<compile_context>
chip_gen: v5e
topology: v5e:2x2
jax: 0.10.0
libtpu: 0.0.40
codegen_flags: <defaults>
</compile_context>

<pallas_src>
import jax
import jax.numpy as jnp
from jax.experimental import pallas as pl
from jax.experimental.pallas import tpu as pltpu

# --- model / problem sizes (small, consistent with the module) -------------
B, N, T = 2, 8, 4                 # batch, num_nodes, time_steps
FEAT, HID, EDGE_DIM = 16, 32, 8   # feature_dim, hidden_dim, edge_dim
HEADS, PRED = 4, 5                # attention heads, num_frames_predict
M = B * N                         # rows fed to the GRU (batch*nodes) = 16
BT = B * T                        # number of (t, b) graphs = 8
BTN = BT * N                      # total node rows across all graphs = 64
HH = HEADS * HID                  # packed head width (= 128, lane dense)
G3 = 3 * HID                      # packed GRU gate width (r, z, n) = 96
OUT = 2 * PRED                    # 10
NEG = -1e30                       # additive mask for non-edges

# --- packed-parameter layout: ONE [WPK_ROWS, WPK_COLS] f32 array, one DMA ---
WPK_COLS = 256
R_G1W  = 0        # [FEAT, HH]        gat1 projection (heads lane-packed)
R_G2W  = 16       # [HID, HH]         gat2 projection
R_ADST = 48       # [HH, 2*HEADS]     block-structured a_dst: lanes 0:4 gat1, 4:8 gat2
R_ASRC = 176      # [2*HEADS, HH]     block-structured a_src rows (gat1 then gat2)
R_REP  = 184      # [HEADS, HEADS*BTN] head-block replication matrix (0/1)
R_WIH0 = 192      # [HID, G3]         GRU layer-0 W_ih
R_WHH0 = 224      # [HID, G3]         GRU layer-0 W_hh
R_W1BD = 256      # [2*HID, 256]      GRU layer-1 block-diag: Wih1 @ cols 0:96, Whh1 @ cols 128:224
R_PW1  = 320      # [HID, HID]        predictor W1
R_PW2  = 352      # [HID, OUT]        predictor W2
R_GB   = 384      # gat biases: lanes 0:HID gat1_b, HID:2*HID gat2_b
R_BIH0 = 385      # [1, G3]
R_BHH0 = 386      # [1, G3]
R_B1   = 387      # [1, 256]: bih1 @ 0:96, bhh1 @ 128:224
R_PB1  = 388      # [1, HID]
R_PB2  = 389      # [1, OUT]
WPK_ROWS = 392
COL_GH1 = 128     # lane offset of the gh half in the fused layer-1 GRU output

# TODO(synk): edge_embedding(edge_feat) is computed in the reference forward but its
# result is never used, so it is omitted here (output is identical without it).


# ---------------------------------------------------------------------------
# GAT layer: one GATConv (heads=HEADS, concat=False -> mean over heads) applied
# to all B*T graphs at once. Heads are packed along lanes both in the projection
# ([BTN, HH]) and in the fused attention slab ([BTN, HEADS*BTN]).
# ---------------------------------------------------------------------------
def _gat_layer(h_in, bias_all, w_packed, a_dst, a_src_t, rep, bias_out):
    # Packed projection: one lane-dense matmul for all heads & graphs.
    hp = jnp.dot(h_in, w_packed, preferred_element_type=jnp.float32)       # [BTN, HH]

    # dst score of node i per head, replicated over its 64-lane head block.
    scores_dst = jnp.dot(hp, a_dst, preferred_element_type=jnp.float32)    # [BTN, HEADS]
    dst_rep = jnp.dot(scores_dst, rep, preferred_element_type=jnp.float32) # [BTN, HEADS*BTN]

    # src score of node j per head, laid out along lanes. NT dot (contract both
    # last dims) avoids any in-kernel transpose.
    src_t = jax.lax.dot_general(a_src_t, hp, (((1,), (1,)), ((), ())),
                                preferred_element_type=jnp.float32)        # [HEADS, BTN]
    src_all = jnp.concatenate([src_t[h:h + 1, :] for h in range(HEADS)],
                              axis=1)                                      # [1, HEADS*BTN]

    # Fused lane-dense slab: e[i, h*BTN + j] = a_dst_h[i] + a_src_h[j]
    e = dst_rep + src_all
    e = jnp.maximum(e, 0.2 * e)                 # LeakyReLU(0.2), 2 VPU ops
    e = e + bias_all                            # additive -1e30 on non-edges
    # One shared row max across the 4 head blocks: exact for softmax (the shift
    # cancels between numerator and per-head denominator); values here are O(1).
    mx = jnp.max(e, axis=1, keepdims=True)      # [BTN, 1]
    p = jnp.exp(e - mx)                         # non-edges underflow to exactly 0.0

    acc = jnp.zeros((BTN, HID), jnp.float32)
    for h in range(HEADS):                      # static unroll over heads
        p_h = p[:, h * BTN:(h + 1) * BTN]                                  # [BTN, BTN]
        num = jnp.dot(p_h, hp[:, h * HID:(h + 1) * HID],
                      preferred_element_type=jnp.float32)                  # [BTN, HID]
        # normalize AFTER the aggregation matmul at [BTN, HID] granularity;
        # self-loops guarantee denom > 0, clamp keeps the approx reciprocal NaN-safe.
        denom = jnp.maximum(jnp.sum(p_h, axis=1, keepdims=True), 1e-30)
        acc = acc + num * pl.reciprocal(denom, approx=True)
    return acc * (1.0 / HEADS) + bias_out       # concat=False -> mean, + bias


# ---------------------------------------------------------------------------
# GRU gate math (PyTorch order r, z, n); gi/gh already include their biases.
# ---------------------------------------------------------------------------
def _gru_gates(gi, gh, h):
    r = jax.nn.sigmoid(gi[:, 0 * HID:1 * HID] + gh[:, 0 * HID:1 * HID])
    z = jax.nn.sigmoid(gi[:, 1 * HID:2 * HID] + gh[:, 1 * HID:2 * HID])
    n = jnp.tanh(gi[:, 2 * HID:3 * HID] + r * gh[:, 2 * HID:3 * HID])
    return (1.0 - z) * n + z * h


# ---------------------------------------------------------------------------
# Fused kernel: GAT x2 -> GRU (2 layers, T steps) -> predictor
# ---------------------------------------------------------------------------
def fused_kernel(x_ref, adjb_ref, wp_ref, out_ref):
    x = x_ref[...]                              # [BTN, FEAT], rows ordered (t, b, n)
    adj_b = adjb_ref[...]                       # [BTN, BTN]  0 / -1e30 additive mask
    # per-head tiled mask bias, built once and shared by both GAT layers
    bias_all = jnp.concatenate([adj_b] * HEADS, axis=1)          # [BTN, HEADS*BTN]

    rep = wp_ref[R_REP:R_REP + HEADS, 0:HEADS * BTN]              # [HEADS, HEADS*BTN]

    # --- spatial GAT stack ---------------------------------------------------
    h1 = _gat_layer(x, bias_all,
                    wp_ref[R_G1W:R_G1W + FEAT, 0:HH],
                    wp_ref[R_ADST:R_ADST + HH, 0:HEADS],
                    wp_ref[R_ASRC:R_ASRC + HEADS, 0:HH],
                    rep,
                    wp_ref[R_GB:R_GB + 1, 0:HID])
    h1 = jnp.maximum(h1, 0.0)                   # relu between gat1 and gat2
    spatial = _gat_layer(h1, bias_all,
                         wp_ref[R_G2W:R_G2W + HID, 0:HH],
                         wp_ref[R_ADST:R_ADST + HH, HEADS:2 * HEADS],
                         wp_ref[R_ASRC + HEADS:R_ASRC + 2 * HEADS, 0:HH],
                         rep,
                         wp_ref[R_GB:R_GB + 1, HID:2 * HID])      # [BTN, HID]

    # --- 2-layer GRU over time, fully in-kernel ------------------------------
    whh0 = wp_ref[R_WHH0:R_WHH0 + HID, 0:G3]
    bhh0 = wp_ref[R_BHH0:R_BHH0 + 1, 0:G3]
    w1bd = wp_ref[R_W1BD:R_W1BD + 2 * HID, :]                     # [2*HID, 256] block-diag
    b1 = wp_ref[R_B1:R_B1 + 1, :]                                 # [1, 256]

    # Layer-0 input gates don't depend on the recurrent state: one matmul for all
    # (t, b, n) rows, then static per-step row slices.
    gi0_all = (jnp.dot(spatial, wp_ref[R_WIH0:R_WIH0 + HID, 0:G3],
                       preferred_element_type=jnp.float32)
               + wp_ref[R_BIH0:R_BIH0 + 1, 0:G3])                 # [BTN, G3]

    h_l0 = jnp.zeros((M, HID), jnp.float32)
    h_l1 = jnp.zeros((M, HID), jnp.float32)
    for t in range(T):                          # static unroll, T = 4
        gi0 = gi0_all[t * M:(t + 1) * M, :]     # rows already ordered b*N + n
        gh0 = jnp.dot(h_l0, whh0, preferred_element_type=jnp.float32) + bhh0
        h_l0 = _gru_gates(gi0, gh0, h_l0)
        # layer 1: gi1 and gh1 in ONE matmul via block-diagonal packed weight
        g1 = jnp.dot(jnp.concatenate([h_l0, h_l1], axis=1), w1bd,
                     preferred_element_type=jnp.float32) + b1     # [M, 256]
        h_l1 = _gru_gates(g1[:, 0:G3], g1[:, COL_GH1:COL_GH1 + G3], h_l1)

    # --- predictor: Linear -> ReLU -> Linear ---------------------------------
    p1 = (jnp.dot(h_l1, wp_ref[R_PW1:R_PW1 + HID, 0:HID],
                  preferred_element_type=jnp.float32)
          + wp_ref[R_PB1:R_PB1 + 1, 0:HID])
    p1 = jnp.maximum(p1, 0.0)
    out_ref[...] = (jnp.dot(p1, wp_ref[R_PW2:R_PW2 + HID, 0:OUT],
                            preferred_element_type=jnp.float32)
                    + wp_ref[R_PB2:R_PB2 + 1, 0:OUT])


# ---------------------------------------------------------------------------
# Wrapper
# ---------------------------------------------------------------------------
def temporal_graph_network_gat(x, adj, wpack):
    # x: [B, N, T, FEAT], adj: [B, T, N, N] with adj[b,t,i,j]=1 iff edge j->i.
    # Rows ordered (t, b, n): index t*B*N + b*N + n, so the GAT output is already
    # in GRU sequence order and time-step slabs are contiguous row slices.
    x_all = jnp.transpose(x, (2, 0, 1, 3)).reshape(BTN, FEAT)
    adj_tb = jnp.transpose(adj, (1, 0, 2, 3)).reshape(BT, N, N)   # graph index t*B + b
    eye_bt = jnp.eye(BT, dtype=jnp.float32)
    adj_big = (eye_bt[:, None, :, None] * adj_tb[:, :, None, :]).reshape(BTN, BTN)
    # additive softmax mask: 0 on edges (incl. self loops), -1e30 elsewhere
    adj_bias = jnp.where(adj_big > 0, 0.0, NEG).astype(jnp.float32)

    vmem = pl.BlockSpec(memory_space=pltpu.MemorySpace.VMEM)
    preds = pl.pallas_call(
        fused_kernel,
        out_shape=jax.ShapeDtypeStruct((M, OUT), jnp.float32),
        in_specs=[vmem, vmem, vmem],
        out_specs=vmem,
    )(x_all, adj_bias, wpack)

    return preds.reshape(B, N, PRED, 2)


# ---------------------------------------------------------------------------
# Deterministic synthetic parameters, packed into one [WPK_ROWS, WPK_COLS] array
# ---------------------------------------------------------------------------
def init_params(key):
    ks = jax.random.split(key, 20)
    nrm = lambda k, shape: (0.1 * jax.random.normal(k, shape)).astype(jnp.float32)

    def pack_heads(w):                 # [HEADS, IN, HID] -> [IN, HEADS*HID]
        return jnp.transpose(w, (1, 0, 2)).reshape(w.shape[1], HH)

    def pack_dst(a):                   # [HEADS, HID] -> [HH, HEADS] block columns
        m = jnp.zeros((HH, HEADS), jnp.float32)
        for h in range(HEADS):
            m = m.at[h * HID:(h + 1) * HID, h].set(a[h])
        return m

    def pack_src(a):                   # [HEADS, HID] -> [HEADS, HH] block rows
        m = jnp.zeros((HEADS, HH), jnp.float32)
        for h in range(HEADS):
            m = m.at[h, h * HID:(h + 1) * HID].set(a[h])
        return m

    g1w = pack_heads(nrm(ks[0], (HEADS, FEAT, HID)))
    g1s = pack_src(nrm(ks[1], (HEADS, HID)))
    g1d = pack_dst(nrm(ks[2], (HEADS, HID)))
    g1b = nrm(ks[3], (1, HID))
    g2w = pack_heads(nrm(ks[4], (HEADS, HID, HID)))
    g2s = pack_src(nrm(ks[5], (HEADS, HID)))
    g2d = pack_dst(nrm(ks[6], (HEADS, HID)))
    g2b = nrm(ks[7], (1, HID))
    wih0 = nrm(ks[8], (HID, G3))
    whh0 = nrm(ks[9], (HID, G3))
    bih0 = nrm(ks[10], (1, G3))
    bhh0 = nrm(ks[11], (1, G3))
    wih1 = nrm(ks[12], (HID, G3))
    whh1 = nrm(ks[13], (HID, G3))
    bih1 = nrm(ks[14], (1, G3))
    bhh1 = nrm(ks[15], (1, G3))
    pw1 = nrm(ks[16], (HID, HID))
    pb1 = nrm(ks[17], (1, HID))
    pw2 = nrm(ks[18], (HID, OUT))
    pb2 = nrm(ks[19], (1, OUT))

    # head-block replication matrix: rep[h, h*BTN:(h+1)*BTN] = 1
    rep = jnp.zeros((HEADS, HEADS * BTN), jnp.float32)
    for h in range(HEADS):
        rep = rep.at[h, h * BTN:(h + 1) * BTN].set(1.0)

    wp = jnp.zeros((WPK_ROWS, WPK_COLS), jnp.float32)
    put = lambda a, r, c, blk: a.at[r:r + blk.shape[0], c:c + blk.shape[1]].set(blk)
    wp = put(wp, R_G1W, 0, g1w)
    wp = put(wp, R_G2W, 0, g2w)
    wp = put(wp, R_ADST, 0, g1d)
    wp = put(wp, R_ADST, HEADS, g2d)
    wp = put(wp, R_ASRC, 0, g1s)
    wp = put(wp, R_ASRC + HEADS, 0, g2s)
    wp = put(wp, R_REP, 0, rep)
    wp = put(wp, R_WIH0, 0, wih0)
    wp = put(wp, R_WHH0, 0, whh0)
    wp = put(wp, R_W1BD, 0, wih1)              # layer-1 block-diag, gi block
    wp = put(wp, R_W1BD + HID, COL_GH1, whh1)  # layer-1 block-diag, gh block
    wp = put(wp, R_PW1, 0, pw1)
    wp = put(wp, R_PW2, 0, pw2)
    wp = put(wp, R_GB, 0, g1b)
    wp = put(wp, R_GB, HID, g2b)
    wp = put(wp, R_BIH0, 0, bih0)
    wp = put(wp, R_BHH0, 0, bhh0)
    wp = put(wp, R_B1, 0, bih1)
    wp = put(wp, R_B1, COL_GH1, bhh1)
    wp = put(wp, R_PB1, 0, pb1)
    wp = put(wp, R_PB2, 0, pb2)
    return wp


if __name__ == "__main__":
    key = jax.random.PRNGKey(0)
    kx, kadj, kp = jax.random.split(key, 3)

    x = jax.random.normal(kx, (B, N, T, FEAT), dtype=jnp.float32)
    rand_adj = (jax.random.uniform(kadj, (B, T, N, N)) < 0.4).astype(jnp.float32)
    adj = jnp.maximum(rand_adj, jnp.eye(N, dtype=jnp.float32))   # self loops (add_self_loops)

    wpack = init_params(kp)

    out = jax.jit(temporal_graph_network_gat)(x, adj, wpack)
    out = jax.block_until_ready(out)
    assert out.shape == (B, N, PRED, 2) and out.dtype == jnp.float32
    assert bool(jnp.all(jnp.isfinite(out)))
    print("KERNEL_OK")
</pallas_src>

<mosaic_0001>
module attributes {stable_mosaic.version = 11 : i64} {
  func.func @fused_kernel(%arg0: memref<64x16xf32, #tpu.memory_space<vmem>>, %arg1: memref<64x64xf32, #tpu.memory_space<vmem>>, %arg2: memref<392x256xf32, #tpu.memory_space<vmem>>, %arg3: memref<16x10xf32, #tpu.memory_space<vmem>>) attributes {dimension_semantics = [], scalar_prefetch = 0 : i64, scratch_operands = 0 : i64, tpu.core_type = #tpu.core_type<tc>} {
    %c0 = arith.constant 0 : index
    %c0_0 = arith.constant 0 : index
    %0 = vector.load %arg0[%c0, %c0_0] : memref<64x16xf32, #tpu.memory_space<vmem>>, vector<64x16xf32>
    %c0_1 = arith.constant 0 : index
    %c0_2 = arith.constant 0 : index
    %1 = vector.load %arg1[%c0_1, %c0_2] : memref<64x64xf32, #tpu.memory_space<vmem>>, vector<64x64xf32>
    %2 = tpu.concatenate %1, %1, %1, %1 in 1 : vector<64x64xf32>, vector<64x64xf32>, vector<64x64xf32>, vector<64x64xf32> -> vector<64x256xf32>
    %c184 = arith.constant 184 : index
    %c0_3 = arith.constant 0 : index
    %3 = vector.load %arg2[%c184, %c0_3] : memref<392x256xf32, #tpu.memory_space<vmem>>, vector<4x256xf32>
    %c0_4 = arith.constant 0 : index
    %c0_5 = arith.constant 0 : index
    %4 = vector.load %arg2[%c0_4, %c0_5] : memref<392x256xf32, #tpu.memory_space<vmem>>, vector<16x128xf32>
    %c48 = arith.constant 48 : index
    %c0_6 = arith.constant 0 : index
    %5 = vector.load %arg2[%c48, %c0_6] : memref<392x256xf32, #tpu.memory_space<vmem>>, vector<128x4xf32>
    %c176 = arith.constant 176 : index
    %c0_7 = arith.constant 0 : index
    %6 = vector.load %arg2[%c176, %c0_7] : memref<392x256xf32, #tpu.memory_space<vmem>>, vector<4x128xf32>
    %c384 = arith.constant 384 : index
    %c0_8 = arith.constant 0 : index
    %7 = vector.load %arg2[%c384, %c0_8] : memref<392x256xf32, #tpu.memory_space<vmem>>, vector<1x32xf32>
    %cst = arith.constant dense<0.000000e+00> : vector<64x128xf32>
    %8 = tpu.matmul %0, %4, %cst {dimension_numbers = #tpu.dot_dimension_numbers<[1], [0], [0], [1], [0, 0, 1, 1], [], []>} : vector<64x16xf32>, vector<16x128xf32>, vector<64x128xf32> -> vector<64x128xf32>
    %cst_9 = arith.constant dense<0.000000e+00> : vector<64x4xf32>
    %9 = tpu.matmul %8, %5, %cst_9 {dimension_numbers = #tpu.dot_dimension_numbers<[1], [0], [0], [1], [0, 0, 1, 1], [], []>} : vector<64x128xf32>, vector<128x4xf32>, vector<64x4xf32> -> vector<64x4xf32>
    %cst_10 = arith.constant dense<0.000000e+00> : vector<64x256xf32>
    %10 = tpu.matmul %9, %3, %cst_10 {dimension_numbers = #tpu.dot_dimension_numbers<[1], [0], [0], [1], [0, 0, 1, 1], [], []>} : vector<64x4xf32>, vector<4x256xf32>, vector<64x256xf32> -> vector<64x256xf32>
    %cst_11 = arith.constant dense<0.000000e+00> : vector<4x64xf32>
    %11 = tpu.matmul %6, %8, %cst_11 {dimension_numbers = #tpu.dot_dimension_numbers<[1], [1], [0], [0], [0, 0, 1, 0], [], []>} : vector<4x128xf32>, vector<64x128xf32>, vector<4x64xf32> -> vector<4x64xf32>
    %12 = vector.extract_strided_slice %11 {offsets = [0, 0], sizes = [1, 64], strides = [1, 1]} : vector<4x64xf32> to vector<1x64xf32>
    %13 = vector.extract_strided_slice %11 {offsets = [1, 0], sizes = [1, 64], strides = [1, 1]} : vector<4x64xf32> to vector<1x64xf32>
    %14 = vector.extract_strided_slice %11 {offsets = [2, 0], sizes = [1, 64], strides = [1, 1]} : vector<4x64xf32> to vector<1x64xf32>
    %15 = vector.extract_strided_slice %11 {offsets = [3, 0], sizes = [1, 64], strides = [1, 1]} : vector<4x64xf32> to vector<1x64xf32>
    %16 = tpu.concatenate %12, %13, %14, %15 in 1 : vector<1x64xf32>, vector<1x64xf32>, vector<1x64xf32>, vector<1x64xf32> -> vector<1x256xf32>
    %17 = vector.broadcast %16 : vector<1x256xf32> to vector<64x256xf32>
    %18 = arith.addf %10, %17 : vector<64x256xf32>
    %cst_12 = arith.constant 2.000000e-01 : f32
    %19 = vector.broadcast %cst_12 : f32 to vector<64x256xf32>
    %20 = arith.mulf %19, %18 : vector<64x256xf32>
    %21 = arith.maximumf %18, %20 : vector<64x256xf32>
    %22 = arith.addf %21, %2 : vector<64x256xf32>
    %cst_13 = arith.constant dense<0xFF800000> : vector<64xf32>
    %23 = vector.multi_reduction <maximumf>, %22, %cst_13 [1] : vector<64x256xf32> to vector<64xf32>
    %24 = vector.shape_cast %23 : vector<64xf32> to vector<64x1xf32>
    %25 = vector.broadcast %24 : vector<64x1xf32> to vector<64x256xf32>
    %26 = arith.subf %22, %25 : vector<64x256xf32>
    %27 = math.exp %26 : vector<64x256xf32>
    %cst_14 = arith.constant 0.000000e+00 : f32
    %28 = vector.broadcast %cst_14 : f32 to vector<64x32xf32>
    %29 = vector.extract_strided_slice %27 {offsets = [0, 0], sizes = [64, 64], strides = [1, 1]} : vector<64x256xf32> to vector<64x64xf32>
    %30 = vector.extract_strided_slice %8 {offsets = [0, 0], sizes = [64, 32], strides = [1, 1]} : vector<64x128xf32> to vector<64x32xf32>
    %cst_15 = arith.constant dense<0.000000e+00> : vector<64x32xf32>
    %31 = tpu.matmul %29, %30, %cst_15 {dimension_numbers = #tpu.dot_dimension_numbers<[1], [0], [0], [1], [0, 0, 1, 1], [], []>} : vector<64x64xf32>, vector<64x32xf32>, vector<64x32xf32> -> vector<64x32xf32>
    %cst_16 = arith.constant dense<0.000000e+00> : vector<64xf32>
    %32 = vector.multi_reduction <add>, %29, %cst_16 [1] : vector<64x64xf32> to vector<64xf32>
    %33 = vector.shape_cast %32 : vector<64xf32> to vector<64x1xf32>
    %cst_17 = arith.constant 1.000000e-30 : f32
    %34 = vector.broadcast %cst_17 : f32 to vector<64x1xf32>
    %35 = arith.maximumf %33, %34 : vector<64x1xf32>
    %36 = tpu.reciprocal %35 {approx = true} : vector<64x1xf32> -> vector<64x1xf32>
    %37 = vector.broadcast %36 : vector<64x1xf32> to vector<64x32xf32>
    %38 = arith.mulf %31, %37 : vector<64x32xf32>
    %39 = arith.addf %28, %38 : vector<64x32xf32>
    %40 = vector.extract_strided_slice %27 {offsets = [0, 64], sizes = [64, 64], strides = [1, 1]} : vector<64x256xf32> to vector<64x64xf32>
    %41 = vector.extract_strided_slice %8 {offsets = [0, 32], sizes = [64, 32], strides = [1, 1]} : vector<64x128xf32> to vector<64x32xf32>
    %cst_18 = arith.constant dense<0.000000e+00> : vector<64x32xf32>
    %42 = tpu.matmul %40, %41, %cst_18 {dimension_numbers = #tpu.dot_dimension_numbers<[1], [0], [0], [1], [0, 0, 1, 1], [], []>} : vector<64x64xf32>, vector<64x32xf32>, vector<64x32xf32> -> vector<64x32xf32>
    %cst_19 = arith.constant dense<0.000000e+00> : vector<64xf32>
    %43 = vector.multi_reduction <add>, %40, %cst_19 [1] : vector<64x64xf32> to vector<64xf32>
    %44 = vector.shape_cast %43 : vector<64xf32> to vector<64x1xf32>
    %cst_20 = arith.constant 1.000000e-30 : f32
    %45 = vector.broadcast %cst_20 : f32 to vector<64x1xf32>
    %46 = arith.maximumf %44, %45 : vector<64x1xf32>
    %47 = tpu.reciprocal %46 {approx = true} : vector<64x1xf32> -> vector<64x1xf32>
    %48 = vector.broadcast %47 : vector<64x1xf32> to vector<64x32xf32>
    %49 = arith.mulf %42, %48 : vector<64x32xf32>
    %50 = arith.addf %39, %49 : vector<64x32xf32>
    %51 = vector.extract_strided_slice %27 {offsets = [0, 128], sizes = [64, 64], strides = [1, 1]} : vector<64x256xf32> to vector<64x64xf32>
    %52 = vector.extract_strided_slice %8 {offsets = [0, 64], sizes = [64, 32], strides = [1, 1]} : vector<64x128xf32> to vector<64x32xf32>
    %cst_21 = arith.constant dense<0.000000e+00> : vector<64x32xf32>
    %53 = tpu.matmul %51, %52, %cst_21 {dimension_numbers = #tpu.dot_dimension_numbers<[1], [0], [0], [1], [0, 0, 1, 1], [], []>} : vector<64x64xf32>, vector<64x32xf32>, vector<64x32xf32> -> vector<64x32xf32>
    %cst_22 = arith.constant dense<0.000000e+00> : vector<64xf32>
    %54 = vector.multi_reduction <add>, %51, %cst_22 [1] : vector<64x64xf32> to vector<64xf32>
    %55 = vector.shape_cast %54 : vector<64xf32> to vector<64x1xf32>
    %cst_23 = arith.constant 1.000000e-30 : f32
    %56 = vector.broadcast %cst_23 : f32 to vector<64x1xf32>
    %57 = arith.maximumf %55, %56 : vector<64x1xf32>
    %58 = tpu.reciprocal %57 {approx = true} : vector<64x1xf32> -> vector<64x1xf32>
    %59 = vector.broadcast %58 : vector<64x1xf32> to vector<64x32xf32>
    %60 = arith.mulf %53, %59 : vector<64x32xf32>
    %61 = arith.addf %50, %60 : vector<64x32xf32>
    %62 = vector.extract_strided_slice %27 {offsets = [0, 192], sizes = [64, 64], strides = [1, 1]} : vector<64x256xf32> to vector<64x64xf32>
    %63 = vector.extract_strided_slice %8 {offsets = [0, 96], sizes = [64, 32], strides = [1, 1]} : vector<64x128xf32> to vector<64x32xf32>
    %cst_24 = arith.constant dense<0.000000e+00> : vector<64x32xf32>
    %64 = tpu.matmul %62, %63, %cst_24 {dimension_numbers = #tpu.dot_dimension_numbers<[1], [0], [0], [1], [0, 0, 1, 1], [], []>} : vector<64x64xf32>, vector<64x32xf32>, vector<64x32xf32> -> vector<64x32xf32>
    %cst_25 = arith.constant dense<0.000000e+00> : vector<64xf32>
    %65 = vector.multi_reduction <add>, %62, %cst_25 [1] : vector<64x64xf32> to vector<64xf32>
    %66 = vector.shape_cast %65 : vector<64xf32> to vector<64x1xf32>
    %cst_26 = arith.constant 1.000000e-30 : f32
    %67 = vector.broadcast %cst_26 : f32 to vector<64x1xf32>
    %68 = arith.maximumf %66, %67 : vector<64x1xf32>
    %69 = tpu.reciprocal %68 {approx = true} : vector<64x1xf32> -> vector<64x1xf32>
    %70 = vector.broadcast %69 : vector<64x1xf32> to vector<64x32xf32>
    %71 = arith.mulf %64, %70 : vector<64x32xf32>
    %72 = arith.addf %61, %71 : vector<64x32xf32>
    %cst_27 = arith.constant 2.500000e-01 : f32
    %73 = vector.broadcast %cst_27 : f32 to vector<64x32xf32>
    %74 = arith.mulf %72, %73 : vector<64x32xf32>
    %75 = vector.broadcast %7 : vector<1x32xf32> to vector<64x32xf32>
    %76 = arith.addf %74, %75 : vector<64x32xf32>
    %cst_28 = arith.constant 0.000000e+00 : f32
    %77 = vector.broadcast %cst_28 : f32 to vector<64x32xf32>
    %78 = arith.maximumf %76, %77 : vector<64x32xf32>
    %c16 = arith.constant 16 : index
    %c0_29 = arith.constant 0 : index
    %79 = vector.load %arg2[%c16, %c0_29] : memref<392x256xf32, #tpu.memory_space<vmem>>, vector<32x128xf32>
    %c48_30 = arith.constant 48 : index
    %c4 = arith.constant 4 : index
    %80 = vector.load %arg2[%c48_30, %c4] : memref<392x256xf32, #tpu.memory_space<vmem>>, vector<128x4xf32>
    %c180 = arith.constant 180 : index
    %c0_31 = arith.constant 0 : index
    %81 = vector.load %arg2[%c180, %c0_31] : memref<392x256xf32, #tpu.memory_space<vmem>>, vector<4x128xf32>
    %c384_32 = arith.constant 384 : index
    %c32 = arith.constant 32 : index
    %82 = vector.load %arg2[%c384_32, %c32] : memref<392x256xf32, #tpu.memory_space<vmem>>, vector<1x32xf32>
    %cst_33 = arith.constant dense<0.000000e+00> : vector<64x128xf32>
    %83 = tpu.matmul %78, %79, %cst_33 {dimension_numbers = #tpu.dot_dimension_numbers<[1], [0], [0], [1], [0, 0, 1, 1], [], []>} : vector<64x32xf32>, vector<32x128xf32>, vector<64x128xf32> -> vector<64x128xf32>
    %cst_34 = arith.constant dense<0.000000e+00> : vector<64x4xf32>
    %84 = tpu.matmul %83, %80, %cst_34 {dimension_numbers = #tpu.dot_dimension_numbers<[1], [0], [0], [1], [0, 0, 1, 1], [], []>} : vector<64x128xf32>, vector<128x4xf32>, vector<64x4xf32> -> vector<64x4xf32>
    %cst_35 = arith.constant dense<0.000000e+00> : vector<64x256xf32>
    %85 = tpu.matmul %84, %3, %cst_35 {dimension_numbers = #tpu.dot_dimension_numbers<[1], [0], [0], [1], [0, 0, 1, 1], [], []>} : vector<64x4xf32>, vector<4x256xf32>, vector<64x256xf32> -> vector<64x256xf32>
    %cst_36 = arith.constant dense<0.000000e+00> : vector<4x64xf32>
    %86 = tpu.matmul %81, %83, %cst_36 {dimension_numbers = #tpu.dot_dimension_numbers<[1], [1], [0], [0], [0, 0, 1, 0], [], []>} : vector<4x128xf32>, vector<64x128xf32>, vector<4x64xf32> -> vector<4x64xf32>
    %87 = vector.extract_strided_slice %86 {offsets = [0, 0], sizes = [1, 64], strides = [1, 1]} : vector<4x64xf32> to vector<1x64xf32>
    %88 = vector.extract_strided_slice %86 {offsets = [1, 0], sizes = [1, 64], strides = [1, 1]} : vector<4x64xf32> to vector<1x64xf32>
    %89 = vector.extract_strided_slice %86 {offsets = [2, 0], sizes = [1, 64], strides = [1, 1]} : vector<4x64xf32> to vector<1x64xf32>
    %90 = vector.extract_strided_slice %86 {offsets = [3, 0], sizes = [1, 64], strides = [1, 1]} : vector<4x64xf32> to vector<1x64xf32>
    %91 = tpu.concatenate %87, %88, %89, %90 in 1 : vector<1x64xf32>, vector<1x64xf32>, vector<1x64xf32>, vector<1x64xf32> -> vector<1x256xf32>
    %92 = vector.broadcast %91 : vector<1x256xf32> to vector<64x256xf32>
    %93 = arith.addf %85, %92 : vector<64x256xf32>
    %cst_37 = arith.constant 2.000000e-01 : f32
    %94 = vector.broadcast %cst_37 : f32 to vector<64x256xf32>
    %95 = arith.mulf %94, %93 : vector<64x256xf32>
    %96 = arith.maximumf %93, %95 : vector<64x256xf32>
    %97 = arith.addf %96, %2 : vector<64x256xf32>
    %cst_38 = arith.constant dense<0xFF800000> : vector<64xf32>
    %98 = vector.multi_reduction <maximumf>, %97, %cst_38 [1] : vector<64x256xf32> to vector<64xf32>
    %99 = vector.shape_cast %98 : vector<64xf32> to vector<64x1xf32>
    %100 = vector.broadcast %99 : vector<64x1xf32> to vector<64x256xf32>
    %101 = arith.subf %97, %100 : vector<64x256xf32>
    %102 = math.exp %101 : vector<64x256xf32>
    %cst_39 = arith.constant 0.000000e+00 : f32
    %103 = vector.broadcast %cst_39 : f32 to vector<64x32xf32>
    %104 = vector.extract_strided_slice %102 {offsets = [0, 0], sizes = [64, 64], strides = [1, 1]} : vector<64x256xf32> to vector<64x64xf32>
    %105 = vector.extract_strided_slice %83 {offsets = [0, 0], sizes = [64, 32], strides = [1, 1]} : vector<64x128xf32> to vector<64x32xf32>
    %cst_40 = arith.constant dense<0.000000e+00> : vector<64x32xf32>
    %106 = tpu.matmul %104, %105, %cst_40 {dimension_numbers = #tpu.dot_dimension_numbers<[1], [0], [0], [1], [0, 0, 1, 1], [], []>} : vector<64x64xf32>, vector<64x32xf32>, vector<64x32xf32> -> vector<64x32xf32>
    %cst_41 = arith.constant dense<0.000000e+00> : vector<64xf32>
    %107 = vector.multi_reduction <add>, %104, %cst_41 [1] : vector<64x64xf32> to vector<64xf32>
    %108 = vector.shape_cast %107 : vector<64xf32> to vector<64x1xf32>
    %cst_42 = arith.constant 1.000000e-30 : f32
    %109 = vector.broadcast %cst_42 : f32 to vector<64x1xf32>
    %110 = arith.maximumf %108, %109 : vector<64x1xf32>
    %111 = tpu.reciprocal %110 {approx = true} : vector<64x1xf32> -> vector<64x1xf32>
    %112 = vector.broadcast %111 : vector<64x1xf32> to vector<64x32xf32>
    %113 = arith.mulf %106, %112 : vector<64x32xf32>
    %114 = arith.addf %103, %113 : vector<64x32xf32>
    %115 = vector.extract_strided_slice %102 {offsets = [0, 64], sizes = [64, 64], strides = [1, 1]} : vector<64x256xf32> to vector<64x64xf32>
    %116 = vector.extract_strided_slice %83 {offsets = [0, 32], sizes = [64, 32], strides = [1, 1]} : vector<64x128xf32> to vector<64x32xf32>
    %cst_43 = arith.constant dense<0.000000e+00> : vector<64x32xf32>
    %117 = tpu.matmul %115, %116, %cst_43 {dimension_numbers = #tpu.dot_dimension_numbers<[1], [0], [0], [1], [0, 0, 1, 1], [], []>} : vector<64x64xf32>, vector<64x32xf32>, vector<64x32xf32> -> vector<64x32xf32>
    %cst_44 = arith.constant dense<0.000000e+00> : vector<64xf32>
    %118 = vector.multi_reduction <add>, %115, %cst_44 [1] : vector<64x64xf32> to vector<64xf32>
    %119 = vector.shape_cast %118 : vector<64xf32> to vector<64x1xf32>
    %cst_45 = arith.constant 1.000000e-30 : f32
    %120 = vector.broadcast %cst_45 : f32 to vector<64x1xf32>
    %121 = arith.maximumf %119, %120 : vector<64x1xf32>
    %122 = tpu.reciprocal %121 {approx = true} : vector<64x1xf32> -> vector<64x1xf32>
    %123 = vector.broadcast %122 : vector<64x1xf32> to vector<64x32xf32>
    %124 = arith.mulf %117, %123 : vector<64x32xf32>
    %125 = arith.addf %114, %124 : vector<64x32xf32>
    %126 = vector.extract_strided_slice %102 {offsets = [0, 128], sizes = [64, 64], strides = [1, 1]} : vector<64x256xf32> to vector<64x64xf32>
    %127 = vector.extract_strided_slice %83 {offsets = [0, 64], sizes = [64, 32], strides = [1, 1]} : vector<64x128xf32> to vector<64x32xf32>
    %cst_46 = arith.constant dense<0.000000e+00> : vector<64x32xf32>
    %128 = tpu.matmul %126, %127, %cst_46 {dimension_numbers = #tpu.dot_dimension_numbers<[1], [0], [0], [1], [0, 0, 1, 1], [], []>} : vector<64x64xf32>, vector<64x32xf32>, vector<64x32xf32> -> vector<64x32xf32>
    %cst_47 = arith.constant dense<0.000000e+00> : vector<64xf32>
    %129 = vector.multi_reduction <add>, %126, %cst_47 [1] : vector<64x64xf32> to vector<64xf32>
    %130 = vector.shape_cast %129 : vector<64xf32> to vector<64x1xf32>
    %cst_48 = arith.constant 1.000000e-30 : f32
    %131 = vector.broadcast %cst_48 : f32 to vector<64x1xf32>
    %132 = arith.maximumf %130, %131 : vector<64x1xf32>
    %133 = tpu.reciprocal %132 {approx = true} : vector<64x1xf32> -> vector<64x1xf32>
    %134 = vector.broadcast %133 : vector<64x1xf32> to vector<64x32xf32>
    %135 = arith.mulf %128, %134 : vector<64x32xf32>
    %136 = arith.addf %125, %135 : vector<64x32xf32>
    %137 = vector.extract_strided_slice %102 {offsets = [0, 192], sizes = [64, 64], strides = [1, 1]} : vector<64x256xf32> to vector<64x64xf32>
    %138 = vector.extract_strided_slice %83 {offsets = [0, 96], sizes = [64, 32], strides = [1, 1]} : vector<64x128xf32> to vector<64x32xf32>
    %cst_49 = arith.constant dense<0.000000e+00> : vector<64x32xf32>
    %139 = tpu.matmul %137, %138, %cst_49 {dimension_numbers = #tpu.dot_dimension_numbers<[1], [0], [0], [1], [0, 0, 1, 1], [], []>} : vector<64x64xf32>, vector<64x32xf32>, vector<64x32xf32> -> vector<64x32xf32>
    %cst_50 = arith.constant dense<0.000000e+00> : vector<64xf32>
    %140 = vector.multi_reduction <add>, %137, %cst_50 [1] : vector<64x64xf32> to vector<64xf32>
    %141 = vector.shape_cast %140 : vector<64xf32> to vector<64x1xf32>
    %cst_51 = arith.constant 1.000000e-30 : f32
    %142 = vector.broadcast %cst_51 : f32 to vector<64x1xf32>
    %143 = arith.maximumf %141, %142 : vector<64x1xf32>
    %144 = tpu.reciprocal %143 {approx = true} : vector<64x1xf32> -> vector<64x1xf32>
    %145 = vector.broadcast %144 : vector<64x1xf32> to vector<64x32xf32>
    %146 = arith.mulf %139, %145 : vector<64x32xf32>
    %147 = arith.addf %136, %146 : vector<64x32xf32>
    %cst_52 = arith.constant 2.500000e-01 : f32
    %148 = vector.broadcast %cst_52 : f32 to vector<64x32xf32>
    %149 = arith.mulf %147, %148 : vector<64x32xf32>
    %150 = vector.broadcast %82 : vector<1x32xf32> to vector<64x32xf32>
    %151 = arith.addf %149, %150 : vector<64x32xf32>
    %c224 = arith.constant 224 : index
    %c0_53 = arith.constant 0 : index
    %152 = vector.load %arg2[%c224, %c0_53] : memref<392x256xf32, #tpu.memory_space<vmem>>, vector<32x96xf32>
    %c386 = arith.constant 386 : index
    %c0_54 = arith.constant 0 : index
    %153 = vector.load %arg2[%c386, %c0_54] : memref<392x256xf32, #tpu.memory_space<vmem>>, vector<1x96xf32>
    %c256 = arith.constant 256 : index
    %c0_55 = arith.constant 0 : index
    %154 = vector.load %arg2[%c256, %c0_55] : memref<392x256xf32, #tpu.memory_space<vmem>>, vector<64x256xf32>
    %c387 = arith.constant 387 : index
    %c0_56 = arith.constant 0 : index
    %155 = vector.load %arg2[%c387, %c0_56] : memref<392x256xf32, #tpu.memory_space<vmem>>, vector<1x256xf32>
    %c192 = arith.constant 192 : index
    %c0_57 = arith.constant 0 : index
    %156 = vector.load %arg2[%c192, %c0_57] : memref<392x256xf32, #tpu.memory_space<vmem>>, vector<32x96xf32>
    %cst_58 = arith.constant dense<0.000000e+00> : vector<64x96xf32>
    %157 = tpu.matmul %151, %156, %cst_58 {dimension_numbers = #tpu.dot_dimension_numbers<[1], [0], [0], [1], [0, 0, 1, 1], [], []>} : vector<64x32xf32>, vector<32x96xf32>, vector<64x96xf32> -> vector<64x96xf32>
    %c385 = arith.constant 385 : index
    %c0_59 = arith.constant 0 : index
    %158 = vector.load %arg2[%c385, %c0_59] : memref<392x256xf32, #tpu.memory_space<vmem>>, vector<1x96xf32>
    %159 = vector.broadcast %158 : vector<1x96xf32> to vector<64x96xf32>
    %160 = arith.addf %157, %159 : vector<64x96xf32>
    %cst_60 = arith.constant 0.000000e+00 : f32
    %161 = vector.broadcast %cst_60 : f32 to vector<16x32xf32>
    %cst_61 = arith.constant 0.000000e+00 : f32
    %162 = vector.broadcast %cst_61 : f32 to vector<16x32xf32>
    %163 = vector.extract_strided_slice %160 {offsets = [0, 0], sizes = [16, 96], strides = [1, 1]} : vector<64x96xf32> to vector<16x96xf32>
    %cst_62 = arith.constant dense<0.000000e+00> : vector<16x96xf32>
    %164 = tpu.matmul %161, %152, %cst_62 {dimension_numbers = #tpu.dot_dimension_numbers<[1], [0], [0], [1], [0, 0, 1, 1], [], []>} : vector<16x32xf32>, vector<32x96xf32>, vector<16x96xf32> -> vector<16x96xf32>
    %165 = vector.broadcast %153 : vector<1x96xf32> to vector<16x96xf32>
    %166 = arith.addf %164, %165 : vector<16x96xf32>
    %167 = vector.extract_strided_slice %163 {offsets = [0, 0], sizes = [16, 32], strides = [1, 1]} : vector<16x96xf32> to vector<16x32xf32>
    %168 = vector.extract_strided_slice %166 {offsets = [0, 0], sizes = [16, 32], strides = [1, 1]} : vector<16x96xf32> to vector<16x32xf32>
    %169 = arith.addf %167, %168 : vector<16x32xf32>
    %170 = arith.negf %169 : vector<16x32xf32>
    %171 = math.exp %170 : vector<16x32xf32>
    %cst_63 = arith.constant 1.000000e+00 : f32
    %172 = vector.broadcast %cst_63 : f32 to vector<16x32xf32>
    %173 = arith.addf %172, %171 : vector<16x32xf32>
    %174 = arith.divf %172, %173 : vector<16x32xf32>
    %175 = vector.extract_strided_slice %163 {offsets = [0, 32], sizes = [16, 32], strides = [1, 1]} : vector<16x96xf32> to vector<16x32xf32>
    %176 = vector.extract_strided_slice %166 {offsets = [0, 32], sizes = [16, 32], strides = [1, 1]} : vector<16x96xf32> to vector<16x32xf32>
    %177 = arith.addf %175, %176 : vector<16x32xf32>
    %178 = arith.negf %177 : vector<16x32xf32>
    %179 = math.exp %178 : vector<16x32xf32>
    %cst_64 = arith.constant 1.000000e+00 : f32
    %180 = vector.broadcast %cst_64 : f32 to vector<16x32xf32>
    %181 = arith.addf %180, %179 : vector<16x32xf32>
    %182 = arith.divf %180, %181 : vector<16x32xf32>
    %183 = vector.extract_strided_slice %163 {offsets = [0, 64], sizes = [16, 32], strides = [1, 1]} : vector<16x96xf32> to vector<16x32xf32>
    %184 = vector.extract_strided_slice %166 {offsets = [0, 64], sizes = [16, 32], strides = [1, 1]} : vector<16x96xf32> to vector<16x32xf32>
    %185 = arith.mulf %174, %184 : vector<16x32xf32>
    %186 = arith.addf %183, %185 : vector<16x32xf32>
    %187 = math.tanh %186 : vector<16x32xf32>
    %cst_65 = arith.constant 1.000000e+00 : f32
    %188 = vector.broadcast %cst_65 : f32 to vector<16x32xf32>
    %189 = arith.subf %188, %182 : vector<16x32xf32>
    %190 = arith.mulf %189, %187 : vector<16x32xf32>
    %191 = arith.mulf %182, %161 : vector<16x32xf32>
    %192 = arith.addf %190, %191 : vector<16x32xf32>
    %193 = tpu.concatenate %192, %162 in 1 : vector<16x32xf32>, vector<16x32xf32> -> vector<16x64xf32>
    %cst_66 = arith.constant dense<0.000000e+00> : vector<16x256xf32>
    %194 = tpu.matmul %193, %154, %cst_66 {dimension_numbers = #tpu.dot_dimension_numbers<[1], [0], [0], [1], [0, 0, 1, 1], [], []>} : vector<16x64xf32>, vector<64x256xf32>, vector<16x256xf32> -> vector<16x256xf32>
    %195 = vector.broadcast %155 : vector<1x256xf32> to vector<16x256xf32>
    %196 = arith.addf %194, %195 : vector<16x256xf32>
    %197 = vector.extract_strided_slice %196 {offsets = [0, 0], sizes = [16, 96], strides = [1, 1]} : vector<16x256xf32> to vector<16x96xf32>
    %198 = vector.extract_strided_slice %196 {offsets = [0, 128], sizes = [16, 96], strides = [1, 1]} : vector<16x256xf32> to vector<16x96xf32>
    %199 = vector.extract_strided_slice %197 {offsets = [0, 0], sizes = [16, 32], strides = [1, 1]} : vector<16x96xf32> to vector<16x32xf32>
    %200 = vector.extract_strided_slice %198 {offsets = [0, 0], sizes = [16, 32], strides = [1, 1]} : vector<16x96xf32> to vector<16x32xf32>
    %201 = arith.addf %199, %200 : vector<16x32xf32>
    %202 = arith.negf %201 : vector<16x32xf32>
    %203 = math.exp %202 : vector<16x32xf32>
    %cst_67 = arith.constant 1.000000e+00 : f32
    %204 = vector.broadcast %cst_67 : f32 to vector<16x32xf32>
    %205 = arith.addf %204, %203 : vector<16x32xf32>
    %206 = arith.divf %204, %205 : vector<16x32xf32>
    %207 = vector.extract_strided_slice %197 {offsets = [0, 32], sizes = [16, 32], strides = [1, 1]} : vector<16x96xf32> to vector<16x32xf32>
    %208 = vector.extract_strided_slice %198 {offsets = [0, 32], sizes = [16, 32], strides = [1, 1]} : vector<16x96xf32> to vector<16x32xf32>
    %209 = arith.addf %207, %208 : vector<16x32xf32>
    %210 = arith.negf %209 : vector<16x32xf32>
    %211 = math.exp %210 : vector<16x32xf32>
    %cst_68 = arith.constant 1.000000e+00 : f32
    %212 = vector.broadcast %cst_68 : f32 to vector<16x32xf32>
    %213 = arith.addf %212, %211 : vector<16x32xf32>
    %214 = arith.divf %212, %213 : vector<16x32xf32>
    %215 = vector.extract_strided_slice %197 {offsets = [0, 64], sizes = [16, 32], strides = [1, 1]} : vector<16x96xf32> to vector<16x32xf32>
    %216 = vector.extract_strided_slice %198 {offsets = [0, 64], sizes = [16, 32], strides = [1, 1]} : vector<16x96xf32> to vector<16x32xf32>
    %217 = arith.mulf %206, %216 : vector<16x32xf32>
    %218 = arith.addf %215, %217 : vector<16x32xf32>
    %219 = math.tanh %218 : vector<16x32xf32>
    %cst_69 = arith.constant 1.000000e+00 : f32
    %220 = vector.broadcast %cst_69 : f32 to vector<16x32xf32>
    %221 = arith.subf %220, %214 : vector<16x32xf32>
    %222 = arith.mulf %221, %219 : vector<16x32xf32>
    %223 = arith.mulf %214, %162 : vector<16x32xf32>
    %224 = arith.addf %222, %223 : vector<16x32xf32>
    %225 = vector.extract_strided_slice %160 {offsets = [16, 0], sizes = [16, 96], strides = [1, 1]} : vector<64x96xf32> to vector<16x96xf32>
    %cst_70 = arith.constant dense<0.000000e+00> : vector<16x96xf32>
    %226 = tpu.matmul %192, %152, %cst_70 {dimension_numbers = #tpu.dot_dimension_numbers<[1], [0], [0], [1], [0, 0, 1, 1], [], []>} : vector<16x32xf32>, vector<32x96xf32>, vector<16x96xf32> -> vector<16x96xf32>
    %227 = vector.broadcast %153 : vector<1x96xf32> to vector<16x96xf32>
    %228 = arith.addf %226, %227 : vector<16x96xf32>
    %229 = vector.extract_strided_slice %225 {offsets = [0, 0], sizes = [16, 32], strides = [1, 1]} : vector<16x96xf32> to vector<16x32xf32>
    %230 = vector.extract_strided_slice %228 {offsets = [0, 0], sizes = [16, 32], strides = [1, 1]} : vector<16x96xf32> to vector<16x32xf32>
    %231 = arith.addf %229, %230 : vector<16x32xf32>
    %232 = arith.negf %231 : vector<16x32xf32>
    %233 = math.exp %232 : vector<16x32xf32>
    %cst_71 = arith.constant 1.000000e+00 : f32
    %234 = vector.broadcast %cst_71 : f32 to vector<16x32xf32>
    %235 = arith.addf %234, %233 : vector<16x32xf32>
    %236 = arith.divf %234, %235 : vector<16x32xf32>
    %237 = vector.extract_strided_slice %225 {offsets = [0, 32], sizes = [16, 32], strides = [1, 1]} : vector<16x96xf32> to vector<16x32xf32>
    %238 = vector.extract_strided_slice %228 {offsets = [0, 32], sizes = [16, 32], strides = [1, 1]} : vector<16x96xf32> to vector<16x32xf32>
    %239 = arith.addf %237, %238 : vector<16x32xf32>
    %240 = arith.negf %239 : vector<16x32xf32>
    %241 = math.exp %240 : vector<16x32xf32>
    %cst_72 = arith.constant 1.000000e+00 : f32
    %242 = vector.broadcast %cst_72 : f32 to vector<16x32xf32>
    %243 = arith.addf %242, %241 : vector<16x32xf32>
    %244 = arith.divf %242, %243 : vector<16x32xf32>
    %245 = vector.extract_strided_slice %225 {offsets = [0, 64], sizes = [16, 32], strides = [1, 1]} : vector<16x96xf32> to vector<16x32xf32>
    %246 = vector.extract_strided_slice %228 {offsets = [0, 64], sizes = [16, 32], strides = [1, 1]} : vector<16x96xf32> to vector<16x32xf32>
    %247 = arith.mulf %236, %246 : vector<16x32xf32>
    %248 = arith.addf %245, %247 : vector<16x32xf32>
    %249 = math.tanh %248 : vector<16x32xf32>
    %cst_73 = arith.constant 1.000000e+00 : f32
    %250 = vector.broadcast %cst_73 : f32 to vector<16x32xf32>
    %251 = arith.subf %250, %244 : vector<16x32xf32>
    %252 = arith.mulf %251, %249 : vector<16x32xf32>
    %253 = arith.mulf %244, %192 : vector<16x32xf32>
    %254 = arith.addf %252, %253 : vector<16x32xf32>
    %255 = tpu.concatenate %254, %224 in 1 : vector<16x32xf32>, vector<16x32xf32> -> vector<16x64xf32>
    %cst_74 = arith.constant dense<0.000000e+00> : vector<16x256xf32>
    %256 = tpu.matmul %255, %154, %cst_74 {dimension_numbers = #tpu.dot_dimension_numbers<[1], [0], [0], [1], [0, 0, 1, 1], [], []>} : vector<16x64xf32>, vector<64x256xf32>, vector<16x256xf32> -> vector<16x256xf32>
    %257 = vector.broadcast %155 : vector<1x256xf32> to vector<16x256xf32>
    %258 = arith.addf %256, %257 : vector<16x256xf32>
    %259 = vector.extract_strided_slice %258 {offsets = [0, 0], sizes = [16, 96], strides = [1, 1]} : vector<16x256xf32> to vector<16x96xf32>
    %260 = vector.extract_strided_slice %258 {offsets = [0, 128], sizes = [16, 96], strides = [1, 1]} : vector<16x256xf32> to vector<16x96xf32>
    %261 = vector.extract_strided_slice %259 {offsets = [0, 0], sizes = [16, 32], strides = [1, 1]} : vector<16x96xf32> to vector<16x32xf32>
    %262 = vector.extract_strided_slice %260 {offsets = [0, 0], sizes = [16, 32], strides = [1, 1]} : vector<16x96xf32> to vector<16x32xf32>
    %263 = arith.addf %261, %262 : vector<16x32xf32>
    %264 = arith.negf %263 : vector<16x32xf32>
    %265 = math.exp %264 : vector<16x32xf32>
    %cst_75 = arith.constant 1.000000e+00 : f32
    %266 = vector.broadcast %cst_75 : f32 to vector<16x32xf32>
    %267 = arith.addf %266, %265 : vector<16x32xf32>
    %268 = arith.divf %266, %267 : vector<16x32xf32>
    %269 = vector.extract_strided_slice %259 {offsets = [0, 32], sizes = [16, 32], strides = [1, 1]} : vector<16x96xf32> to vector<16x32xf32>
    %270 = vector.extract_strided_slice %260 {offsets = [0, 32], sizes = [16, 32], strides = [1, 1]} : vector<16x96xf32> to vector<16x32xf32>
    %271 = arith.addf %269, %270 : vector<16x32xf32>
    %272 = arith.negf %271 : vector<16x32xf32>
    %273 = math.exp %272 : vector<16x32xf32>
    %cst_76 = arith.constant 1.000000e+00 : f32
    %274 = vector.broadcast %cst_76 : f32 to vector<16x32xf32>
    %275 = arith.addf %274, %273 : vector<16x32xf32>
    %276 = arith.divf %274, %275 : vector<16x32xf32>
    %277 = vector.extract_strided_slice %259 {offsets = [0, 64], sizes = [16, 32], strides = [1, 1]} : vector<16x96xf32> to vector<16x32xf32>
    %278 = vector.extract_strided_slice %260 {offsets = [0, 64], sizes = [16, 32], strides = [1, 1]} : vector<16x96xf32> to vector<16x32xf32>
    %279 = arith.mulf %268, %278 : vector<16x32xf32>
    %280 = arith.addf %277, %279 : vector<16x32xf32>
    %281 = math.tanh %280 : vector<16x32xf32>
    %cst_77 = arith.constant 1.000000e+00 : f32
    %282 = vector.broadcast %cst_77 : f32 to vector<16x32xf32>
    %283 = arith.subf %282, %276 : vector<16x32xf32>
    %284 = arith.mulf %283, %281 : vector<16x32xf32>
    %285 = arith.mulf %276, %224 : vector<16x32xf32>
    %286 = arith.addf %284, %285 : vector<16x32xf32>
    %287 = vector.extract_strided_slice %160 {offsets = [32, 0], sizes = [16, 96], strides = [1, 1]} : vector<64x96xf32> to vector<16x96xf32>
    %cst_78 = arith.constant dense<0.000000e+00> : vector<16x96xf32>
    %288 = tpu.matmul %254, %152, %cst_78 {dimension_numbers = #tpu.dot_dimension_numbers<[1], [0], [0], [1], [0, 0, 1, 1], [], []>} : vector<16x32xf32>, vector<32x96xf32>, vector<16x96xf32> -> vector<16x96xf32>
    %289 = vector.broadcast %153 : vector<1x96xf32> to vector<16x96xf32>
    %290 = arith.addf %288, %289 : vector<16x96xf32>
    %291 = vector.extract_strided_slice %287 {offsets = [0, 0], sizes = [16, 32], strides = [1, 1]} : vector<16x96xf32> to vector<16x32xf32>
    %292 = vector.extract_strided_slice %290 {offsets = [0, 0], sizes = [16, 32], strides = [1, 1]} : vector<16x96xf32> to vector<16x32xf32>
    %293 = arith.addf %291, %292 : vector<16x32xf32>
    %294 = arith.negf %293 : vector<16x32xf32>
    %295 = math.exp %294 : vector<16x32xf32>
    %cst_79 = arith.constant 1.000000e+00 : f32
    %296 = vector.broadcast %cst_79 : f32 to vector<16x32xf32>
    %297 = arith.addf %296, %295 : vector<16x32xf32>
    %298 = arith.divf %296, %297 : vector<16x32xf32>
    %299 = vector.extract_strided_slice %287 {offsets = [0, 32], sizes = [16, 32], strides = [1, 1]} : vector<16x96xf32> to vector<16x32xf32>
    %300 = vector.extract_strided_slice %290 {offsets = [0, 32], sizes = [16, 32], strides = [1, 1]} : vector<16x96xf32> to vector<16x32xf32>
    %301 = arith.addf %299, %300 : vector<16x32xf32>
    %302 = arith.negf %301 : vector<16x32xf32>
    %303 = math.exp %302 : vector<16x32xf32>
    %cst_80 = arith.constant 1.000000e+00 : f32
    %304 = vector.broadcast %cst_80 : f32 to vector<16x32xf32>
    %305 = arith.addf %304, %303 : vector<16x32xf32>
    %306 = arith.divf %304, %305 : vector<16x32xf32>
    %307 = vector.extract_strided_slice %287 {offsets = [0, 64], sizes = [16, 32], strides = [1, 1]} : vector<16x96xf32> to vector<16x32xf32>
    %308 = vector.extract_strided_slice %290 {offsets = [0, 64], sizes = [16, 32], strides = [1, 1]} : vector<16x96xf32> to vector<16x32xf32>
    %309 = arith.mulf %298, %308 : vector<16x32xf32>
    %310 = arith.addf %307, %309 : vector<16x32xf32>
    %311 = math.tanh %310 : vector<16x32xf32>
    %cst_81 = arith.constant 1.000000e+00 : f32
    %312 = vector.broadcast %cst_81 : f32 to vector<16x32xf32>
    %313 = arith.subf %312, %306 : vector<16x32xf32>
    %314 = arith.mulf %313, %311 : vector<16x32xf32>
    %315 = arith.mulf %306, %254 : vector<16x32xf32>
    %316 = arith.addf %314, %315 : vector<16x32xf32>
    %317 = tpu.concatenate %316, %286 in 1 : vector<16x32xf32>, vector<16x32xf32> -> vector<16x64xf32>
    %cst_82 = arith.constant dense<0.000000e+00> : vector<16x256xf32>
    %318 = tpu.matmul %317, %154, %cst_82 {dimension_numbers = #tpu.dot_dimension_numbers<[1], [0], [0], [1], [0, 0, 1, 1], [], []>} : vector<16x64xf32>, vector<64x256xf32>, vector<16x256xf32> -> vector<16x256xf32>
    %319 = vector.broadcast %155 : vector<1x256xf32> to vector<16x256xf32>
    %320 = arith.addf %318, %319 : vector<16x256xf32>
    %321 = vector.extract_strided_slice %320 {offsets = [0, 0], sizes = [16, 96], strides = [1, 1]} : vector<16x256xf32> to vector<16x96xf32>
    %322 = vector.extract_strided_slice %320 {offsets = [0, 128], sizes = [16, 96], strides = [1, 1]} : vector<16x256xf32> to vector<16x96xf32>
    %323 = vector.extract_strided_slice %321 {offsets = [0, 0], sizes = [16, 32], strides = [1, 1]} : vector<16x96xf32> to vector<16x32xf32>
    %324 = vector.extract_strided_slice %322 {offsets = [0, 0], sizes = [16, 32], strides = [1, 1]} : vector<16x96xf32> to vector<16x32xf32>
    %325 = arith.addf %323, %324 : vector<16x32xf32>
    %326 = arith.negf %325 : vector<16x32xf32>
    %327 = math.exp %326 : vector<16x32xf32>
    %cst_83 = arith.constant 1.000000e+00 : f32
    %328 = vector.broadcast %cst_83 : f32 to vector<16x32xf32>
    %329 = arith.addf %328, %327 : vector<16x32xf32>
    %330 = arith.divf %328, %329 : vector<16x32xf32>
    %331 = vector.extract_strided_slice %321 {offsets = [0, 32], sizes = [16, 32], strides = [1, 1]} : vector<16x96xf32> to vector<16x32xf32>
    %332 = vector.extract_strided_slice %322 {offsets = [0, 32], sizes = [16, 32], strides = [1, 1]} : vector<16x96xf32> to vector<16x32xf32>
    %333 = arith.addf %331, %332 : vector<16x32xf32>
    %334 = arith.negf %333 : vector<16x32xf32>
    %335 = math.exp %334 : vector<16x32xf32>
    %cst_84 = arith.constant 1.000000e+00 : f32
    %336 = vector.broadcast %cst_84 : f32 to vector<16x32xf32>
    %337 = arith.addf %336, %335 : vector<16x32xf32>
    %338 = arith.divf %336, %337 : vector<16x32xf32>
    %339 = vector.extract_strided_slice %321 {offsets = [0, 64], sizes = [16, 32], strides = [1, 1]} : vector<16x96xf32> to vector<16x32xf32>
    %340 = vector.extract_strided_slice %322 {offsets = [0, 64], sizes = [16, 32], strides = [1, 1]} : vector<16x96xf32> to vector<16x32xf32>
    %341 = arith.mulf %330, %340 : vector<16x32xf32>
    %342 = arith.addf %339, %341 : vector<16x32xf32>
    %343 = math.tanh %342 : vector<16x32xf32>
    %cst_85 = arith.constant 1.000000e+00 : f32
    %344 = vector.broadcast %cst_85 : f32 to vector<16x32xf32>
    %345 = arith.subf %344, %338 : vector<16x32xf32>
    %346 = arith.mulf %345, %343 : vector<16x32xf32>
    %347 = arith.mulf %338, %286 : vector<16x32xf32>
    %348 = arith.addf %346, %347 : vector<16x32xf32>
    %349 = vector.extract_strided_slice %160 {offsets = [48, 0], sizes = [16, 96], strides = [1, 1]} : vector<64x96xf32> to vector<16x96xf32>
    %cst_86 = arith.constant dense<0.000000e+00> : vector<16x96xf32>
    %350 = tpu.matmul %316, %152, %cst_86 {dimension_numbers = #tpu.dot_dimension_numbers<[1], [0], [0], [1], [0, 0, 1, 1], [], []>} : vector<16x32xf32>, vector<32x96xf32>, vector<16x96xf32> -> vector<16x96xf32>
    %351 = vector.broadcast %153 : vector<1x96xf32> to vector<16x96xf32>
    %352 = arith.addf %350, %351 : vector<16x96xf32>
    %353 = vector.extract_strided_slice %349 {offsets = [0, 0], sizes = [16, 32], strides = [1, 1]} : vector<16x96xf32> to vector<16x32xf32>
    %354 = vector.extract_strided_slice %352 {offsets = [0, 0], sizes = [16, 32], strides = [1, 1]} : vector<16x96xf32> to vector<16x32xf32>
    %355 = arith.addf %353, %354 : vector<16x32xf32>
    %356 = arith.negf %355 : vector<16x32xf32>
    %357 = math.exp %356 : vector<16x32xf32>
    %cst_87 = arith.constant 1.000000e+00 : f32
    %358 = vector.broadcast %cst_87 : f32 to vector<16x32xf32>
    %359 = arith.addf %358, %357 : vector<16x32xf32>
    %360 = arith.divf %358, %359 : vector<16x32xf32>
    %361 = vector.extract_strided_slice %349 {offsets = [0, 32], sizes = [16, 32], strides = [1, 1]} : vector<16x96xf32> to vector<16x32xf32>
    %362 = vector.extract_strided_slice %352 {offsets = [0, 32], sizes = [16, 32], strides = [1, 1]} : vector<16x96xf32> to vector<16x32xf32>
    %363 = arith.addf %361, %362 : vector<16x32xf32>
    %364 = arith.negf %363 : vector<16x32xf32>
    %365 = math.exp %364 : vector<16x32xf32>
    %cst_88 = arith.constant 1.000000e+00 : f32
    %366 = vector.broadcast %cst_88 : f32 to vector<16x32xf32>
    %367 = arith.addf %366, %365 : vector<16x32xf32>
    %368 = arith.divf %366, %367 : vector<16x32xf32>
    %369 = vector.extract_strided_slice %349 {offsets = [0, 64], sizes = [16, 32], strides = [1, 1]} : vector<16x96xf32> to vector<16x32xf32>
    %370 = vector.extract_strided_slice %352 {offsets = [0, 64], sizes = [16, 32], strides = [1, 1]} : vector<16x96xf32> to vector<16x32xf32>
    %371 = arith.mulf %360, %370 : vector<16x32xf32>
    %372 = arith.addf %369, %371 : vector<16x32xf32>
    %373 = math.tanh %372 : vector<16x32xf32>
    %cst_89 = arith.constant 1.000000e+00 : f32
    %374 = vector.broadcast %cst_89 : f32 to vector<16x32xf32>
    %375 = arith.subf %374, %368 : vector<16x32xf32>
    %376 = arith.mulf %375, %373 : vector<16x32xf32>
    %377 = arith.mulf %368, %316 : vector<16x32xf32>
    %378 = arith.addf %376, %377 : vector<16x32xf32>
    %379 = tpu.concatenate %378, %348 in 1 : vector<16x32xf32>, vector<16x32xf32> -> vector<16x64xf32>
    %cst_90 = arith.constant dense<0.000000e+00> : vector<16x256xf32>
    %380 = tpu.matmul %379, %154, %cst_90 {dimension_numbers = #tpu.dot_dimension_numbers<[1], [0], [0], [1], [0, 0, 1, 1], [], []>} : vector<16x64xf32>, vector<64x256xf32>, vector<16x256xf32> -> vector<16x256xf32>
    %381 = vector.broadcast %155 : vector<1x256xf32> to vector<16x256xf32>
    %382 = arith.addf %380, %381 : vector<16x256xf32>
    %383 = vector.extract_strided_slice %382 {offsets = [0, 0], sizes = [16, 96], strides = [1, 1]} : vector<16x256xf32> to vector<16x96xf32>
    %384 = vector.extract_strided_slice %382 {offsets = [0, 128], sizes = [16, 96], strides = [1, 1]} : vector<16x256xf32> to vector<16x96xf32>
    %385 = vector.extract_strided_slice %383 {offsets = [0, 0], sizes = [16, 32], strides = [1, 1]} : vector<16x96xf32> to vector<16x32xf32>
    %386 = vector.extract_strided_slice %384 {offsets = [0, 0], sizes = [16, 32], strides = [1, 1]} : vector<16x96xf32> to vector<16x32xf32>
    %387 = arith.addf %385, %386 : vector<16x32xf32>
    %388 = arith.negf %387 : vector<16x32xf32>
    %389 = math.exp %388 : vector<16x32xf32>
    %cst_91 = arith.constant 1.000000e+00 : f32
    %390 = vector.broadcast %cst_91 : f32 to vector<16x32xf32>
    %391 = arith.addf %390, %389 : vector<16x32xf32>
    %392 = arith.divf %390, %391 : vector<16x32xf32>
    %393 = vector.extract_strided_slice %383 {offsets = [0, 32], sizes = [16, 32], strides = [1, 1]} : vector<16x96xf32> to vector<16x32xf32>
    %394 = vector.extract_strided_slice %384 {offsets = [0, 32], sizes = [16, 32], strides = [1, 1]} : vector<16x96xf32> to vector<16x32xf32>
    %395 = arith.addf %393, %394 : vector<16x32xf32>
    %396 = arith.negf %395 : vector<16x32xf32>
    %397 = math.exp %396 : vector<16x32xf32>
    %cst_92 = arith.constant 1.000000e+00 : f32
    %398 = vector.broadcast %cst_92 : f32 to vector<16x32xf32>
    %399 = arith.addf %398, %397 : vector<16x32xf32>
    %400 = arith.divf %398, %399 : vector<16x32xf32>
    %401 = vector.extract_strided_slice %383 {offsets = [0, 64], sizes = [16, 32], strides = [1, 1]} : vector<16x96xf32> to vector<16x32xf32>
    %402 = vector.extract_strided_slice %384 {offsets = [0, 64], sizes = [16, 32], strides = [1, 1]} : vector<16x96xf32> to vector<16x32xf32>
    %403 = arith.mulf %392, %402 : vector<16x32xf32>
    %404 = arith.addf %401, %403 : vector<16x32xf32>
    %405 = math.tanh %404 : vector<16x32xf32>
    %cst_93 = arith.constant 1.000000e+00 : f32
    %406 = vector.broadcast %cst_93 : f32 to vector<16x32xf32>
    %407 = arith.subf %406, %400 : vector<16x32xf32>
    %408 = arith.mulf %407, %405 : vector<16x32xf32>
    %409 = arith.mulf %400, %348 : vector<16x32xf32>
    %410 = arith.addf %408, %409 : vector<16x32xf32>
    %c320 = arith.constant 320 : index
    %c0_94 = arith.constant 0 : index
    %411 = vector.load %arg2[%c320, %c0_94] : memref<392x256xf32, #tpu.memory_space<vmem>>, vector<32x32xf32>
    %cst_95 = arith.constant dense<0.000000e+00> : vector<16x32xf32>
    %412 = tpu.matmul %410, %411, %cst_95 {dimension_numbers = #tpu.dot_dimension_numbers<[1], [0], [0], [1], [0, 0, 1, 1], [], []>} : vector<16x32xf32>, vector<32x32xf32>, vector<16x32xf32> -> vector<16x32xf32>
    %c388 = arith.constant 388 : index
    %c0_96 = arith.constant 0 : index
    %413 = vector.load %arg2[%c388, %c0_96] : memref<392x256xf32, #tpu.memory_space<vmem>>, vector<1x32xf32>
    %414 = vector.broadcast %413 : vector<1x32xf32> to vector<16x32xf32>
    %415 = arith.addf %412, %414 : vector<16x32xf32>
    %cst_97 = arith.constant 0.000000e+00 : f32
    %416 = vector.broadcast %cst_97 : f32 to vector<16x32xf32>
    %417 = arith.maximumf %415, %416 : vector<16x32xf32>
    %c352 = arith.constant 352 : index
    %c0_98 = arith.constant 0 : index
    %418 = vector.load %arg2[%c352, %c0_98] : memref<392x256xf32, #tpu.memory_space<vmem>>, vector<32x10xf32>
    %cst_99 = arith.constant dense<0.000000e+00> : vector<16x10xf32>
    %419 = tpu.matmul %417, %418, %cst_99 {dimension_numbers = #tpu.dot_dimension_numbers<[1], [0], [0], [1], [0, 0, 1, 1], [], []>} : vector<16x32xf32>, vector<32x10xf32>, vector<16x10xf32> -> vector<16x10xf32>
    %c389 = arith.constant 389 : index
    %c0_100 = arith.constant 0 : index
    %420 = vector.load %arg2[%c389, %c0_100] : memref<392x256xf32, #tpu.memory_space<vmem>>, vector<1x10xf32>
    %421 = vector.broadcast %420 : vector<1x10xf32> to vector<16x10xf32>
    %422 = arith.addf %419, %421 : vector<16x10xf32>
    %c0_101 = arith.constant 0 : index
    %c0_102 = arith.constant 0 : index
    %423 = vector.load %arg3[%c0_101, %c0_102] : memref<16x10xf32, #tpu.memory_space<vmem>>, vector<16x10xf32>
    tpu.vector_store %arg3[%c0_101, %c0_102], %422 {strides = array<i32>} : memref<16x10xf32, #tpu.memory_space<vmem>>, vector<16x10xf32>,
    return
  }
}

</mosaic_0001>

<bundles_post_ra>
// kernel: temporal_graph_network_gat.1
= control target key start
LH: loop header
LB: loop body
LE: loop exit
PB: predicated region body
PF: predicated region fallthrough
CT: control target
= control target key end

     0   :  { %vm93_vm0 = vcmask 130048   ;;  %s3939_s13 = smov 64   ;;  %vm260_vm1 = vcmask 1043456   ;;  %s3940_s28 = smov 96   ;;  %vm235_vm2 = vcmask 31744   ;;  %vm62_vm3 = vcmask 523264   ;;  %s5614_s2 = inlined_call_operand.vmem [shape: f32[392,256], index: 2, kind: input, shape index: {}]   ;;  %s5615_s0 = inlined_call_operand.vmem [shape: f32[64,16], index: 0, kind: input, shape index: {}]   ;;  %s5616_s1 = inlined_call_operand.vmem [shape: f32[64,64], index: 1, kind: input, shape index: {}]   ;;  %s5617_s3 = inlined_call_operand.vmem [shape: f32[16,10], index: 3, kind: output, shape index: {}]  }
   0x1   :  { %v74_v0 = vld [vmem:[%s5614_s2 + $0x10] sm:$0xff]  ;;  %v73_v1 = vld [vmem:[%s5614_s2] sm:$0xff]  ;;  %v15_v3 = vld [vmem:[%s5615_s0 + $0x8] sm:$0xff]  ;;  %s3942_s6 = smov 124   ;;  %vm1094_vm4 = vcmask 261120  }
   0x2   :  { %132 = vmatpush.msra.mxu0 %v74_v0  ;;  %v14_v2 = vld [vmem:[%s5615_s0] sm:$0xff]  ;;  %v16_v4 = vld [vmem:[%s5615_s0 + $0x10] sm:$0xff]  ;;  %v17_v5 = vld [vmem:[%s5615_s0 + $0x18] sm:$0xff] }
   0x3   :  { %v3989_v6 = vld [vmem:[%s5614_s2 + $0x150] sm:$0xff]  ;;  %v3994_v7 = vld [vmem:[%s5614_s2 + $0x140] sm:$0xff]  ;;  %v19_v28 = vld [vmem:[%s5615_s0 + $0x28] sm:$0xff] }
   0x4   :  { %133 = vmatpush.msra.mxu0 %v73_v1  ;;  %v3999_v8 = vld [vmem:[%s5614_s2 + $0x130] sm:$0xff]  ;;  %159 = vmatpush.msra.mxu1 %v3989_v6  ;;  %v3547_v9 = vpack.i.bf16 %v3994_v7, %v3989_v6  ;;  %v4007_v10 = vld [vmem:[%s5614_s2 + $0x120] sm:$0xff]  ;;  %v21_v31 = vld [vmem:[%s5615_s0 + $0x38] sm:$0xff] }
   0x5   :  { %3303 = vmatmul.msk.f32.vlgmr.msra.gmra.mxu0 %vm93_vm0, %v14_v2  ;;  %v4012_v11 = vld [vmem:[%s5614_s2 + $0x110] sm:$0xff]  ;;  %v4017_v12 = vld [vmem:[%s5614_s2 + $0x100] sm:$0xff]  ;;  %v3552_v13 = vpack.i.bf16 %v4007_v10, %v3999_v8  ;;  %v4136_v37 = vld [vmem:[%s5616_s1 + $0x8] sm:$0xff] }
   0x6   :  { %v3557_v14 = vpack.i.bf16 %v4017_v12, %v4012_v11  ;;  %v4026_v15 = vld [vmem:[%s5614_s2 + $0xf0] sm:$0xff]  ;;  %v4031_v16 = vld [vmem:[%s5614_s2 + $0xe0] sm:$0xff]  ;;  %160 = vmatpush.msra.mxu1 %v3994_v7  ;;  %v4145_v38 = vld [vmem:[%s5616_s1 + $0x38] sm:$0xff] }
   0x7   :  { %v4036_v17 = vld [vmem:[%s5614_s2 + $0xd0] sm:$0xff]  ;;  %v3562_v18 = vpack.i.bf16 %v4031_v16, %v4026_v15  ;;  %v4044_v19 = vld [vmem:[%s5614_s2 + $0xc0] sm:$0xff]  ;;  %v4150_v39 = vld [vmem:[%s5616_s1 + $0x28] sm:$0xff] }
   0x8   :  { %v4049_v20 = vld [vmem:[%s5614_s2 + $0xb0] sm:$0xff]  ;;  %v4054_v21 = vld [vmem:[%s5614_s2 + $0xa0] sm:$0xff]  ;;  %161 = vmatpush.msra.mxu1 %v3999_v8  ;;  %v4172_v44 = vld [vmem:[%s5616_s1 + $0x18] sm:$0xff]  ;;  %v5623_v6 = vpack.i.bf16 %v4044_v19, %v4036_v17 }
   0x9   :  { %v3572_v23 = vpack.i.bf16 %v4054_v21, %v4049_v20  ;;  %v4063_v24 = vld [vmem:[%s5614_s2 + $0x90] sm:$0xff]  ;;  %v4068_v25 = vld [vmem:[%s5614_s2 + $0x80] sm:$0xff]  ;;  %v4202_v55 = vld [vmem:[%s5614_s2 + $0x178] sm:$0xf] }
   0xa   :  { %v18_v26 = vld [vmem:[%s5615_s0 + $0x20] sm:$0xff]  ;;  %162 = vmatpush.msra.mxu1 %v4007_v10  ;;  %v20_v29 = vld [vmem:[%s5615_s0 + $0x30] sm:$0xff] }
   0xb   :  { %v4098_v30 = vld [vmem:[%s5614_s2 + $0x70] sm:$0xff]  ;;  %v4109_v32 = vld [vmem:[%s5614_s2 + $0x60] sm:$0xff] }
   0xc   :  { %163 = vmatpush.msra.mxu1 %v4012_v11  ;;  %v4117_v34 = vld [vmem:[%s5616_s1 + $0x20] sm:$0xff]  ;;  %v4131_v36 = vld [vmem:[%s5616_s1 + $0x30] sm:$0xff]  ;;  %v5624_v11 = vpack.i.bf16 %v4068_v25, %v4063_v24 }
   0xd   :  { %3304 = vmatmul.msk.f32.gmra.mxu0 %vm93_vm0, %v15_v3  ;;  %v4122_v35 = vld [vmem:[%s5616_s1] sm:$0xff]  ;;  %46 = vrot.lane.b32.xlu0 %v4117_v34, %s3939_s13  ;;  %v4165_v42 = vld [vmem:[%s5616_s1 + $0x10] sm:$0xff]  ;;  %s3941_s1 = smov 32  }
   0xe   :  { %164 = vmatpush.msra.mxu1 %v4017_v12  ;;  %38 = vrot.lane.b32.xlu1 %v4122_v35, %s3939_s13  ;;  %v71_v45 = vld [vmem:[%s5614_s2 + $0x170] sm:$0xf]  ;;  %v91_v54 = vld [vmem:[%s5614_s2 + $0x160] sm:$0xf] }
   0xf   :  { %42 = vrot.lane.b32.xlu2 %v4165_v42, %s3939_s13  ;;  %3311 = vmatpush.msk.msra.mxu3 %vm260_vm1, %v71_v45 }
  0x10   :  { %165 = vmatpush.msra.mxu1 %v4026_v15  ;;  %v5625_v15 = vpack.i.bf16 %v4109_v32, %v4098_v30 }
  0x12   :  { %166 = vmatpush.msra.mxu1 %v4031_v16 }
  0x14   :  { %167 = vmatpush.msra.mxu1 %v4036_v17 }
  0x15   :  { %3305 = vmatmul.msk.f32.gmra.mxu0 %vm93_vm0, %v16_v4  ;;  %50 = vrot.lane.b32.xlu0 %v4131_v36, %s3939_s13 }
  0x16   :  { %168 = vmatpush.msra.mxu1 %v4044_v19  ;;  %40 = vrot.lane.b32.xlu1 %v4136_v37, %s3939_s13 }
  0x17   :  { %44 = vrot.lane.b32.xlu2 %v4172_v44, %s3939_s13 }
  0x18   :  { %169 = vmatpush.msra.mxu1 %v4049_v20 }
  0x1a   :  { %170 = vmatpush.msra.mxu1 %v4054_v21 }
  0x1c   :  { %171 = vmatpush.msra.mxu1 %v4063_v24  ;;  %v1090_v24 = vld [vmem:[%s5614_s2 + $0x30] sm:$0xff] }
  0x1d   :  { %3306 = vmatmul.msk.f32.gmra.mxu0 %vm93_vm0, %v17_v5  ;;  %52 = vrot.lane.b32.xlu0 %v4145_v38, %s3939_s13 }
  0x1e   :  { %172 = vmatpush.msra.mxu1 %v4068_v25  ;;  %48 = vrot.lane.b32.xlu1 %v4150_v39, %s3939_s13  ;;  %v1089_v25 = vld [vmem:[%s5614_s2 + $0x20] sm:$0xff] }
  0x20   :  { %173 = vmatpush.msra.mxu1 %v4098_v30 }
  0x22   :  { %174 = vmatpush.msra.mxu1 %v4109_v32 }
  0x25   :  { %3307 = vmatmul.msk.f32.gmra.mxu0 %vm93_vm0, %v18_v26 }
  0x2d   :  { %3308 = vmatmul.msk.f32.gmra.mxu0 %vm93_vm0, %v19_v28 }
  0x35   :  { %3309 = vmatmul.msk.f32.gmra.mxu0 %vm93_vm0, %v20_v29 }
  0x3d   :  { %3310 = vmatmul.msk.f32.gmra.mxu0 %vm93_vm0, %v21_v31 }
  0x69   :  { %v4214_v60 = vpop.permute.xlu2 %42 }
  0x71   :  { %v4222_v0 = vpop.permute.xlu2 %44 }
  0x7f   :  { %v4208_v58 = vpop.permute.xlu0 %46 }
  0x80   :  { %v4206_v56 = vpop.permute.xlu1 %38 }
  0x82   :  { %v4156_v40 = vpop.f32.mrf.mxu0 }
  0x83   :  { %175 = vmatmul.f32.vlgmr.msra.gmra.mxu1 %v4156_v40 }
  0x87   :  { %v4218_v62 = vpop.permute.xlu0 %50 }
  0x88   :  { %v4212_v59 = vpop.permute.xlu1 %40 }
  0x8a   :  { %v4159_v41 = vpop.f32.mrf.mxu0 }
  0x8b   :  { %178 = vmatmul.f32.gmra.mxu1 %v4159_v41 }
  0x8f   :  { %v4226_v2 = vpop.permute.xlu0 %52 }
  0x90   :  { %v4220_v63 = vpop.permute.xlu1 %48 }
  0x92   :  { %v141_v43 = vpop.f32.mrf.mxu0 }
  0x93   :  { %181 = vmatmul.f32.gmra.mxu1 %v141_v43 }
  0x9a   :  { %v144_v46 = vpop.f32.mrf.mxu0 }
  0x9b   :  { %184 = vmatmul.f32.gmra.mxu1 %v144_v46  ;;  %v4180_v47 = vpack.i.bf16 %v141_v43, %v144_v46 }
  0x9d   :  { %3493 = vrot.lane.b32.xlu0 %v4180_v47, %s3940_s28  ;;  %3488 = vrot.lane.b32.xlu1 %v4180_v47, %s3941_s1 }
  0xa2   :  { %v147_v48 = vpop.f32.mrf.mxu0 }
  0xa3   :  { %187 = vmatmul.f32.gmra.mxu1 %v147_v48 }
  0xaa   :  { %v150_v49 = vpop.f32.mrf.mxu0 }
  0xab   :  { %190 = vmatmul.f32.gmra.mxu1 %v150_v49  ;;  %v3507_v50 = vpack.i.bf16 %v147_v48, %v150_v49 }
  0xad   :  { %3508 = vrot.lane.b32.xlu0 %v3507_v50, %s3939_s13  ;;  %3498 = vrot.lane.b32.xlu1 %v3507_v50, %s3941_s1 }
  0xb2   :  { %v153_v51 = vpop.f32.mrf.mxu0 }
  0xb3   :  { %193 = vmatmul.f32.gmra.mxu1 %v153_v51 }
  0xb5   :  { %3503 = vrot.lane.b32.xlu1 %v3507_v50, %s3940_s28 }
  0xba   :  { %v156_v52 = vpop.f32.mrf.mxu0 }
  0xbb   :  { %196 = vmatmul.f32.gmra.mxu1 %v156_v52  ;;  %208 = vmatpush.xpose.msra.mxu2 %v156_v52  ;;  %v3522_v53 = vpack.i.bf16 %v153_v51, %v156_v52 }
  0xbc   :  { %501 = vmatpush.msrb.mxu3 %v156_v52 }
  0xbd   :  { %3523 = vrot.lane.b32.xlu0 %v3522_v53, %s3939_s13  ;;  %3518 = vrot.lane.b32.xlu2 %v3522_v53, %s3940_s28 }
  0xbe   :  { %3513 = vrot.lane.b32.xlu1 %v3522_v53, %s3941_s1  ;;  %502 = vmatpush.msrb.mxu3 %v153_v51 }
  0xbf   :  { %209 = vmatpush.xpose.msra.mxu2 %v153_v51 }
  0xc0   :  { %503 = vmatpush.msrb.mxu3 %v150_v49 }
  0xc2   :  { %504 = vmatpush.msrb.mxu3 %v147_v48 }
  0xc3   :  { %210 = vmatpush.xpose.msra.mxu2 %v150_v49 }
  0xc4   :  { %505 = vmatpush.msrb.mxu3 %v144_v46 }
  0xc6   :  { %506 = vmatpush.msrb.mxu3 %v141_v43 }
  0xc7   :  { %211 = vmatpush.xpose.msra.mxu2 %v147_v48 }
  0xc8   :  { %507 = vmatpush.msrb.mxu3 %v4159_v41 }
  0xca   :  { %508 = vmatpush.msrb.mxu3 %v4156_v40 }
  0xcb   :  { %212 = vmatpush.xpose.msra.mxu2 %v144_v46 }
  0xcf   :  { %213 = vmatpush.xpose.msra.mxu2 %v141_v43 }
  0xd3   :  { %214 = vmatpush.xpose.msra.mxu2 %v4159_v41 }
  0xd7   :  { %215 = vmatpush.xpose.msra.mxu2 %v4156_v40 }
  0xda   :  { %216 = vmatmul.f32.vlgmr.msra.gmra.mxu2 %v91_v54 }
  0xdb   :  { %3320 = vmatpush.msk.msrb.mxu2 %vm260_vm1, %v4202_v55 }
 0x100   :  { %v176_v57 = vpop.f32.mrf.mxu1 }
 0x101   :  { %3312 = vmatmul.msk.f32.vlgmr.msra.gmra.mxu3 %vm235_vm2, %v176_v57  ;;  %3321 = vmatmul.msk.f32.vlgmr.msrb.gmra.mxu2 %vm235_vm2, %v176_v57 }
 0x108   :  { %v179_v61 = vpop.f32.mrf.mxu1 }
 0x109   :  { %3313 = vmatmul.msk.f32.gmra.mxu3 %vm235_vm2, %v179_v61  ;;  %3322 = vmatmul.msk.f32.gmra.mxu2 %vm235_vm2, %v179_v61 }
 0x10f   :  { %v3489_v3 = vpop.permute.xlu1 %3488  ;;  %v3494_v29 = vpop.permute.xlu0 %3493 }
 0x110   :  { %v182_v1 = vpop.f32.mrf.mxu1  ;;  %v3495_v51 = vunpack.i.l.bf16 %v3494_v29  ;;  %v3496_v52 = vunpack.i.h.bf16 %v3494_v29 }
 0x111   :  { %3314 = vmatmul.msk.f32.gmra.mxu3 %vm235_vm2, %v182_v1  ;;  %3323 = vmatmul.msk.f32.gmra.mxu2 %vm235_vm2, %v182_v1 }
 0x117   :  { %v3519_v4 = vpop.permute.xlu2 %3518 }
 0x118   :  { %v185_v5 = vpop.f32.mrf.mxu1  ;;  %v3520_v26 = vunpack.i.l.bf16 %v3519_v4  ;;  %v3521_v28 = vunpack.i.h.bf16 %v3519_v4 }
 0x119   :  { %3315 = vmatmul.msk.f32.gmra.mxu3 %vm235_vm2, %v185_v5  ;;  %3324 = vmatmul.msk.f32.gmra.mxu2 %vm235_vm2, %v185_v5 }
 0x11a   :  { %662 = vmatpush.msrb.mxu0 %v3520_v26 }
 0x11c   :  { %663 = vmatpush.msrb.mxu0 %v3521_v28 }
 0x11f   :  { %v3499_v31 = vpop.permute.xlu1 %3498  ;;  %v3509_v45 = vpop.permute.xlu0 %3508 }
 0x120   :  { %v188_v43 = vpop.f32.mrf.mxu1  ;;  %v3510_v26 = vunpack.i.l.bf16 %v3509_v45  ;;  %v3500_v28 = vunpack.i.l.bf16 %v3499_v31  ;;  %v3511_v29 = vunpack.i.h.bf16 %v3509_v45 }
 0x121   :  { %3316 = vmatmul.msk.f32.gmra.mxu3 %vm235_vm2, %v188_v43  ;;  %3325 = vmatmul.msk.f32.gmra.mxu2 %vm235_vm2, %v188_v43  ;;  %v3501_v43 = vunpack.i.h.bf16 %v3499_v31  ;;  %v3532_v31 = vpack.i.bf16 %v4156_v40, %v4159_v41 }
 0x127   :  { %v3504_v46 = vpop.permute.xlu1 %3503 }
 0x128   :  { %v191_v48 = vpop.f32.mrf.mxu1  ;;  %v3505_v49 = vunpack.i.l.bf16 %v3504_v46  ;;  %v3506_v50 = vunpack.i.h.bf16 %v3504_v46 }
 0x129   :  { %3317 = vmatmul.msk.f32.gmra.mxu3 %vm235_vm2, %v191_v48  ;;  %3326 = vmatmul.msk.f32.gmra.mxu2 %vm235_vm2, %v191_v48  ;;  %v3490_v48 = vunpack.i.l.bf16 %v3489_v3 }
 0x12a   :  { %664 = vmatpush.msrb.mxu0 %v3505_v49  ;;  %v3491_v49 = vunpack.i.h.bf16 %v3489_v3 }
 0x12c   :  { %665 = vmatpush.msrb.mxu0 %v3506_v50 }
 0x12e   :  { %666 = vmatpush.msrb.mxu0 %v3495_v51 }
 0x12f   :  { %v3524_v53 = vpop.permute.xlu0 %3523 }
 0x130   :  { %v3514_v54 = vpop.permute.xlu1 %3513  ;;  %v194_v57 = vpop.f32.mrf.mxu1  ;;  %667 = vmatpush.msrb.mxu0 %v3496_v52  ;;  %v3525_v61 = vunpack.i.l.bf16 %v3524_v53  ;;  %v3526_v4 = vunpack.i.h.bf16 %v3524_v53 }
 0x131   :  { %v3515_v1 = vunpack.i.l.bf16 %v3514_v54  ;;  %3318 = vmatmul.msk.f32.gmra.mxu3 %vm235_vm2, %v194_v57  ;;  %3327 = vmatmul.msk.f32.gmra.mxu2 %vm235_vm2, %v194_v57  ;;  %v3516_v5 = vunpack.i.h.bf16 %v3514_v54 }
 0x132   :  { %815 = vmatpush.msrb.mxu1 %v3525_v61 }
 0x133   :  { %968 = vmatpush.msra.mxu2 %v3515_v1 }
 0x134   :  { %816 = vmatpush.msrb.mxu1 %v3526_v4 }
 0x135   :  { %969 = vmatpush.msra.mxu2 %v3516_v5 }
 0x136   :  { %817 = vmatpush.msrb.mxu1 %v3510_v26 }
 0x137   :  { %970 = vmatpush.msra.mxu2 %v3500_v28 }
 0x138   :  { %v197_v46 = vpop.f32.mrf.mxu1  ;;  %818 = vmatpush.msrb.mxu1 %v3511_v29 }
 0x139   :  { %971 = vmatpush.msra.mxu2 %v3501_v43  ;;  %3319 = vmatmul.msk.f32.gmra.mxu3 %vm235_vm2, %v197_v46 }
 0x13a   :  { %3328 = vmatmul.msk.f32.gmra.mxu2 %vm235_vm2, %v197_v46 }
 0x13b   :  { %972 = vmatpush.msra.mxu2 %v3490_v48 }
 0x13d   :  { %973 = vmatpush.msra.mxu2 %v3491_v49 }
 0x15d   :  { %v217_v50 = vpop.f32.mrf.mxu2 }
 0x15e   :  { %v221_v51 = vrot.slane %v217_v50, 1  ;;  %v227_v52 = vrot.slane %v217_v50, 3  ;;  %v225_v41 = vrot.slane %v217_v50, 2 }
 0x160   :  { %222 = vrot.lane.b32.xlu0 %v221_v51, %s3939_s13 }
 0x168   :  { %228 = vrot.lane.b32.xlu0 %v227_v52, %s3939_s13 }
 0x170   :  { %3533 = vrot.lane.b32.xlu0 %v3532_v31, %s3941_s1 }
 0x178   :  { %3538 = vrot.lane.b32.xlu0 %v3532_v31, %s3940_s28 }
 0x184   :  { %v284_v45 = vpop.f32.mrf.mxu3  ;;  %v325_v53 = vpop.f32.mrf.mxu2 }
 0x18c   :  { %v287_v54 = vpop.f32.mrf.mxu3  ;;  %v328_v57 = vpop.f32.mrf.mxu2 }
 0x194   :  { %v290_v4 = vpop.f32.mrf.mxu3  ;;  %v331_v51 = vpop.f32.mrf.mxu2 }
 0x1d2   :  { %v223_v3 = vpop.permute.xlu0 %222 }
 0x1d3   :  { %v231_v61 = vsel %vm62_vm3, %v217_v50, %v223_v3  ;;  %v4264_v50 = vsel %vm62_vm3, %v4165_v42, %v4214_v60 }
 0x1d4   :  { %v4245_v1 = vperm.slane %v231_v61, 0 }
 0x1d6   :  { %v291_v5 = vadd.f32 %v290_v4, %v4245_v1  ;;  %v288_v26 = vadd.f32 %v287_v54, %v4245_v1  ;;  %v285_v40 = vadd.f32 %v284_v45, %v4245_v1  ;;  %v4259_v45 = vsel %vm62_vm3, %v4136_v37, %v4212_v59 }
 0x1d8   :  { %v353_v43 = vmul.f32 0.2, %v291_v5  ;;  %v351_v46 = vmul.f32 0.2, %v288_v26  ;;  %v349_v49 = vmul.f32 0.2, %v285_v40 }
 0x1da   :  { %v229_v28 = vpop.permute.xlu0 %228  ;;  %v369_v54 = vmax.f32 %v291_v5, %v353_v43  ;;  %v367_v4 = vmax.f32 %v288_v26, %v351_v46 }
 0x1db   :  { %v232_v29 = vsel %vm62_vm3, %v225_v41, %v229_v28 }
 0x1dc   :  { %v4251_v48 = vperm.slane %v232_v29, 0  ;;  %v4272_v22 = vadd.f32 %v369_v54, %v4264_v50  ;;  %v4275_v42 = vadd.f32 %v367_v4, %v4259_v45 }
 0x1de   :  { %v332_v52 = vadd.f32 %v331_v51, %v4251_v48  ;;  %v329_v3 = vadd.f32 %v328_v57, %v4251_v48  ;;  %v326_v61 = vadd.f32 %v325_v53, %v4251_v48  ;;  %v365_v51 = vmax.f32 %v285_v40, %v349_v49 }
 0x1df   :  { %v4269_v53 = vsel %vm62_vm3, %v4122_v35, %v4206_v56 }
 0x1e0   :  { %v354_v41 = vmul.f32 0.2, %v332_v52  ;;  %v352_v28 = vmul.f32 0.2, %v329_v3  ;;  %v350_v29 = vmul.f32 0.2, %v326_v61  ;;  %v4284_v35 = vadd.f32 %v365_v51, %v4269_v53 }
 0x1e2   :  { %v3534_v57 = vpop.permute.xlu0 %3533  ;;  %v370_v33 = vmax.f32 %v332_v52, %v354_v41  ;;  %v368_v37 = vmax.f32 %v329_v3, %v352_v28  ;;  %v366_v59 = vmax.f32 %v326_v61, %v350_v29  ;;  %v334_v52 = vpop.f32.mrf.mxu2 }
 0x1e3   :  { %v3535_v27 = vunpack.i.l.bf16 %v3534_v57  ;;  %v3536_v26 = vunpack.i.h.bf16 %v3534_v57  ;;  %v293_v3 = vpop.f32.mrf.mxu3  ;;  %v335_v29 = vadd.f32 %v334_v52, %v4251_v48 }
 0x1e4   :  { %v4278_v60 = vadd.f32 %v370_v33, %v4264_v50  ;;  %v4281_v5 = vadd.f32 %v368_v37, %v4259_v45  ;;  %v4287_v56 = vadd.f32 %v366_v59, %v4269_v53  ;;  %v294_v57 = vadd.f32 %v293_v3, %v4245_v1 }
 0x1e5   :  { %974 = vmatpush.msra.mxu2 %v3535_v27  ;;  %v356_v59 = vmul.f32 0.2, %v335_v29  ;;  %v4314_v3 = vsel %vm62_vm3, %v4131_v36, %v4218_v62 }
 0x1e6   :  { %v403_v40 = vmax.f32 %v4272_v22, %v4278_v60  ;;  %v400_v43 = vmax.f32 %v4275_v42, %v4281_v5  ;;  %v397_v33 = vmax.f32 %v4284_v35, %v4287_v56 }
 0x1e7   :  { %975 = vmatpush.msra.mxu2 %v3536_v26 }
 0x1e8   :  { %404 = vmax.xlane.f32.xlu0 %v403_v40  ;;  %401 = vmax.xlane.f32.xlu1 %v400_v43  ;;  %v372_v43 = vmax.f32 %v335_v29, %v356_v59  ;;  %v4337_v59 = vsel %vm62_vm3, %v4117_v34, %v4208_v58  ;;  %v4350_v34 = vsel %vm62_vm3, %v4150_v39, %v4220_v63 }
 0x1e9   :  { %398 = vmax.xlane.f32.xlu2 %v397_v33  ;;  %3378 = vmatpush.msk.msrb.mxu2 %vm260_vm1, %v4202_v55 }
 0x1ea   :  { %v3539_v46 = vpop.permute.xlu0 %3538  ;;  %v337_v61 = vpop.f32.mrf.mxu2 }
 0x1eb   :  { %v3540_v49 = vunpack.i.l.bf16 %v3539_v46  ;;  %v3541_v27 = vunpack.i.h.bf16 %v3539_v46  ;;  %v296_v54 = vpop.f32.mrf.mxu3 }
 0x1ed   :  { %668 = vmatpush.msrb.mxu0 %v3540_v49  ;;  %v297_v49 = vadd.f32 %v296_v54, %v4245_v1 }
 0x1ef   :  { %669 = vmatpush.msrb.mxu0 %v3541_v27  ;;  %v4309_v27 = vsel %vm62_vm3, %v4172_v44, %v4222_v0 }
 0x1f2   :  { %v340_v4 = vpop.f32.mrf.mxu2 }
 0x1f3   :  { %v299_v41 = vpop.f32.mrf.mxu3  ;;  %v341_v36 = vadd.f32 %v340_v4, %v4251_v48 }
 0x1fa   :  { %v343_v28 = vpop.f32.mrf.mxu2 }
 0x1fb   :  { %v344_v55 = vadd.f32 %v343_v28, %v4251_v48  ;;  %v302_v51 = vpop.f32.mrf.mxu3  ;;  %v4317_v28 = vadd.f32 %v372_v43, %v4309_v27 }
 0x1fc   :  { %v303_v37 = vadd.f32 %v302_v51, %v4245_v1 }
 0x1fd   :  { %v362_v26 = vmul.f32 0.2, %v344_v55 }
 0x1fe   :  { %v361_v40 = vmul.f32 0.2, %v303_v37 }
 0x1ff   :  { %v378_v33 = vmax.f32 %v344_v55, %v362_v26  ;;  %v357_v55 = vmul.f32 0.2, %v297_v49 }
 0x200   :  { %v377_v52 = vmax.f32 %v303_v37, %v361_v40  ;;  %v300_v37 = vadd.f32 %v299_v41, %v4245_v1 }
 0x201   :  { %3543 = vrot.lane.b32.xlu2 %v3532_v31, %s3939_s13  ;;  %3528 = vrot.lane.b32.xlu1 %v4180_v47, %s3939_s13  ;;  %v355_v31 = vmul.f32 0.2, %v294_v57  ;;  %v338_v47 = vadd.f32 %v337_v61, %v4251_v48  ;;  %v4320_v61 = vadd.f32 %v378_v33, %v4314_v3 }
 0x202   :  { %v4326_v44 = vadd.f32 %v377_v52, %v4314_v3  ;;  %v359_v4 = vmul.f32 0.2, %v300_v37 }
 0x203   :  { %v371_v46 = vmax.f32 %v294_v57, %v355_v31  ;;  %v358_v29 = vmul.f32 0.2, %v338_v47  ;;  %v373_v57 = vmax.f32 %v297_v49, %v357_v55  ;;  %v360_v31 = vmul.f32 0.2, %v341_v36 }
 0x204   :  { %v415_v62 = vmax.f32 %v4326_v44, %v4320_v61  ;;  %v375_v41 = vmax.f32 %v300_v37, %v359_v4 }
 0x205   :  { %v4323_v54 = vadd.f32 %v371_v46, %v4309_v27  ;;  %v374_v51 = vmax.f32 %v338_v47, %v358_v29  ;;  %v4343_v40 = vadd.f32 %v373_v57, %v4337_v59  ;;  %v376_v47 = vmax.f32 %v341_v36, %v360_v31 }
 0x206   :  { %v4356_v33 = vadd.f32 %v375_v41, %v4350_v34 }
 0x207   :  { %v406_v0 = vmax.f32 %v4323_v54, %v4317_v28  ;;  %v4340_v26 = vadd.f32 %v374_v51, %v4337_v59  ;;  %v4353_v58 = vadd.f32 %v376_v47, %v4350_v34 }
 0x209   :  { %v409_v43 = vmax.f32 %v4343_v40, %v4340_v26  ;;  %v412_v46 = vmax.f32 %v4356_v33, %v4353_v58 }
 0x22a   :  { %407 = vmax.xlane.f32.xlu2 %v406_v0 }
 0x22b   :  { %416 = vmax.xlane.f32.xlu1 %v415_v62 }
 0x232   :  { %410 = vmax.xlane.f32.xlu2 %v409_v43 }
 0x23a   :  { %413 = vmax.xlane.f32.xlu2 %v412_v46 }
 0x25b   :  { %v402_v49 = vpop.xlane.xlu1 %401  ;;  %v405_v36 = vpop.xlane.xlu0 %404 }
 0x25c   :  { %v423_v52 = vsub.f32 %v4275_v42, %v402_v49  ;;  %v424_v29 = vsub.f32 %v4281_v5, %v402_v49  ;;  %v399_v55 = vpop.xlane.xlu2 %398  ;;  %v426_v37 = vsub.f32 %v4278_v60, %v405_v36  ;;  %v425_v4 = vsub.f32 %v4272_v22, %v405_v36 }
 0x25d   :  { %v421_v0 = vsub.f32 %v4284_v35, %v399_v55  ;;  %v422_v39 = vsub.f32 %v4287_v56, %v399_v55  ;;  %v346_v55 = vpop.f32.mrf.mxu2 }
 0x25e   :  { %v441_v63 = vmul.f32 1.442695, %v423_v52  ;;  %v443_v51 = vmul.f32 1.442695, %v424_v29  ;;  %v447_v31 = vmul.f32 1.442695, %v426_v37  ;;  %v4407_v37 = vsel %vm62_vm3, %v4145_v38, %v4226_v2 }
 0x25f   :  { %v437_v62 = vmul.f32 1.442695, %v421_v0  ;;  %v439_v57 = vmul.f32 1.442695, %v422_v39  ;;  %v445_v60 = vmul.f32 1.442695, %v425_v4  ;;  %v347_v0 = vadd.f32 %v346_v55, %v4251_v48  ;;  %v305_v39 = vpop.f32.mrf.mxu3 }
 0x260   :  { %3647 = vpow2.f32 %v441_v63  ;;  %v306_v63 = vadd.f32 %v305_v39, %v4245_v1 }
 0x261   :  { %3649 = vpow2.f32 %v443_v51  ;;  %v364_v51 = vmul.f32 0.2, %v347_v0 }
 0x262   :  { %3651 = vpow2.f32 %v437_v62  ;;  %v363_v36 = vmul.f32 0.2, %v306_v63 }
 0x263   :  { %3653 = vpow2.f32 %v439_v57  ;;  %v380_v62 = vmax.f32 %v347_v0, %v364_v51 }
 0x264   :  { %3655 = vpow2.f32 %v447_v31  ;;  %v3544_v41 = vpop.permute.xlu2 %3543  ;;  %v379_v57 = vmax.f32 %v306_v63, %v363_v36 }
 0x265   :  { %3657 = vpow2.f32 %v445_v60  ;;  %v3545_v52 = vunpack.i.l.bf16 %v3544_v41  ;;  %v3546_v29 = vunpack.i.h.bf16 %v3544_v41  ;;  %v4410_v31 = vadd.f32 %v380_v62, %v4407_v37 }
 0x266   :  { %v4365_v42 = vpop.eup %3647  ;;  %v4413_v48 = vadd.f32 %v379_v57, %v4407_v37 }
 0x267   :  { %v4367_v5 = vpop.eup %3649  ;;  %592 = vrot.lane.b32.xlu1 %v4365_v42, %s3939_s13 }
 0x268   :  { %v4371_v35 = vpop.eup %3651  ;;  %906 = vrot.lane.b32.xlu2 %v4367_v5, %s3939_s13  ;;  %v418_v1 = vmax.f32 %v4413_v48, %v4410_v31 }
 0x269   :  { %v4375_v56 = vpop.eup %3653  ;;  %3329 = vmatmul.msk.f32.vlgmr.msrb.gmra.mxu3 %vm62_vm3, %v4371_v35 }
 0x26a   :  { %904 = vrot.lane.b32.xlu0 %v4375_v56, %s3939_s13  ;;  %v4382_v43 = vpop.eup %3655 }
 0x26b   :  { %v4390_v49 = vpop.eup %3657 }
 0x270   :  { %908 = vrot.lane.b32.xlu2 %v4382_v43, %s3939_s13 }
 0x271   :  { %3330 = vmatmul.msk.f32.gmra.mxu3 %vm62_vm3, %v4365_v42 }
 0x272   :  { %590 = vrot.lane.b32.xlu0 %v4371_v35, %s3939_s13 }
 0x273   :  { %v3529_v22 = vpop.permute.xlu1 %3528 }
 0x274   :  { %v3530_v47 = vunpack.i.l.bf16 %v3529_v22  ;;  %v3531_v46 = vunpack.i.h.bf16 %v3529_v22 }
 0x276   :  { %819 = vmatpush.msrb.mxu1 %v3530_v47 }
 0x278   :  { %594 = vrot.lane.b32.xlu2 %v4390_v49, %s3939_s13  ;;  %820 = vmatpush.msrb.mxu1 %v3531_v46 }
 0x279   :  { %3331 = vmatmul.msk.f32.gmra.mxu3 %vm62_vm3, %v4390_v49 }
 0x27a   :  { %821 = vmatpush.msrb.mxu1 %v3545_v52 }
 0x27c   :  { %822 = vmatpush.msrb.mxu1 %v3546_v29 }
 0x27d   :  { %3345 = vmatmul.msk.f32.vlgmr.msrb.gmra.mxu1 %vm62_vm3, %v4375_v56 }
 0x285   :  { %3346 = vmatmul.msk.f32.gmra.mxu1 %vm62_vm3, %v4367_v5 }
 0x28d   :  { %3347 = vmatmul.msk.f32.gmra.mxu1 %vm62_vm3, %v4382_v43 }
 0x29c   :  { %419 = vmax.xlane.f32.xlu0 %v418_v1 }
 0x29d   :  { %v408_v4 = vpop.xlane.xlu2 %407 }
 0x29e   :  { %v427_v60 = vsub.f32 %v4323_v54, %v408_v4  ;;  %v428_v22 = vsub.f32 %v4317_v28, %v408_v4 }
 0x2a0   :  { %v449_v47 = vmul.f32 1.442695, %v427_v60  ;;  %v451_v41 = vmul.f32 1.442695, %v428_v22 }
 0x2a2   :  { %3659 = vpow2.f32 %v449_v47 }
 0x2a3   :  { %3661 = vpow2.f32 %v451_v41 }
 0x2a5   :  { %v411_v38 = vpop.xlane.xlu2 %410 }
 0x2a6   :  { %v429_v2 = vsub.f32 %v4343_v40, %v411_v38  ;;  %v430_v46 = vsub.f32 %v4340_v26, %v411_v38  ;;  %v417_v40 = vpop.xlane.xlu1 %416  ;;  %v534_v38 = vsel %vm62_vm3, %v4371_v35, 0.0 }
 0x2a7   :  { %v433_v62 = vsub.f32 %v4326_v44, %v417_v40 }
 0x2a8   :  { %v3660_v52 = vpop.eup %3659  ;;  %v453_v29 = vmul.f32 1.442695, %v429_v2  ;;  %v455_v55 = vmul.f32 1.442695, %v430_v46  ;;  %v851_v46 = vsel %vm62_vm3, %v4367_v5, 0.0 }
 0x2a9   :  { %v4421_v0 = vpop.eup %3661  ;;  %596 = vrot.lane.b32.xlu1 %v3660_v52, %s3939_s13  ;;  %3332 = vmatmul.msk.f32.gmra.mxu3 %vm62_vm3, %v3660_v52 }
 0x2aa   :  { %3663 = vpow2.f32 %v453_v29  ;;  %910 = vrot.lane.b32.xlu2 %v4421_v0, %s3939_s13  ;;  %3348 = vmatmul.msk.f32.gmra.mxu1 %vm62_vm3, %v4421_v0 }
 0x2ab   :  { %3665 = vpow2.f32 %v455_v55  ;;  %v543_v55 = vsel %vm62_vm3, %v3660_v52, 0.0 }
 0x2ad   :  { %v414_v28 = vpop.xlane.xlu2 %413 }
 0x2ae   :  { %v431_v54 = vsub.f32 %v4356_v33, %v414_v28  ;;  %v432_v26 = vsub.f32 %v4353_v58, %v414_v28  ;;  %v434_v33 = vsub.f32 %v4320_v61, %v417_v40  ;;  %v461_v58 = vmul.f32 1.442695, %v433_v62 }
 0x2b0   :  { %v4431_v39 = vpop.eup %3663  ;;  %v457_v63 = vmul.f32 1.442695, %v431_v54  ;;  %v459_v51 = vmul.f32 1.442695, %v432_v26  ;;  %v463_v57 = vmul.f32 1.442695, %v434_v33 }
 0x2b1   :  { %v3666_v36 = vpop.eup %3665  ;;  %3333 = vmatmul.msk.f32.gmra.mxu3 %vm62_vm3, %v4431_v39  ;;  %v546_v8 = vsel %vm62_vm3, %v4431_v39, 0.0 }
 0x2b2   :  { %3667 = vpow2.f32 %v457_v63  ;;  %598 = vrot.lane.b32.xlu2 %v4431_v39, %s3939_s13  ;;  %3349 = vmatmul.msk.f32.gmra.mxu1 %vm62_vm3, %v3666_v36  ;;  %v860_v62 = vsel %vm62_vm3, %v3666_v36, 0.0 }
 0x2b3   :  { %3669 = vpow2.f32 %v459_v51  ;;  %912 = vrot.lane.b32.xlu0 %v3666_v36, %s3939_s13 }
 0x2b4   :  { %3671 = vpow2.f32 %v461_v58 }
 0x2b5   :  { %3673 = vpow2.f32 %v463_v57 }
 0x2b8   :  { %v4441_v1 = vpop.eup %3667 }
 0x2b9   :  { %v4443_v4 = vpop.eup %3669  ;;  %3334 = vmatmul.msk.f32.gmra.mxu3 %vm62_vm3, %v4441_v1  ;;  %v549_v10 = vsel %vm62_vm3, %v4441_v1, 0.0 }
 0x2ba   :  { %914 = vrot.lane.b32.xlu1 %v4443_v4, %s3939_s13  ;;  %600 = vrot.lane.b32.xlu2 %v4441_v1, %s3939_s13  ;;  %v3672_v61 = vpop.eup %3671  ;;  %v863_v20 = vsel %vm62_vm3, %v4443_v4, 0.0 }
 0x2bb   :  { %3350 = vmatmul.msk.f32.gmra.mxu1 %vm62_vm3, %v4443_v4  ;;  %v4453_v44 = vpop.eup %3673 }
 0x2c1   :  { %3335 = vmatmul.msk.f32.gmra.mxu3 %vm62_vm3, %v3672_v61 }
 0x2c2   :  { %916 = vrot.lane.b32.xlu1 %v4453_v44, %s3939_s13  ;;  %602 = vrot.lane.b32.xlu2 %v3672_v61, %s3939_s13  ;;  %v4462_v22 = vpop.permute.xlu2 %906 }
 0x2c3   :  { %3351 = vmatmul.msk.f32.gmra.mxu1 %vm62_vm3, %v4453_v44 }
 0x2ca   :  { %v4470_v41 = vpop.permute.xlu2 %908 }
 0x2d2   :  { %v595_v29 = vpop.permute.xlu2 %594 }
 0x2d3   :  { %v709_v54 = vsel %vm62_vm3, %v595_v29, 0.0 }
 0x2d9   :  { %v593_v2 = vpop.permute.xlu1 %592 }
 0x2dc   :  { %v905_v60 = vpop.permute.xlu0 %904 }
 0x2dd   :  { %3353 = vmatmul.msk.f32.vlgmr.msra.gmra.mxu2 %vm62_vm3, %v905_v60  ;;  %v1009_v28 = vsel %vm62_vm3, %v905_v60, 0.0 }
 0x2e4   :  { %v4464_v47 = vpop.permute.xlu0 %590 }
 0x2e5   :  { %3337 = vmatmul.msk.f32.vlgmr.msrb.gmra.mxu0 %vm62_vm3, %v4464_v47  ;;  %3354 = vmatmul.msk.f32.gmra.mxu2 %vm62_vm3, %v4462_v22 }
 0x2eb   :  { %535 = vadd.xlane.f32.xlu2 %v534_v38  ;;  %v552_v38 = vsel %vm62_vm3, %v3672_v61, 0.0  ;;  %v848_v61 = vsel %vm62_vm3, %v4375_v56, 0.0  ;;  %v1012_v56 = vsel %vm62_vm3, %v4462_v22, 0.0 }
 0x2ec   :  { %v510_v19 = vpop.f32.mrf.mxu3 }
 0x2ed   :  { %3338 = vmatmul.msk.f32.gmra.mxu0 %vm62_vm3, %v593_v2  ;;  %3355 = vmatmul.msk.f32.gmra.mxu2 %vm62_vm3, %v4470_v41 }
 0x2f3   :  { %852 = vadd.xlane.f32.xlu2 %v851_v46 }
 0x2f5   :  { %3339 = vmatmul.msk.f32.gmra.mxu0 %vm62_vm3, %v595_v29 }
 0x2fa   :  { %v824_v32 = vpop.f32.mrf.mxu1 }
 0x2fb   :  { %544 = vadd.xlane.f32.xlu2 %v543_v55 }
 0x303   :  { %1010 = vadd.xlane.f32.xlu2 %v1009_v28 }
 0x304   :  { %v911_v35 = vpop.permute.xlu2 %910 }
 0x305   :  { %3356 = vmatmul.msk.f32.gmra.mxu2 %vm62_vm3, %v911_v35 }
 0x30b   :  { %710 = vadd.xlane.f32.xlu2 %v709_v54  ;;  %v537_v54 = vsel %vm62_vm3, %v4365_v42, 0.0  ;;  %v857_v42 = vsel %vm62_vm3, %v4421_v0, 0.0  ;;  %v866_v0 = vsel %vm62_vm3, %v4453_v44, 0.0 }
 0x30c   :  { %v599_v52 = vpop.permute.xlu2 %598 }
 0x30f   :  { %v420_v26 = vpop.xlane.xlu0 %419 }
 0x310   :  { %v435_v40 = vsub.f32 %v4413_v48, %v420_v26  ;;  %v436_v5 = vsub.f32 %v4410_v31, %v420_v26  ;;  %v1018_v31 = vsel %vm62_vm3, %v911_v35, 0.0  ;;  %v540_v26 = vsel %vm62_vm3, %v4390_v49, 0.0 }
 0x311   :  { %v715_v49 = vsel %vm62_vm3, %v599_v52, 0.0 }
 0x312   :  { %v465_v63 = vmul.f32 1.442695, %v435_v40  ;;  %v467_v51 = vmul.f32 1.442695, %v436_v5  ;;  %v854_v40 = vsel %vm62_vm3, %v4382_v43, 0.0  ;;  %v706_v5 = vsel %vm62_vm3, %v593_v2, 0.0 }
 0x313   :  { %861 = vadd.xlane.f32.xlu2 %v860_v62  ;;  %v1015_v43 = vsel %vm62_vm3, %v4470_v41, 0.0 }
 0x314   :  { %3675 = vpow2.f32 %v465_v63  ;;  %v601_v36 = vpop.permute.xlu2 %600  ;;  %v703_v63 = vsel %vm62_vm3, %v4464_v47, 0.0 }
 0x315   :  { %3677 = vpow2.f32 %v467_v51  ;;  %v718_v57 = vsel %vm62_vm3, %v601_v36, 0.0  ;;  %v1092_v51 = vld [vmem:[%s5614_s2 + $0x50] sm:$0xff] }
 0x316   :  { %1131 = vmatpush.msra.mxu3 %v1092_v51 }
 0x31a   :  { %v4487_v33 = vpop.eup %3675 }
 0x31b   :  { %v3678_v58 = vpop.eup %3677  ;;  %604 = vrot.lane.b32.xlu1 %v4487_v33, %s3939_s13  ;;  %3336 = vmatmul.msk.f32.gmra.mxu3 %vm62_vm3, %v4487_v33  ;;  %v597_v48 = vpop.permute.xlu1 %596  ;;  %v555_v22 = vsel %vm62_vm3, %v4487_v33, 0.0 }
 0x31c   :  { %918 = vrot.lane.b32.xlu0 %v3678_v58, %s3939_s13  ;;  %3352 = vmatmul.msk.f32.gmra.mxu1 %vm62_vm3, %v3678_v58  ;;  %v603_v29 = vpop.permute.xlu2 %602  ;;  %v869_v35 = vsel %vm62_vm3, %v3678_v58, 0.0 }
 0x31d   :  { %1019 = vadd.xlane.f32.xlu2 %v1018_v31  ;;  %3340 = vmatmul.msk.f32.gmra.mxu0 %vm62_vm3, %v597_v48  ;;  %v721_v39 = vsel %vm62_vm3, %v603_v29, 0.0 }
 0x325   :  { %719 = vadd.xlane.f32.xlu2 %v718_v57  ;;  %v913_v60 = vpop.permute.xlu0 %912  ;;  %3341 = vmatmul.msk.f32.gmra.mxu0 %vm62_vm3, %v599_v52 }
 0x326   :  { %3357 = vmatmul.msk.f32.gmra.mxu2 %vm62_vm3, %v913_v60 }
 0x32c   :  { %v915_v46 = vpop.permute.xlu1 %914 }
 0x32d   :  { %553 = vadd.xlane.f32.xlu2 %v552_v38  ;;  %3342 = vmatmul.msk.f32.gmra.mxu0 %vm62_vm3, %v601_v36  ;;  %v1024_v21 = vsel %vm62_vm3, %v915_v46, 0.0 }
 0x32e   :  { %3358 = vmatmul.msk.f32.gmra.mxu2 %vm62_vm3, %v915_v46 }
 0x334   :  { %v917_v55 = vpop.permute.xlu1 %916 }
 0x335   :  { %3343 = vmatmul.msk.f32.gmra.mxu0 %vm62_vm3, %v603_v29  ;;  %v1027_v28 = vsel %vm62_vm3, %v917_v55, 0.0  ;;  %v513_v29 = vpop.f32.mrf.mxu3 }
 0x336   :  { %3359 = vmatmul.msk.f32.gmra.mxu2 %vm62_vm3, %v917_v55  ;;  %1028 = vadd.xlane.f32.xlu2 %v1027_v28 }
 0x33e   :  { %870 = vadd.xlane.f32.xlu2 %v869_v35 }
 0x345   :  { %849 = vadd.xlane.f32.xlu1 %v848_v61 }
 0x346   :  { %538 = vadd.xlane.f32.xlu0 %v537_v54 }
 0x34d   :  { %541 = vadd.xlane.f32.xlu1 %v540_v26 }
 0x34e   :  { %855 = vadd.xlane.f32.xlu0 %v854_v40 }
 0x355   :  { %707 = vadd.xlane.f32.xlu1 %v706_v5 }
 0x356   :  { %704 = vadd.xlane.f32.xlu0 %v703_v63  ;;  %3553 = vrot.lane.b32.xlu2 %v3552_v13, %s3942_s6  ;;  %v712_v13 = vsel %vm62_vm3, %v597_v48, 0.0 }
 0x35d   :  { %858 = vadd.xlane.f32.xlu1 %v857_v42 }
 0x35e   :  { %1013 = vadd.xlane.f32.xlu0 %v1012_v56  ;;  %3573 = vrot.lane.b32.xlu2 %v3572_v23, %s3942_s6  ;;  %v1021_v23 = vsel %vm62_vm3, %v913_v60, 0.0  ;;  %v536_v44 = vpop.xlane.xlu2 %535 }
 0x35f   :  { %v558_v62 = vmax.f32 %v536_v44, 1e-30 }
 0x360   :  { %v977_v38 = vpop.f32.mrf.mxu2 }
 0x361   :  { %3679 = vrcp.f32 %v558_v62 }
 0x362   :  { %v671_v52 = vpop.f32.mrf.mxu0 }
 0x365   :  { %1016 = vadd.xlane.f32.xlu1 %v1015_v43  ;;  %v827_v43 = vpop.f32.mrf.mxu1 }
 0x366   :  { %547 = vadd.xlane.f32.xlu0 %v546_v8  ;;  %v853_v2 = vpop.xlane.xlu2 %852 }
 0x367   :  { %v873_v46 = vmax.f32 %v853_v2, 1e-30  ;;  %v3680_v28 = vpop.eup %3679 }
 0x368   :  { %v574_v8 = vmul.f32 %v3680_v28, %v510_v19 }
 0x36a   :  { %v674_v61 = vpop.f32.mrf.mxu0 }
 0x36d   :  { %550 = vadd.xlane.f32.xlu1 %v549_v10 }
 0x36e   :  { %713 = vadd.xlane.f32.xlu0 %v712_v13  ;;  %v4570_v7 = vpop.xlane.xlu2 %544 }
 0x375   :  { %716 = vadd.xlane.f32.xlu1 %v715_v49 }
 0x376   :  { %864 = vadd.xlane.f32.xlu0 %v863_v20  ;;  %v1011_v16 = vpop.xlane.xlu2 %1010 }
 0x377   :  { %v1033_v57 = vmax.f32 %v1011_v16, 1e-30 }
 0x37d   :  { %1025 = vadd.xlane.f32.xlu1 %v1024_v21 }
 0x37e   :  { %1022 = vadd.xlane.f32.xlu0 %v1021_v23  ;;  %v711_v30 = vpop.xlane.xlu2 %710 }
 0x37f   :  { %v729_v54 = vmax.f32 %v711_v30, 1e-30  ;;  %v561_v30 = vmax.f32 %v4570_v7, 1e-30 }
 0x385   :  { %867 = vadd.xlane.f32.xlu1 %v866_v0 }
 0x386   :  { %722 = vadd.xlane.f32.xlu0 %v721_v39  ;;  %v4591_v63 = vpop.xlane.xlu2 %861 }
 0x38d   :  { %v605_v1 = vpop.permute.xlu1 %604 }
 0x38e   :  { %556 = vadd.xlane.f32.xlu0 %v555_v22  ;;  %v919_v4 = vpop.permute.xlu0 %918  ;;  %3344 = vmatmul.msk.f32.gmra.mxu0 %vm62_vm3, %v605_v1  ;;  %v724_v47 = vsel %vm62_vm3, %v605_v1, 0.0  ;;  %v980_v22 = vpop.f32.mrf.mxu2 }
 0x38f   :  { %3360 = vmatmul.msk.f32.gmra.mxu2 %vm62_vm3, %v919_v4  ;;  %725 = vadd.xlane.f32.xlu1 %v724_v47  ;;  %v1030_v41 = vsel %vm62_vm3, %v919_v4, 0.0  ;;  %v516_v47 = vpop.f32.mrf.mxu3 }
 0x390   :  { %v1020_v19 = vpop.xlane.xlu2 %1019 }
 0x391   :  { %v1036_v7 = vmax.f32 %v1020_v19, 1e-30 }
 0x396   :  { %1031 = vadd.xlane.f32.xlu0 %v1030_v41 }
 0x3a8   :  { %3548 = vrot.lane.b32.xlu1 %v3547_v9, %s3942_s6 }
 0x3aa   :  { %3558 = vrot.lane.b32.xlu0 %v3557_v14, %s3942_s6  ;;  %v1091_v14 = vld [vmem:[%s5614_s2 + $0x40] sm:$0xff] }
 0x3ab   :  { %1132 = vmatpush.msra.mxu3 %v1091_v14 }
 0x3ad   :  { %1133 = vmatpush.msra.mxu3 %v1090_v24 }
 0x3af   :  { %1134 = vmatpush.msra.mxu3 %v1089_v25 }
 0x3b0   :  { %3563 = vrot.lane.b32.xlu1 %v3562_v18, %s3942_s6 }
 0x3b2   :  { %3568 = vrot.lane.b32.xlu0 %v5623_v6, %s3942_s6 }
 0x3b8   :  { %v850_v9 = vpop.xlane.xlu1 %849  ;;  %3578 = vrot.lane.b32.xlu1 %v5624_v11, %s3942_s6  ;;  %v677_v11 = vpop.f32.mrf.mxu0 }
 0x3b9   :  { %v539_v12 = vpop.xlane.xlu0 %538  ;;  %v872_v33 = vmax.f32 %v850_v9, 1e-30 }
 0x3ba   :  { %3583 = vrot.lane.b32.xlu0 %v5625_v15, %s3942_s6  ;;  %v559_v58 = vmax.f32 %v539_v12, 1e-30 }
 0x3bb   :  { %3681 = vrcp.f32 %v872_v33 }
 0x3bc   :  { %3683 = vrcp.f32 %v559_v58 }
 0x3c0   :  { %v542_v17 = vpop.xlane.xlu1 %541 }
 0x3c1   :  { %v856_v18 = vpop.xlane.xlu0 %855  ;;  %v560_v55 = vmax.f32 %v542_v17, 1e-30  ;;  %v3682_v35 = vpop.eup %3681 }
 0x3c2   :  { %v3684_v26 = vpop.eup %3683  ;;  %v874_v13 = vmax.f32 %v856_v18, 1e-30  ;;  %v888_v23 = vmul.f32 %v3682_v35, %v824_v32  ;;  %v4596_v18 = vld [vmem:[%s5614_s2 + $0x300] ss:$0 sm:$0xff]  ;;  %v680_v35 = vpop.f32.mrf.mxu0 }
 0x3c3   :  { %v575_v0 = vmul.f32 %v3684_v26, %v513_v29 }
 0x3c8   :  { %v708_v48 = vpop.xlane.xlu1 %707 }
 0x3c9   :  { %v728_v31 = vmax.f32 %v708_v48, 1e-30  ;;  %v705_v36 = vpop.xlane.xlu0 %704 }
 0x3ca   :  { %v727_v60 = vmax.f32 %v705_v36, 1e-30  ;;  %v519_v36 = vpop.f32.mrf.mxu3 }
 0x3cb   :  { %3685 = vrcp.f32 %v728_v31 }
 0x3cc   :  { %3687 = vrcp.f32 %v727_v60 }
 0x3cd   :  { %3689 = vrcp.f32 %v1033_v57 }
 0x3ce   :  { %3691 = vrcp.f32 %v873_v46  ;;  %v983_v46 = vpop.f32.mrf.mxu2 }
 0x3cf   :  { %3693 = vrcp.f32 %v560_v55 }
 0x3d0   :  { %v4589_v40 = vpop.xlane.xlu1 %858  ;;  %3695 = vrcp.f32 %v729_v54 }
 0x3d1   :  { %v3686_v5 = vpop.eup %3685  ;;  %v1014_v42 = vpop.xlane.xlu0 %1013  ;;  %v875_v57 = vmax.f32 %v4589_v40, 1e-30 }
 0x3d2   :  { %v3688_v56 = vpop.eup %3687  ;;  %v1034_v10 = vmax.f32 %v1014_v42, 1e-30  ;;  %v744_v49 = vmul.f32 %v3686_v5, %v674_v61 }
 0x3d3   :  { %v743_v20 = vmul.f32 %v3688_v56, %v671_v52  ;;  %v3690_v21 = vpop.eup %3689  ;;  %v830_v52 = vpop.f32.mrf.mxu1 }
 0x3d4   :  { %3697 = vrcp.f32 %v1034_v10  ;;  %v3692_v1 = vpop.eup %3691  ;;  %v1049_v41 = vmul.f32 %v3690_v21, %v977_v38  ;;  %v752_v2 = vadd.f32 %v744_v49, %v575_v0 }
 0x3d5   :  { %v751_v39 = vadd.f32 %v743_v20, %v574_v8  ;;  %v3694_v4 = vpop.eup %3693  ;;  %3699 = vrcp.f32 %v874_v13  ;;  %v889_v9 = vmul.f32 %v3692_v1, %v827_v43  ;;  %v720_v43 = vpop.xlane.xlu2 %719 }
 0x3d6   :  { %v3696_v6 = vpop.eup %3695  ;;  %v576_v17 = vmul.f32 %v3694_v4, %v516_v47  ;;  %v986_v49 = vpop.f32.mrf.mxu2 }
 0x3d7   :  { %v896_v44 = vadd.f32 %v888_v23, %v751_v39  ;;  %v897_v25 = vadd.f32 %v889_v9, %v752_v2  ;;  %v745_v33 = vmul.f32 %v3696_v6, %v677_v11  ;;  %v522_v47 = vpop.f32.mrf.mxu3  ;;  %v732_v11 = vmax.f32 %v720_v43, 1e-30 }
 0x3d8   :  { %v1017_v51 = vpop.xlane.xlu1 %1016 }
 0x3d9   :  { %v1035_v12 = vmax.f32 %v1017_v51, 1e-30  ;;  %v548_v14 = vpop.xlane.xlu0 %547  ;;  %v1057_v15 = vadd.f32 %v1049_v41, %v896_v44  ;;  %v753_v31 = vadd.f32 %v745_v33, %v576_v17  ;;  %v876_v41 = vmax.f32 %v4591_v63, 1e-30  ;;  %v683_v44 = vpop.f32.mrf.mxu0 }
 0x3da   :  { %v3698_v16 = vpop.eup %3697  ;;  %v562_v20 = vmax.f32 %v548_v14, 1e-30 }
 0x3db   :  { %3701 = vrcp.f32 %v1035_v12  ;;  %v1065_v24 = vmul.f32 0.25, %v1057_v15  ;;  %v1050_v62 = vmul.f32 %v3698_v16, %v980_v22  ;;  %v3700_v58 = vpop.eup %3699  ;;  %v833_v56 = vpop.f32.mrf.mxu1 }
 0x3dc   :  { %v890_v29 = vmul.f32 %v3700_v58, %v830_v52  ;;  %3703 = vrcp.f32 %v561_v30 }
 0x3dd   :  { %v1073_v32 = vadd.f32 %v1065_v24, %v4596_v18  ;;  %v1058_v48 = vadd.f32 %v1050_v62, %v897_v25  ;;  %3705 = vrcp.f32 %v875_v57  ;;  %v554_v17 = vpop.xlane.xlu2 %553 }
 0x3de   :  { %v898_v26 = vadd.f32 %v890_v29, %v753_v31  ;;  %v989_v25 = vpop.f32.mrf.mxu2 }
 0x3df   :  { %v1081_v60 = vmax.f32 %v1073_v32, 0.0  ;;  %v1066_v38 = vmul.f32 0.25, %v1058_v48 }
 0x3e0   :  { %v551_v55 = vpop.xlane.xlu1 %550 }
 0x3e1   :  { %v3702_v28 = vpop.eup %3701  ;;  %3361 = vmatmul.msk.f32.vlgmr.msra.gmra.mxu3 %vm1094_vm4, %v1081_v60  ;;  %v714_v61 = vpop.xlane.xlu0 %713  ;;  %v1074_v42 = vadd.f32 %v1066_v38, %v4596_v18  ;;  %v563_v0 = vmax.f32 %v551_v55, 1e-30  ;;  %v564_v38 = vmax.f32 %v554_v17, 1e-30 }
 0x3e2   :  { %v730_v54 = vmax.f32 %v714_v61, 1e-30  ;;  %v1051_v5 = vmul.f32 %v3702_v28, %v983_v46  ;;  %v3704_v8 = vpop.eup %3703  ;;  %v525_v60 = vpop.f32.mrf.mxu3 }
 0x3e3   :  { %v1082_v10 = vmax.f32 %v1074_v42, 0.0  ;;  %v3706_v23 = vpop.eup %3705  ;;  %v577_v4 = vmul.f32 %v3704_v8, %v519_v36  ;;  %v836_v15 = vpop.f32.mrf.mxu1 }
 0x3e4   :  { %3707 = vrcp.f32 %v730_v54  ;;  %v1059_v40 = vadd.f32 %v1051_v5, %v898_v26  ;;  %v891_v12 = vmul.f32 %v3706_v23, %v833_v56  ;;  %v686_v46 = vpop.f32.mrf.mxu0 }
 0x3e5   :  { %3709 = vrcp.f32 %v1036_v7  ;;  %v1029_v7 = vpop.xlane.xlu2 %1028 }
 0x3e6   :  { %v1067_v13 = vmul.f32 0.25, %v1059_v40 }
 0x3e8   :  { %v717_v21 = vpop.xlane.xlu1 %716  ;;  %v1075_v51 = vadd.f32 %v1067_v13, %v4596_v18 }
 0x3e9   :  { %v731_v39 = vmax.f32 %v717_v21, 1e-30  ;;  %3362 = vmatmul.msk.f32.gmra.mxu3 %vm1094_vm4, %v1082_v10  ;;  %v865_v1 = vpop.xlane.xlu0 %864 }
 0x3ea   :  { %v3708_v22 = vpop.eup %3707  ;;  %v877_v9 = vmax.f32 %v865_v1, 1e-30  ;;  %v1083_v19 = vmax.f32 %v1075_v51, 0.0  ;;  %v528_v51 = vpop.f32.mrf.mxu3 }
 0x3eb   :  { %v746_v2 = vmul.f32 %v3708_v22, %v680_v35  ;;  %3711 = vrcp.f32 %v731_v39  ;;  %v3710_v6 = vpop.eup %3709  ;;  %v839_v5 = vpop.f32.mrf.mxu1  ;;  %v1039_v22 = vmax.f32 %v1029_v7, 1e-30 }
 0x3ec   :  { %3713 = vrcp.f32 %v562_v20  ;;  %v1052_v16 = vmul.f32 %v3710_v6, %v986_v49  ;;  %v992_v20 = vpop.f32.mrf.mxu2 }
 0x3ed   :  { %3715 = vrcp.f32 %v563_v0  ;;  %v754_v14 = vadd.f32 %v746_v2, %v577_v4 }
 0x3ee   :  { %3717 = vrcp.f32 %v876_v41 }
 0x3ef   :  { %v899_v24 = vadd.f32 %v891_v12, %v754_v14  ;;  %3719 = vrcp.f32 %v877_v9  ;;  %v871_v9 = vpop.xlane.xlu2 %870 }
 0x3f0   :  { %v1026_v63 = vpop.xlane.xlu1 %1025  ;;  %3721 = vrcp.f32 %v732_v11 }
 0x3f1   :  { %v3712_v62 = vpop.eup %3711  ;;  %v1038_v52 = vmax.f32 %v1026_v63, 1e-30  ;;  %3363 = vmatmul.msk.f32.gmra.mxu3 %vm1094_vm4, %v1083_v19  ;;  %v1023_v33 = vpop.xlane.xlu0 %1022  ;;  %v1060_v58 = vadd.f32 %v1052_v16, %v899_v24 }
 0x3f2   :  { %v3714_v30 = vpop.eup %3713  ;;  %v1037_v32 = vmax.f32 %v1023_v33, 1e-30  ;;  %v747_v31 = vmul.f32 %v3712_v62, %v683_v44  ;;  %v689_v16 = vpop.f32.mrf.mxu0  ;;  %v879_v33 = vmax.f32 %v871_v9, 1e-30 }
 0x3f3   :  { %v3716_v48 = vpop.eup %3715  ;;  %3723 = vrcp.f32 %v1038_v52  ;;  %v1068_v36 = vmul.f32 0.25, %v1060_v58  ;;  %v578_v29 = vmul.f32 %v3714_v30, %v522_v47  ;;  %v842_v52 = vpop.f32.mrf.mxu1 }
 0x3f4   :  { %3725 = vrcp.f32 %v1037_v32  ;;  %v3718_v57 = vpop.eup %3717  ;;  %v579_v35 = vmul.f32 %v3716_v48, %v525_v60  ;;  %v995_v58 = vpop.f32.mrf.mxu2 }
 0x3f5   :  { %v1076_v55 = vadd.f32 %v1068_v36, %v4596_v18  ;;  %v3720_v28 = vpop.eup %3719  ;;  %v755_v26 = vadd.f32 %v747_v31, %v578_v29  ;;  %v892_v43 = vmul.f32 %v3718_v57, %v836_v15  ;;  %3727 = vrcp.f32 %v564_v38  ;;  %v531_v7 = vpop.f32.mrf.mxu3 }
 0x3f6   :  { %v3722_v61 = vpop.eup %3721  ;;  %v893_v8 = vmul.f32 %v3720_v28, %v839_v5 }
 0x3f7   :  { %v1084_v54 = vmax.f32 %v1076_v55, 0.0  ;;  %v748_v42 = vmul.f32 %v3722_v61, %v686_v46  ;;  %v900_v0 = vadd.f32 %v892_v43, %v755_v26 }
 0x3f8   :  { %v868_v56 = vpop.xlane.xlu1 %867 }
 0x3f9   :  { %v3724_v40 = vpop.eup %3723  ;;  %v878_v10 = vmax.f32 %v868_v56, 1e-30  ;;  %3364 = vmatmul.msk.f32.gmra.mxu3 %vm1094_vm4, %v1084_v54  ;;  %v723_v13 = vpop.xlane.xlu0 %722  ;;  %v756_v23 = vadd.f32 %v748_v42, %v579_v35 }
 0x3fa   :  { %v3726_v49 = vpop.eup %3725  ;;  %v733_v21 = vmax.f32 %v723_v13, 1e-30  ;;  %v1054_v1 = vmul.f32 %v3724_v40, %v992_v20 }
 0x3fb   :  { %3729 = vrcp.f32 %v878_v10  ;;  %v1053_v39 = vmul.f32 %v3726_v49, %v989_v25  ;;  %v901_v47 = vadd.f32 %v893_v8, %v756_v23  ;;  %v3728_v41 = vpop.eup %3727  ;;  %v845_v40 = vpop.f32.mrf.mxu1 }
 0x3fc   :  { %3731 = vrcp.f32 %v733_v21  ;;  %v580_v15 = vmul.f32 %v3728_v41, %v528_v51 }
 0x3fd   :  { %v1061_v4 = vadd.f32 %v1053_v39, %v900_v0  ;;  %v1062_v2 = vadd.f32 %v1054_v1, %v901_v47  ;;  %3733 = vrcp.f32 %v1039_v22  ;;  %v3554_v1 = vpop.permute.xlu2 %3553 }
 0x3ff   :  { %v1069_v44 = vmul.f32 0.25, %v1061_v4  ;;  %v1070_v62 = vmul.f32 0.25, %v1062_v2  ;;  %v3556_v2 = vunpack.i.h.bf16 %v3554_v1 }
 0x401   :  { %v3730_v6 = vpop.eup %3729  ;;  %v557_v11 = vpop.xlane.xlu0 %556  ;;  %v1077_v12 = vadd.f32 %v1069_v44, %v4596_v18  ;;  %v1078_v36 = vadd.f32 %v1070_v62, %v4596_v18  ;;  %v3555_v44 = vunpack.i.l.bf16 %v3554_v1 }
 0x402   :  { %v3732_v14 = vpop.eup %3731  ;;  %v565_v17 = vmax.f32 %v557_v11, 1e-30  ;;  %v726_v19 = vpop.xlane.xlu1 %725  ;;  %v894_v30 = vmul.f32 %v3730_v6, %v842_v52 }
 0x403   :  { %v749_v24 = vmul.f32 %v3732_v14, %v689_v16  ;;  %v734_v25 = vmax.f32 %v726_v19, 1e-30  ;;  %v1085_v63 = vmax.f32 %v1077_v12, 0.0  ;;  %v3734_v48 = vpop.eup %3733  ;;  %v1086_v35 = vmax.f32 %v1078_v36, 0.0 }
 0x404   :  { %3735 = vrcp.f32 %v565_v17  ;;  %v1055_v31 = vmul.f32 %v3734_v48, %v995_v58 }
 0x405   :  { %v757_v32 = vadd.f32 %v749_v24, %v580_v15  ;;  %3737 = vrcp.f32 %v734_v25  ;;  %3365 = vmatmul.msk.f32.gmra.mxu3 %vm1094_vm4, %v1085_v63  ;;  %v3574_v15 = vpop.permute.xlu2 %3573 }
 0x406   :  { %3739 = vrcp.f32 %v879_v33  ;;  %v3575_v17 = vunpack.i.l.bf16 %v3574_v15  ;;  %v3576_v24 = vunpack.i.h.bf16 %v3574_v15 }
 0x407   :  { %v902_v57 = vadd.f32 %v894_v30, %v757_v32 }
 0x409   :  { %v1032_v60 = vpop.xlane.xlu0 %1031  ;;  %v1063_v38 = vadd.f32 %v1055_v31, %v902_v57 }
 0x40a   :  { %v3736_v46 = vpop.eup %3735  ;;  %v1040_v29 = vmax.f32 %v1032_v60, 1e-30 }
 0x40b   :  { %v3738_v55 = vpop.eup %3737  ;;  %v692_v28 = vpop.f32.mrf.mxu0  ;;  %v1071_v61 = vmul.f32 0.25, %v1063_v38  ;;  %v581_v26 = vmul.f32 %v3736_v46, %v531_v7 }
 0x40c   :  { %3741 = vrcp.f32 %v1040_v29  ;;  %v750_v54 = vmul.f32 %v3738_v55, %v692_v28  ;;  %v3740_v5 = vpop.eup %3739  ;;  %v1093_v29 = vld [vmem:[%s5614_s2 + $0x160] sm:$0xf0]  ;;  %v3935_v28 = vld [vmem:[%s5614_s2 + $0x170] sm:$0xf] }
 0x40d   :  { %3366 = vmatmul.msk.f32.gmra.mxu3 %vm1094_vm4, %v1086_v35  ;;  %v1079_v56 = vadd.f32 %v1071_v61, %v4596_v18  ;;  %v895_v43 = vmul.f32 %v3740_v5, %v845_v40  ;;  %v1266_v55 = vrot.slane %v1093_v29, 4 }
 0x40e   :  { %v758_v42 = vadd.f32 %v750_v54, %v581_v26 }
 0x40f   :  { %v1087_v20 = vmax.f32 %v1079_v56, 0.0 }
 0x410   :  { %v903_v13 = vadd.f32 %v895_v43, %v758_v42 }
 0x412   :  { %v3742_v8 = vpop.eup %3741  ;;  %v998_v10 = vpop.f32.mrf.mxu2 }
 0x413   :  { %v1056_v49 = vmul.f32 %v3742_v8, %v998_v10 }
 0x415   :  { %v1064_v21 = vadd.f32 %v1056_v49, %v903_v13  ;;  %3367 = vmatmul.msk.f32.gmra.mxu3 %vm1094_vm4, %v1087_v20 }
 0x417   :  { %v1072_v23 = vmul.f32 0.25, %v1064_v21 }
 0x419   :  { %v1080_v0 = vadd.f32 %v1072_v23, %v4596_v18 }
 0x41a   :  { %v3549_v39 = vpop.permute.xlu1 %3548 }
 0x41b   :  { %v1088_v22 = vmax.f32 %v1080_v0, 0.0  ;;  %v3551_v4 = vunpack.i.h.bf16 %v3549_v39  ;;  %v3550_v47 = vunpack.i.l.bf16 %v3549_v39 }
 0x41c   :  { %v3559_v41 = vpop.permute.xlu0 %3558 }
 0x41d   :  { %3368 = vmatmul.msk.f32.gmra.mxu3 %vm1094_vm4, %v1088_v22  ;;  %1224 = vmatpush.msra.mxu0 %v3550_v47  ;;  %v3560_v51 = vunpack.i.l.bf16 %v3559_v41  ;;  %v3561_v9 = vunpack.i.h.bf16 %v3559_v41 }
 0x41f   :  { %1225 = vmatpush.msra.mxu0 %v3551_v4 }
 0x421   :  { %1226 = vmatpush.msra.mxu0 %v3555_v44 }
 0x422   :  { %v3564_v6 = vpop.permute.xlu1 %3563 }
 0x423   :  { %1227 = vmatpush.msra.mxu0 %v3556_v2  ;;  %v3565_v11 = vunpack.i.l.bf16 %v3564_v6  ;;  %v3566_v12 = vunpack.i.h.bf16 %v3564_v6 }
 0x424   :  { %v3569_v18 = vpop.permute.xlu0 %3568 }
 0x425   :  { %1228 = vmatpush.msra.mxu0 %v3560_v51  ;;  %v3570_v14 = vunpack.i.l.bf16 %v3569_v18  ;;  %v3571_v16 = vunpack.i.h.bf16 %v3569_v18 }
 0x427   :  { %1229 = vmatpush.msra.mxu0 %v3561_v9 }
 0x429   :  { %1230 = vmatpush.msra.mxu0 %v3565_v11 }
 0x42a   :  { %v3579_v19 = vpop.permute.xlu1 %3578 }
 0x42b   :  { %1231 = vmatpush.msra.mxu0 %v3566_v12  ;;  %v3580_v25 = vunpack.i.l.bf16 %v3579_v19  ;;  %v3581_v62 = vunpack.i.h.bf16 %v3579_v19 }
 0x42c   :  { %v3584_v63 = vpop.permute.xlu0 %3583 }
 0x42d   :  { %1232 = vmatpush.msra.mxu0 %v3570_v14  ;;  %v3585_v52 = vunpack.i.l.bf16 %v3584_v63  ;;  %v3586_v33 = vunpack.i.h.bf16 %v3584_v63 }
 0x42f   :  { %1233 = vmatpush.msra.mxu0 %v3571_v16 }
 0x431   :  { %1234 = vmatpush.msra.mxu0 %v3575_v17 }
 0x433   :  { %1235 = vmatpush.msra.mxu0 %v3576_v24 }
 0x435   :  { %1236 = vmatpush.msra.mxu0 %v3580_v25 }
 0x437   :  { %1237 = vmatpush.msra.mxu0 %v3581_v62 }
 0x439   :  { %1238 = vmatpush.msra.mxu0 %v3585_v52 }
 0x43b   :  { %1239 = vmatpush.msra.mxu0 %v3586_v33 }
 0x464   :  { %v1136_v58 = vpop.f32.mrf.mxu3 }
 0x465   :  { %1240 = vmatmul.f32.vlgmr.msra.gmra.mxu0 %v1136_v58 }
 0x46c   :  { %v1139_v30 = vpop.f32.mrf.mxu3 }
 0x46d   :  { %1243 = vmatmul.f32.gmra.mxu0 %v1139_v30  ;;  %v4627_v38 = vpack.i.bf16 %v1136_v58, %v1139_v30 }
 0x474   :  { %v4617_v32 = vpop.f32.mrf.mxu3 }
 0x475   :  { %1246 = vmatmul.f32.gmra.mxu0 %v4617_v32 }
 0x47c   :  { %v4620_v48 = vpop.f32.mrf.mxu3 }
 0x47d   :  { %1249 = vmatmul.f32.gmra.mxu0 %v4620_v48  ;;  %v3617_v13 = vpack.i.bf16 %v4617_v32, %v4620_v48 }
 0x488   :  { %v1148_v31 = vpop.f32.mrf.mxu3 }
 0x489   :  { %1252 = vmatmul.f32.gmra.mxu0 %v1148_v31 }
 0x490   :  { %v1151_v36 = vpop.f32.mrf.mxu3 }
 0x491   :  { %1255 = vmatmul.f32.gmra.mxu0 %v1151_v36  ;;  %v4623_v57 = vpack.i.bf16 %v1148_v31, %v1151_v36 }
 0x493   :  { %3613 = vrot.lane.b32.xlu0 %v4623_v57, %s3939_s13 }
 0x498   :  { %v1154_v60 = vpop.f32.mrf.mxu3 }
 0x499   :  { %1258 = vmatmul.f32.gmra.mxu0 %v1154_v60 }
 0x49b   :  { %3633 = vrot.lane.b32.xlu0 %v4627_v38, %s3941_s1 }
 0x4a0   :  { %v1157_v46 = vpop.f32.mrf.mxu3 }
 0x4a1   :  { %1261 = vmatmul.f32.gmra.mxu0 %v1157_v46  ;;  %1276 = vmatpush.xpose.msra.mxu1 %v1157_v46  ;;  %v3587_v10 = vpack.i.bf16 %v1154_v60, %v1157_v46 }
 0x4a2   :  { %1561 = vmatpush.msrb.mxu3 %v1157_v46 }
 0x4a3   :  { %3643 = vrot.lane.b32.xlu0 %v4627_v38, %s3939_s13 }
 0x4a4   :  { %1562 = vmatpush.msrb.mxu3 %v1154_v60 }
 0x4a5   :  { %1277 = vmatpush.xpose.msra.mxu1 %v1154_v60 }
 0x4a6   :  { %1563 = vmatpush.msrb.mxu3 %v1151_v36 }
 0x4a8   :  { %1564 = vmatpush.msrb.mxu3 %v1148_v31 }
 0x4a9   :  { %1278 = vmatpush.xpose.msra.mxu1 %v1151_v36 }
 0x4aa   :  { %1565 = vmatpush.msrb.mxu3 %v4620_v48 }
 0x4ac   :  { %1566 = vmatpush.msrb.mxu3 %v4617_v32 }
 0x4ad   :  { %1279 = vmatpush.xpose.msra.mxu1 %v1148_v31 }
 0x4ae   :  { %1567 = vmatpush.msrb.mxu3 %v1139_v30 }
 0x4b0   :  { %1568 = vmatpush.msrb.mxu3 %v1136_v58 }
 0x4b1   :  { %1280 = vmatpush.xpose.msra.mxu1 %v4620_v48 }
 0x4b5   :  { %1281 = vmatpush.xpose.msra.mxu1 %v4617_v32 }
 0x4b9   :  { %1282 = vmatpush.xpose.msra.mxu1 %v1139_v30 }
 0x4bd   :  { %1283 = vmatpush.xpose.msra.mxu1 %v1136_v58 }
 0x4c0   :  { %1284 = vmatmul.f32.vlgmr.msra.gmra.mxu1 %v1266_v55 }
 0x4c1   :  { %3369 = vmatpush.msk.msrb.mxu1 %vm260_vm1, %v3935_v28 }
 0x4e2   :  { %v1241_v35 = vpop.f32.mrf.mxu0 }
 0x4e3   :  { %3370 = vmatmul.msk.f32.vlgmr.msrb.gmra.mxu1 %vm235_vm2, %v1241_v35  ;;  %3379 = vmatmul.msk.f32.vlgmr.msrb.gmra.mxu2 %vm235_vm2, %v1241_v35 }
 0x4ea   :  { %v1244_v61 = vpop.f32.mrf.mxu0 }
 0x4eb   :  { %3371 = vmatmul.msk.f32.gmra.mxu1 %vm235_vm2, %v1244_v61  ;;  %3380 = vmatmul.msk.f32.gmra.mxu2 %vm235_vm2, %v1244_v61 }
 0x4f2   :  { %v1247_v7 = vpop.f32.mrf.mxu0 }
 0x4f3   :  { %3372 = vmatmul.msk.f32.gmra.mxu1 %vm235_vm2, %v1247_v7  ;;  %3381 = vmatmul.msk.f32.gmra.mxu2 %vm235_vm2, %v1247_v7 }
 0x4fa   :  { %v1250_v54 = vpop.f32.mrf.mxu0 }
 0x4fb   :  { %3373 = vmatmul.msk.f32.gmra.mxu1 %vm235_vm2, %v1250_v54  ;;  %3382 = vmatmul.msk.f32.gmra.mxu2 %vm235_vm2, %v1250_v54 }
 0x506   :  { %v1253_v26 = vpop.f32.mrf.mxu0 }
 0x507   :  { %3374 = vmatmul.msk.f32.gmra.mxu1 %vm235_vm2, %v1253_v26  ;;  %3383 = vmatmul.msk.f32.gmra.mxu2 %vm235_vm2, %v1253_v26 }
 0x50e   :  { %v1256_v5 = vpop.f32.mrf.mxu0 }
 0x50f   :  { %3375 = vmatmul.msk.f32.gmra.mxu1 %vm235_vm2, %v1256_v5  ;;  %3384 = vmatmul.msk.f32.gmra.mxu2 %vm235_vm2, %v1256_v5 }
 0x516   :  { %v1259_v42 = vpop.f32.mrf.mxu0 }
 0x517   :  { %3376 = vmatmul.msk.f32.gmra.mxu1 %vm235_vm2, %v1259_v42  ;;  %3385 = vmatmul.msk.f32.gmra.mxu2 %vm235_vm2, %v1259_v42 }
 0x51e   :  { %v1262_v56 = vpop.f32.mrf.mxu0 }
 0x51f   :  { %3377 = vmatmul.msk.f32.gmra.mxu1 %vm235_vm2, %v1262_v56  ;;  %3386 = vmatmul.msk.f32.gmra.mxu2 %vm235_vm2, %v1262_v56 }
 0x53d   :  { %v1285_v40 = vpop.f32.mrf.mxu1 }
 0x53e   :  { %v1295_v43 = vrot.slane %v1285_v40, 3  ;;  %v1289_v8 = vrot.slane %v1285_v40, 1  ;;  %v1293_v16 = vrot.slane %v1285_v40, 2 }
 0x540   :  { %1296 = vrot.lane.b32.xlu1 %v1295_v43, %s3939_s13  ;;  %1290 = vrot.lane.b32.xlu2 %v1289_v8, %s3939_s13 }
 0x548   :  { %3588 = vrot.lane.b32.xlu1 %v3587_v10, %s3941_s1  ;;  %3618 = vrot.lane.b32.xlu2 %v3617_v13, %s3941_s1 }
 0x550   :  { %3593 = vrot.lane.b32.xlu1 %v3587_v10, %s3940_s28 }
 0x558   :  { %3598 = vrot.lane.b32.xlu1 %v3587_v10, %s3939_s13 }
 0x560   :  { %3603 = vrot.lane.b32.xlu1 %v4623_v57, %s3941_s1  ;;  %v1344_v49 = vpop.f32.mrf.mxu1 }
 0x566   :  { %v1385_v23 = vpop.f32.mrf.mxu2 }
 0x568   :  { %3608 = vrot.lane.b32.xlu1 %v4623_v57, %s3940_s28  ;;  %v1347_v20 = vpop.f32.mrf.mxu1 }
 0x56e   :  { %v1388_v39 = vpop.f32.mrf.mxu2 }
 0x570   :  { %3623 = vrot.lane.b32.xlu1 %v3617_v13, %s3940_s28  ;;  %v1350_v21 = vpop.f32.mrf.mxu1 }
 0x576   :  { %v1391_v22 = vpop.f32.mrf.mxu2 }
 0x578   :  { %3628 = vrot.lane.b32.xlu1 %v3617_v13, %s3939_s13  ;;  %v1353_v0 = vpop.f32.mrf.mxu1 }
 0x57e   :  { %v1394_v47 = vpop.f32.mrf.mxu2 }
 0x580   :  { %3638 = vrot.lane.b32.xlu1 %v4627_v38, %s3940_s28 }
 0x584   :  { %v1356_v1 = vpop.f32.mrf.mxu1 }
 0x58a   :  { %v1397_v18 = vpop.f32.mrf.mxu2 }
 0x58c   :  { %v4676_v4 = vpop.f32.mrf.mxu1 }
 0x592   :  { %v4690_v12 = vpop.f32.mrf.mxu2 }
 0x594   :  { %v1362_v51 = vpop.f32.mrf.mxu1 }
 0x59a   :  { %v1291_v41 = vpop.permute.xlu2 %1290  ;;  %v1403_v62 = vpop.f32.mrf.mxu2 }
 0x59b   :  { %v1299_v44 = vsel %vm62_vm3, %v1285_v40, %v1291_v41 }
 0x59c   :  { %v4679_v2 = vperm.slane %v1299_v44, 0 }
 0x59e   :  { %v4682_v6 = vadd.f32 %v1353_v0, %v4679_v2  ;;  %v4685_v9 = vadd.f32 %v1350_v21, %v4679_v2  ;;  %v4688_v11 = vadd.f32 %v1362_v51, %v4679_v2  ;;  %v1345_v14 = vadd.f32 %v1344_v49, %v4679_v2  ;;  %v3614_v0 = vpop.permute.xlu0 %3613 }
 0x59f   :  { %v1348_v15 = vadd.f32 %v1347_v20, %v4679_v2  ;;  %v1357_v32 = vadd.f32 %v1356_v1, %v4679_v2  ;;  %v3615_v1 = vunpack.i.l.bf16 %v3614_v0 }
 0x5a0   :  { %v1409_v25 = vmul.f32 0.2, %v1345_v14 }
 0x5a1   :  { %v1411_v63 = vmul.f32 0.2, %v1348_v15  ;;  %v1417_v61 = vmul.f32 0.2, %v1357_v32 }
 0x5a2   :  { %v1425_v57 = vmax.f32 %v1345_v14, %v1409_v25 }
 0x5a3   :  { %v1427_v38 = vmax.f32 %v1348_v15, %v1411_v63 }
 0x5a4   :  { %v4711_v7 = vadd.f32 %v1425_v57, %v4269_v53 }
 0x5a5   :  { %v4717_v26 = vadd.f32 %v1427_v38, %v4259_v45 }
 0x5b2   :  { %v1297_v17 = vpop.permute.xlu1 %1296 }
 0x5b3   :  { %v1300_v19 = vsel %vm62_vm3, %v1293_v16, %v1297_v17 }
 0x5b4   :  { %v4695_v24 = vperm.slane %v1300_v19, 0 }
 0x5b6   :  { %v1386_v52 = vadd.f32 %v1385_v23, %v4695_v24  ;;  %v1389_v33 = vadd.f32 %v1388_v39, %v4695_v24  ;;  %v1398_v58 = vadd.f32 %v1397_v18, %v4695_v24  ;;  %v4701_v30 = vadd.f32 %v1394_v47, %v4695_v24  ;;  %v3634_v18 = vpop.permute.xlu0 %3633 }
 0x5b7   :  { %v4705_v48 = vadd.f32 %v1391_v22, %v4695_v24  ;;  %v4708_v31 = vadd.f32 %v1403_v62, %v4695_v24  ;;  %v3616_v22 = vunpack.i.h.bf16 %v3614_v0  ;;  %v3635_v16 = vunpack.i.l.bf16 %v3634_v18 }
 0x5b8   :  { %v1410_v36 = vmul.f32 0.2, %v1386_v52  ;;  %v1412_v60 = vmul.f32 0.2, %v1389_v33  ;;  %v1418_v28 = vmul.f32 0.2, %v1398_v58  ;;  %v3636_v19 = vunpack.i.h.bf16 %v3634_v18 }
 0x5b9   :  { %v1414_v0 = vmul.f32 0.2, %v4705_v48 }
 0x5ba   :  { %v3589_v46 = vpop.permute.xlu1 %3588  ;;  %v1426_v29 = vmax.f32 %v1386_v52, %v1410_v36  ;;  %v1428_v55 = vmax.f32 %v1389_v33, %v1412_v60  ;;  %v1434_v43 = vmax.f32 %v1398_v58, %v1418_v28 }
 0x5bb   :  { %v3590_v35 = vunpack.i.l.bf16 %v3589_v46  ;;  %v3591_v42 = vunpack.i.h.bf16 %v3589_v46 }
 0x5bc   :  { %v4714_v54 = vadd.f32 %v1426_v29, %v4269_v53  ;;  %v4720_v5 = vadd.f32 %v1428_v55, %v4259_v45  ;;  %v1433_v53 = vmax.f32 %v1357_v32, %v1417_v61  ;;  %v4727_v10 = vadd.f32 %v1434_v43, %v4337_v59 }
 0x5bd   :  { %2028 = vmatpush.msra.mxu2 %v3590_v35 }
 0x5be   :  { %v1457_v56 = vmax.f32 %v4711_v7, %v4714_v54  ;;  %v1460_v40 = vmax.f32 %v4717_v26, %v4720_v5  ;;  %v4730_v45 = vadd.f32 %v1433_v53, %v4337_v59  ;;  %v3619_v59 = vpop.permute.xlu2 %3618  ;;  %v3644_v32 = vpop.permute.xlu0 %3643 }
 0x5bf   :  { %2029 = vmatpush.msra.mxu2 %v3591_v42  ;;  %v3620_v51 = vunpack.i.l.bf16 %v3619_v59  ;;  %v3621_v14 = vunpack.i.h.bf16 %v3619_v59  ;;  %v3645_v57 = vunpack.i.l.bf16 %v3644_v32  ;;  %v3646_v60 = vunpack.i.h.bf16 %v3644_v32 }
 0x5c0   :  { %1458 = vmax.xlane.f32.xlu0 %v1457_v56  ;;  %1461 = vmax.xlane.f32.xlu2 %v1460_v40  ;;  %v1469_v20 = vmax.f32 %v4730_v45, %v4727_v10  ;;  %v1430_v59 = vmax.f32 %v4705_v48, %v1414_v0 }
 0x5c2   :  { %v3594_v8 = vpop.permute.xlu1 %3593 }
 0x5c3   :  { %v3595_v13 = vunpack.i.l.bf16 %v3594_v8  ;;  %v3596_v49 = vunpack.i.h.bf16 %v3594_v8 }
 0x5c5   :  { %1722 = vmatpush.msrb.mxu0 %v3595_v13 }
 0x5c7   :  { %1723 = vmatpush.msrb.mxu0 %v3596_v49 }
 0x5c8   :  { %1470 = vmax.xlane.f32.xlu0 %v1469_v20 }
 0x5ca   :  { %v3599_v21 = vpop.permute.xlu1 %3598 }
 0x5cb   :  { %v3600_v23 = vunpack.i.l.bf16 %v3599_v21  ;;  %v3601_v39 = vunpack.i.h.bf16 %v3599_v21 }
 0x5cd   :  { %1875 = vmatpush.msra.mxu1 %v3600_v23  ;;  %v1416_v23 = vmul.f32 0.2, %v4701_v30 }
 0x5cf   :  { %1876 = vmatpush.msra.mxu1 %v3601_v39  ;;  %v1415_v39 = vmul.f32 0.2, %v4682_v6 }
 0x5d1   :  { %1877 = vmatpush.msra.mxu1 %v3615_v1  ;;  %v1413_v1 = vmul.f32 0.2, %v4685_v9 }
 0x5d2   :  { %v3604_v47 = vpop.permute.xlu1 %3603 }
 0x5d3   :  { %v3605_v41 = vunpack.i.l.bf16 %v3604_v47  ;;  %1878 = vmatpush.msra.mxu1 %v3616_v22  ;;  %v3606_v44 = vunpack.i.h.bf16 %v3604_v47  ;;  %v1429_v18 = vmax.f32 %v4685_v9, %v1413_v1 }
 0x5d5   :  { %2030 = vmatpush.msra.mxu2 %v3605_v41  ;;  %v1432_v41 = vmax.f32 %v4701_v30, %v1416_v23 }
 0x5d7   :  { %2031 = vmatpush.msra.mxu2 %v3606_v44  ;;  %v1401_v44 = vadd.f32 %v4690_v12, %v4695_v24 }
 0x5d9   :  { %2032 = vmatpush.msra.mxu2 %v3620_v51  ;;  %v1431_v51 = vmax.f32 %v4682_v6, %v1415_v39  ;;  %v1420_v30 = vmul.f32 0.2, %v1401_v44 }
 0x5da   :  { %v3609_v15 = vpop.permute.xlu1 %3608 }
 0x5db   :  { %v3610_v17 = vunpack.i.l.bf16 %v3609_v15  ;;  %2033 = vmatpush.msra.mxu2 %v3621_v14  ;;  %v3611_v25 = vunpack.i.h.bf16 %v3609_v15  ;;  %v1360_v15 = vadd.f32 %v4676_v4, %v4679_v2  ;;  %v1447_v48 = vadd.f32 %v1431_v51, %v4309_v27 }
 0x5dd   :  { %1724 = vmatpush.msrb.mxu0 %v3610_v17  ;;  %2034 = vmatpush.msra.mxu2 %v3635_v16  ;;  %v4775_v17 = vadd.f32 %v1432_v41, %v4309_v27  ;;  %v1419_v6 = vmul.f32 0.2, %v1360_v15 }
 0x5df   :  { %1725 = vmatpush.msrb.mxu0 %v3611_v25  ;;  %2035 = vmatpush.msra.mxu2 %v3636_v19  ;;  %v1446_v19 = vadd.f32 %v1430_v59, %v4264_v50  ;;  %v1445_v25 = vadd.f32 %v1429_v18, %v4264_v50  ;;  %v1466_v9 = vmax.f32 %v1447_v48, %v4775_v17 }
 0x5e2   :  { %v3624_v63 = vpop.permute.xlu1 %3623 }
 0x5e3   :  { %v3625_v62 = vunpack.i.l.bf16 %v3624_v63  ;;  %v3626_v52 = vunpack.i.h.bf16 %v3624_v63 }
 0x5e5   :  { %1726 = vmatpush.msrb.mxu0 %v3625_v62  ;;  %v1435_v62 = vmax.f32 %v1360_v15, %v1419_v6 }
 0x5e7   :  { %1727 = vmatpush.msrb.mxu0 %v3626_v52  ;;  %v1451_v52 = vadd.f32 %v1435_v62, %v4350_v34 }
 0x5ea   :  { %v3629_v33 = vpop.permute.xlu1 %3628 }
 0x5eb   :  { %v3630_v58 = vunpack.i.l.bf16 %v3629_v33  ;;  %v3631_v36 = vunpack.i.h.bf16 %v3629_v33 }
 0x5ed   :  { %1879 = vmatpush.msra.mxu1 %v3630_v58 }
 0x5ef   :  { %1880 = vmatpush.msra.mxu1 %v3631_v36 }
 0x5f1   :  { %1881 = vmatpush.msra.mxu1 %v3645_v57  ;;  %v1421_v57 = vmul.f32 0.2, %v4688_v11 }
 0x5f2   :  { %v3639_v38 = vpop.permute.xlu1 %3638 }
 0x5f3   :  { %v3640_v46 = vunpack.i.l.bf16 %v3639_v38  ;;  %1882 = vmatpush.msra.mxu1 %v3646_v60  ;;  %v3641_v29 = vunpack.i.h.bf16 %v3639_v38  ;;  %v1437_v60 = vmax.f32 %v4688_v11, %v1421_v57 }
 0x5f5   :  { %1728 = vmatpush.msrb.mxu0 %v3640_v46  ;;  %v4810_v46 = vadd.f32 %v1437_v60, %v4314_v3 }
 0x5f7   :  { %1729 = vmatpush.msrb.mxu0 %v3641_v29 }
 0x633   :  { %v1459_v55 = vpop.xlane.xlu0 %1458  ;;  %v1462_v28 = vpop.xlane.xlu2 %1461 }
 0x634   :  { %v1481_v35 = vsub.f32 %v4711_v7, %v1459_v55  ;;  %v1482_v61 = vsub.f32 %v4714_v54, %v1459_v55  ;;  %v1483_v42 = vsub.f32 %v4717_v26, %v1462_v28  ;;  %v1484_v53 = vsub.f32 %v4720_v5, %v1462_v28  ;;  %v1365_v26 = vpop.f32.mrf.mxu1  ;;  %v1406_v5 = vpop.f32.mrf.mxu2 }
 0x635   :  { %v1407_v20 = vadd.f32 %v1406_v5, %v4695_v24  ;;  %v1366_v21 = vadd.f32 %v1365_v26, %v4679_v2  ;;  %v1463_v24 = vmax.f32 %v1445_v25, %v1446_v19  ;;  %v1436_v2 = vmax.f32 %v1401_v44, %v1420_v30 }
 0x636   :  { %v1497_v56 = vmul.f32 1.442695, %v1481_v35  ;;  %v1499_v40 = vmul.f32 1.442695, %v1482_v61  ;;  %v1501_v43 = vmul.f32 1.442695, %v1483_v42 }
 0x637   :  { %v1503_v8 = vmul.f32 1.442695, %v1484_v53  ;;  %v1424_v22 = vmul.f32 0.2, %v1407_v20  ;;  %v1423_v47 = vmul.f32 0.2, %v1366_v21  ;;  %v4787_v27 = vadd.f32 %v1436_v2, %v4350_v34 }
 0x638   :  { %3743 = vpow2.f32 %v1497_v56  ;;  %v1422_v34 = vmul.f32 0.2, %v4708_v31 }
 0x639   :  { %3745 = vpow2.f32 %v1499_v40  ;;  %v1440_v14 = vmax.f32 %v1407_v20, %v1424_v22  ;;  %v1439_v16 = vmax.f32 %v1366_v21, %v1423_v47  ;;  %v1472_v33 = vmax.f32 %v1451_v52, %v4787_v27 }
 0x63a   :  { %3747 = vpow2.f32 %v1501_v43 }
 0x63b   :  { %3749 = vpow2.f32 %v1503_v8  ;;  %v4781_v12 = vadd.f32 %v1440_v14, %v4407_v37  ;;  %v1455_v4 = vadd.f32 %v1439_v16, %v4407_v37  ;;  %v4789_v50 = vpop.xlane.xlu0 %1470 }
 0x63c   :  { %v1489_v58 = vsub.f32 %v4730_v45, %v4789_v50  ;;  %v1438_v45 = vmax.f32 %v4708_v31, %v1422_v34  ;;  %v1490_v51 = vsub.f32 %v4727_v10, %v4789_v50 }
 0x63d   :  { %v1478_v63 = vmax.f32 %v1455_v4, %v4781_v12 }
 0x63e   :  { %v4738_v13 = vpop.eup %3743  ;;  %v1513_v37 = vmul.f32 1.442695, %v1489_v58  ;;  %v4807_v38 = vadd.f32 %v1438_v45, %v4314_v3  ;;  %v1515_v14 = vmul.f32 1.442695, %v1490_v51  ;;  %v3936_v58 = vld [vmem:[%s5614_s2 + $0x300] ss:$0 sm:$0xff] }
 0x63f   :  { %v4740_v49 = vpop.eup %3745  ;;  %1650 = vrot.lane.b32.xlu1 %v4738_v13, %s3939_s13  ;;  %3387 = vmatmul.msk.f32.vlgmr.msrb.gmra.mxu3 %vm62_vm3, %v4738_v13  ;;  %v1594_v50 = vsel %vm62_vm3, %v4738_v13, 0.0  ;;  %v4928_v45 = vld [vmem:[%s5614_s2 + $0x1e0] sm:$0xff] }
 0x640   :  { %v4746_v7 = vpop.eup %3747  ;;  %1964 = vrot.lane.b32.xlu2 %v4740_v49, %s3939_s13  ;;  %3403 = vmatmul.msk.f32.vlgmr.msra.gmra.mxu1 %vm62_vm3, %v4740_v49  ;;  %3751 = vpow2.f32 %v1513_v37  ;;  %v1475_v29 = vmax.f32 %v4810_v46, %v4807_v38  ;;  %v1908_v30 = vsel %vm62_vm3, %v4740_v49, 0.0 }
 0x641   :  { %1652 = vrot.lane.b32.xlu0 %v4746_v7, %s3939_s13  ;;  %v4754_v54 = vpop.eup %3749  ;;  %v1597_v2 = vsel %vm62_vm3, %v4746_v7, 0.0 }
 0x646   :  { %v4795_v32 = vpop.eup %3751 }
 0x647   :  { %3388 = vmatmul.msk.f32.gmra.mxu3 %vm62_vm3, %v4746_v7 }
 0x648   :  { %3404 = vmatmul.msk.f32.gmra.mxu1 %vm62_vm3, %v4754_v54 }
 0x669   :  { %1467 = vmax.xlane.f32.xlu2 %v1466_v9  ;;  %1464 = vmax.xlane.f32.xlu1 %v1463_v24 }
 0x66b   :  { %1479 = vmax.xlane.f32.xlu0 %v1478_v63 }
 0x671   :  { %1473 = vmax.xlane.f32.xlu1 %v1472_v33  ;;  %v4907_v33 = vld [vmem:[%s5614_s2 + $0x1f0] sm:$0xff] }
 0x672   :  { %2253 = vmatpush.msra.mxu0 %v4907_v33  ;;  %2503 = vmatpush.msrb.mxu1 %v4907_v33 }
 0x674   :  { %2254 = vmatpush.msra.mxu0 %v4928_v45  ;;  %2504 = vmatpush.msrb.mxu1 %v4928_v45 }
 0x67f   :  { %1658 = vrot.lane.b32.xlu0 %v4795_v32, %s3939_s13 }
 0x681   :  { %1966 = vrot.lane.b32.xlu2 %v4754_v54, %s3939_s13 }
 0x69a   :  { %v1965_v36 = vpop.permute.xlu2 %1964 }
 0x69b   :  { %3411 = vmatmul.msk.f32.vlgmr.msra.gmra.mxu2 %vm62_vm3, %v1965_v36  ;;  %v2069_v11 = vsel %vm62_vm3, %v1965_v36, 0.0 }
 0x6aa   :  { %1476 = vmax.xlane.f32.xlu2 %v1475_v29 }
 0x6b1   :  { %v1651_v55 = vpop.permute.xlu1 %1650 }
 0x6b2   :  { %3395 = vmatmul.msk.f32.vlgmr.msrb.gmra.mxu0 %vm62_vm3, %v1651_v55  ;;  %v1763_v28 = vsel %vm62_vm3, %v1651_v55, 0.0  ;;  %v4948_v55 = vld [vmem:[%s5614_s2 + $0x1c0] sm:$0xff] }
 0x6b3   :  { %1764 = vadd.xlane.f32.xlu0 %v1763_v28  ;;  %v1653_v35 = vpop.permute.xlu0 %1652  ;;  %v3943_v28 = vmov 0.0  }
 0x6b4   :  { %v1766_v31 = vsel %vm62_vm3, %v1653_v35, 0.0 }
 0x6ba   :  { %3396 = vmatmul.msk.f32.gmra.mxu0 %vm62_vm3, %v1653_v35  ;;  %v2171_v35 = vld [vmem:[%s5614_s2 + $0x1b0] sm:$0xff] }
 0x6bb   :  { %2070 = vadd.xlane.f32.xlu0 %v2069_v11  ;;  %2209 = vmatpush.msra.mxu3 %v2171_v35 }
 0x6c3   :  { %1767 = vadd.xlane.f32.xlu0 %v1766_v31 }
 0x6dc   :  { %v1468_v3 = vpop.xlane.xlu2 %1467  ;;  %v1465_v61 = vpop.xlane.xlu1 %1464 }
 0x6dd   :  { %v1487_v42 = vsub.f32 %v1447_v48, %v1468_v3  ;;  %v1485_v56 = vsub.f32 %v1445_v25, %v1465_v61  ;;  %v1486_v40 = vsub.f32 %v1446_v19, %v1465_v61  ;;  %v1488_v21 = vsub.f32 %v4775_v17, %v1468_v3 }
 0x6de   :  { %v1480_v43 = vpop.xlane.xlu0 %1479 }
 0x6df   :  { %v1509_v53 = vmul.f32 1.442695, %v1487_v42  ;;  %v1505_v8 = vmul.f32 1.442695, %v1485_v56  ;;  %v1495_v26 = vsub.f32 %v1455_v4, %v1480_v43  ;;  %v1507_v5 = vmul.f32 1.442695, %v1486_v40 }
 0x6e0   :  { %v1511_v47 = vmul.f32 1.442695, %v1488_v21  ;;  %v1496_v4 = vsub.f32 %v4781_v12, %v1480_v43  ;;  %v1911_v12 = vsel %vm62_vm3, %v4754_v54, 0.0  ;;  %v2170_v42 = vld [vmem:[%s5614_s2 + $0x1a0] sm:$0xff]  ;;  %v2169_v56 = vld [vmem:[%s5614_s2 + $0x190] sm:$0xff] }
 0x6e1   :  { %3753 = vpow2.f32 %v1509_v53  ;;  %v1525_v20 = vmul.f32 1.442695, %v1495_v26  ;;  %2210 = vmatpush.msra.mxu3 %v2170_v42  ;;  %v2168_v40 = vld [vmem:[%s5614_s2 + $0x180] sm:$0xff] }
 0x6e2   :  { %3755 = vpow2.f32 %v1505_v8  ;;  %v1527_v63 = vmul.f32 1.442695, %v1496_v4 }
 0x6e3   :  { %3757 = vpow2.f32 %v1507_v5  ;;  %2211 = vmatpush.msra.mxu3 %v2169_v56 }
 0x6e4   :  { %v1967_v23 = vpop.permute.xlu2 %1966  ;;  %v1474_v0 = vpop.xlane.xlu1 %1473  ;;  %3759 = vpow2.f32 %v1525_v20 }
 0x6e5   :  { %v1491_v39 = vsub.f32 %v1451_v52, %v1474_v0  ;;  %3412 = vmatmul.msk.f32.gmra.mxu2 %vm62_vm3, %v1967_v23  ;;  %v1492_v10 = vsub.f32 %v4787_v27, %v1474_v0  ;;  %v2072_v27 = vsel %vm62_vm3, %v1967_v23, 0.0  ;;  %2212 = vmatpush.msra.mxu3 %v2168_v40 }
 0x6e7   :  { %v4821_v1 = vpop.eup %3753  ;;  %v1517_v22 = vmul.f32 1.442695, %v1491_v39  ;;  %v1519_v16 = vmul.f32 1.442695, %v1492_v10 }
 0x6e8   :  { %1656 = vrot.lane.b32.xlu2 %v4821_v1, %s3939_s13  ;;  %v4825_v41 = vpop.eup %3755 }
 0x6e9   :  { %3761 = vpow2.f32 %v1517_v22  ;;  %v4827_v59 = vpop.eup %3757  ;;  %3389 = vmatmul.msk.f32.gmra.mxu3 %vm62_vm3, %v4825_v41  ;;  %1654 = vrot.lane.b32.xlu1 %v4825_v41, %s3939_s13  ;;  %v1600_v34 = vsel %vm62_vm3, %v4825_v41, 0.0  ;;  %v1570_v22 = vpop.f32.mrf.mxu3 }
 0x6ea   :  { %v4833_v44 = vpop.eup %3759  ;;  %3405 = vmatmul.msk.f32.gmra.mxu1 %vm62_vm3, %v4827_v59  ;;  %3763 = vpow2.f32 %v1511_v47 }
 0x6eb   :  { %5626 = vst [vmem:[#allocation2_spill] sm:$0xff] %v4833_v44  ;;  %1664 = vrot.lane.b32.xlu0 %v4833_v44, %s3939_s13  ;;  %3765 = vpow2.f32 %v1515_v14  ;;  %v1884_v14 = vpop.f32.mrf.mxu1 }
 0x6ec   :  { %3767 = vpow2.f32 %v1519_v16 }
 0x6ef   :  { %v4841_v18 = vpop.eup %3761 }
 0x6f0   :  { %v4843_v15 = vpop.eup %3763 }
 0x6f1   :  { %3390 = vmatmul.msk.f32.gmra.mxu3 %vm62_vm3, %v4821_v1  ;;  %1660 = vrot.lane.b32.xlu1 %v4841_v18, %s3939_s13  ;;  %v4854_v17 = vpop.eup %3765  ;;  %v4911_v13 = vpop.permute.xlu0 %1658  ;;  %v1917_v41 = vsel %vm62_vm3, %v4843_v15, 0.0 }
 0x6f2   :  { %3406 = vmatmul.msk.f32.gmra.mxu1 %vm62_vm3, %v4843_v15  ;;  %v4860_v19 = vpop.eup %3767 }
 0x6f3   :  { %1970 = vrot.lane.b32.xlu0 %v4843_v15, %s3939_s13 }
 0x6f9   :  { %3391 = vmatmul.msk.f32.gmra.mxu3 %vm62_vm3, %v4795_v32 }
 0x6fa   :  { %3407 = vmatmul.msk.f32.gmra.mxu1 %vm62_vm3, %v4854_v17 }
 0x701   :  { %3392 = vmatmul.msk.f32.gmra.mxu3 %vm62_vm3, %v4841_v18 }
 0x702   :  { %3408 = vmatmul.msk.f32.gmra.mxu1 %vm62_vm3, %v4860_v19 }
 0x71b   :  { %1909 = vadd.xlane.f32.xlu1 %v1908_v30 }
 0x71d   :  { %v1477_v48 = vpop.xlane.xlu2 %1476 }
 0x71e   :  { %v1493_v25 = vsub.f32 %v4810_v46, %v1477_v48  ;;  %v1494_v6 = vsub.f32 %v4807_v38, %v1477_v48  ;;  %v4939_v46 = vld [vmem:[%s5614_s2 + $0x1d0] sm:$0xff] }
 0x71f   :  { %2255 = vmatpush.msra.mxu0 %v4939_v46  ;;  %2505 = vmatpush.msrb.mxu1 %v4939_v46 }
 0x720   :  { %v1521_v9 = vmul.f32 1.442695, %v1493_v25  ;;  %v1523_v24 = vmul.f32 1.442695, %v1494_v6  ;;  %v2037_v25 = vpop.f32.mrf.mxu2 }
 0x721   :  { %2506 = vmatpush.msrb.mxu1 %v4948_v55  ;;  %2256 = vmatpush.msra.mxu0 %v4948_v55 }
 0x722   :  { %3769 = vpow2.f32 %v1521_v9 }
 0x723   :  { %3771 = vpow2.f32 %v1523_v24  ;;  %1598 = vadd.xlane.f32.xlu1 %v1597_v2 }
 0x724   :  { %3773 = vpow2.f32 %v1527_v63 }
 0x726   :  { %v1765_v37 = vpop.xlane.xlu0 %1764 }
 0x727   :  { %v1787_v8 = vmax.f32 %v1765_v37, 1e-30 }
 0x728   :  { %v4873_v62 = vpop.eup %3769 }
 0x729   :  { %v4875_v49 = vpop.eup %3771  ;;  %1662 = vrot.lane.b32.xlu2 %v4873_v62, %s3939_s13  ;;  %3393 = vmatmul.msk.f32.gmra.mxu3 %vm62_vm3, %v4873_v62  ;;  %3775 = vrcp.f32 %v1787_v8 }
 0x72a   :  { %3409 = vmatmul.msk.f32.gmra.mxu1 %vm62_vm3, %v4875_v49  ;;  %v4885_v7 = vpop.eup %3773 }
 0x72b   :  { %1912 = vadd.xlane.f32.xlu1 %v1911_v12 }
 0x72e   :  { %v2071_v57 = vpop.xlane.xlu0 %2070 }
 0x72f   :  { %v2093_v5 = vmax.f32 %v2071_v57, 1e-30  ;;  %v1731_v51 = vpop.f32.mrf.mxu0  ;;  %v3776_v16 = vpop.eup %3775 }
 0x730   :  { %v1803_v9 = vmul.f32 %v3776_v16, %v1731_v51 }
 0x731   :  { %3394 = vmatmul.msk.f32.gmra.mxu3 %vm62_vm3, %v4833_v44 }
 0x732   :  { %3410 = vmatmul.msk.f32.gmra.mxu1 %vm62_vm3, %v4885_v7 }
 0x733   :  { %2073 = vadd.xlane.f32.xlu1 %v2072_v27  ;;  %v1573_v27 = vpop.f32.mrf.mxu3 }
 0x736   :  { %v1768_v60 = vpop.xlane.xlu0 %1767 }
 0x737   :  { %v1788_v0 = vmax.f32 %v1768_v60, 1e-30  ;;  %v1887_v60 = vpop.f32.mrf.mxu1 }
 0x742   :  { %v4900_v52 = vpop.permute.xlu2 %1656 }
 0x74c   :  { %1968 = vrot.lane.b32.xlu1 %v4827_v59, %s3939_s13 }
 0x752   :  { %1595 = vadd.xlane.f32.xlu2 %v1594_v50 }
 0x75b   :  { %v4896_v54 = vpop.permute.xlu1 %1654 }
 0x75c   :  { %3397 = vmatmul.msk.f32.gmra.mxu0 %vm62_vm3, %v4896_v54 }
 0x75d   :  { %v4943_v29 = vpop.permute.xlu0 %1664 }
 0x75e   :  { %5628 = vst [vmem:[#allocation4_spill] sm:$0xff] %v4943_v29 }
 0x763   :  { %v4919_v36 = vpop.permute.xlu1 %1660 }
 0x764   :  { %3398 = vmatmul.msk.f32.gmra.mxu0 %vm62_vm3, %v4900_v52 }
 0x765   :  { %v4968_v39 = vpop.permute.xlu0 %1970 }
 0x76a   :  { %2134 = vrot.lane.b32.xlu2 %v3936_v58, %s3940_s28  ;;  %v1734_v58 = vpop.f32.mrf.mxu0 }
 0x76c   :  { %3399 = vmatmul.msk.f32.gmra.mxu0 %vm62_vm3, %v4911_v13  ;;  %v5001_v16 = vpop.f32.mrf.mxu3 }
 0x774   :  { %3400 = vmatmul.msk.f32.gmra.mxu0 %vm62_vm3, %v4919_v36 }
 0x776   :  { %1601 = vadd.xlane.f32.xlu1 %v1600_v34 }
 0x783   :  { %v4932_v38 = vpop.permute.xlu2 %1662 }
 0x784   :  { %5627 = vst [vmem:[#allocation3_spill] sm:$0xff] %v4932_v38  ;;  %3401 = vmatmul.msk.f32.gmra.mxu0 %vm62_vm3, %v4932_v38 }
 0x78c   :  { %3402 = vmatmul.msk.f32.gmra.mxu0 %vm62_vm3, %v4943_v29 }
 0x78e   :  { %v1910_v11 = vpop.xlane.xlu1 %1909 }
 0x78f   :  { %v1932_v26 = vmax.f32 %v1910_v11, 1e-30 }
 0x791   :  { %3777 = vrcp.f32 %v1932_v26 }
 0x794   :  { %2257 = vmatmul.f32.vlgmr.msra.gmra.mxu0 %v3943_v28 }
 0x796   :  { %v1599_v31 = vpop.xlane.xlu1 %1598 }
 0x797   :  { %v1619_v21 = vmax.f32 %v1599_v31, 1e-30  ;;  %v3778_v30 = vpop.eup %3777  ;;  %v2040_v31 = vpop.f32.mrf.mxu2 }
 0x798   :  { %v1948_v63 = vmul.f32 %v3778_v30, %v1884_v14  ;;  %v5003_v30 = vpop.f32.mrf.mxu3 }
 0x79c   :  { %2260 = vmatmul.f32.gmra.mxu0 %v3943_v28 }
 0x79e   :  { %v1913_v3 = vpop.xlane.xlu1 %1912 }
 0x79f   :  { %v1933_v47 = vmax.f32 %v1913_v3, 1e-30 }
 0x7a6   :  { %v2074_v61 = vpop.xlane.xlu1 %2073 }
 0x7a7   :  { %v2094_v10 = vmax.f32 %v2074_v61, 1e-30 }
 0x7be   :  { %v1969_v43 = vpop.permute.xlu1 %1968 }
 0x7bf   :  { %3413 = vmatmul.msk.f32.gmra.mxu2 %vm62_vm3, %v1969_v43  ;;  %v2075_v53 = vsel %vm62_vm3, %v1969_v43, 0.0 }
 0x7c0   :  { %2076 = vadd.xlane.f32.xlu1 %v2075_v53 }
 0x7c5   :  { %v1596_v20 = vpop.xlane.xlu2 %1595 }
 0x7c6   :  { %v1618_v23 = vmax.f32 %v1596_v20, 1e-30 }
 0x7c7   :  { %3414 = vmatmul.msk.f32.gmra.mxu2 %vm62_vm3, %v4968_v39 }
 0x7c8   :  { %3779 = vrcp.f32 %v1618_v23  ;;  %1918 = vadd.xlane.f32.xlu1 %v1917_v41 }
 0x7c9   :  { %3781 = vrcp.f32 %v2093_v5 }
 0x7ca   :  { %3783 = vrcp.f32 %v1619_v21 }
 0x7cb   :  { %3785 = vrcp.f32 %v1788_v0 }
 0x7cc   :  { %3787 = vrcp.f32 %v1933_v47  ;;  %v4995_v47 = vld [vmem:[%s5614_s2 + $0x302] ss:$0 sm:$0xff] }
 0x7cd   :  { %3789 = vrcp.f32 %v2094_v10  ;;  %v4974_v56 = vpop.permute.xlu2 %2134 }
 0x7ce   :  { %v3780_v48 = vpop.eup %3779 }
 0x7cf   :  { %v3782_v6 = vpop.eup %3781  ;;  %v1634_v24 = vmul.f32 %v3780_v48, %v1570_v22  ;;  %v5005_v48 = vpop.f32.mrf.mxu3 }
 0x7d0   :  { %v3784_v4 = vpop.eup %3783  ;;  %v2109_v50 = vmul.f32 %v3782_v6, %v2037_v25 }
 0x7d1   :  { %v3786_v2 = vpop.eup %3785  ;;  %v1811_v15 = vadd.f32 %v1803_v9, %v1634_v24  ;;  %v1635_v37 = vmul.f32 %v3784_v4, %v1573_v27  ;;  %v5016_v24 = vld [vmem:[%s5614_s2 + $0x301] ss:$0 sm:$0xff] }
 0x7d2   :  { %v3788_v12 = vpop.eup %3787  ;;  %v1804_v28 = vmul.f32 %v3786_v2, %v1734_v58 }
 0x7d3   :  { %v1956_v34 = vadd.f32 %v1948_v63, %v1811_v15  ;;  %v3790_v57 = vpop.eup %3789  ;;  %v1949_v35 = vmul.f32 %v3788_v12, %v1887_v60 }
 0x7d4   :  { %v1812_v3 = vadd.f32 %v1804_v28, %v1635_v37  ;;  %v2110_v61 = vmul.f32 %v3790_v57, %v2040_v31 }
 0x7d5   :  { %v2117_v11 = vadd.f32 %v2109_v50, %v1956_v34 }
 0x7d6   :  { %v1957_v40 = vadd.f32 %v1949_v35, %v1812_v3 }
 0x7d7   :  { %v2125_v42 = vmul.f32 0.25, %v2117_v11  ;;  %v5007_v25 = vpop.f32.mrf.mxu3 }
 0x7d8   :  { %v2118_v8 = vadd.f32 %v2110_v61, %v1957_v40 }
 0x7d9   :  { %v2137_v43 = vadd.f32 %v4974_v56, %v2125_v42  ;;  %v4977_v53 = vpop.f32.mrf.mxu0 }
 0x7da   :  { %v2126_v26 = vmul.f32 0.25, %v2118_v8 }
 0x7db   :  { %3420 = vmatmul.msk.f32.vlgmr.msra.gmra.mxu3 %vm1094_vm4, %v2137_v43 }
 0x7dc   :  { %v2138_v5 = vadd.f32 %v4974_v56, %v2126_v26 }
 0x7df   :  { %v5009_v6 = vpop.f32.mrf.mxu3 }
 0x7e0   :  { %5631 = vst [vmem:[#allocation7_spill] sm:$0xff] %v5009_v6 }
 0x7e1   :  { %v4982_v20 = vpop.f32.mrf.mxu0 }
 0x7e3   :  { %3421 = vmatmul.msk.f32.gmra.mxu3 %vm1094_vm4, %v2138_v5 }
 0x7e7   :  { %v5011_v9 = vpop.f32.mrf.mxu3 }
 0x7e8   :  { %5632 = vst [vmem:[#allocation8_spill] sm:$0xff] %v5011_v9 }
 0x7e9   :  { %v4984_v21 = vpop.f32.mrf.mxu0 }
 0x7f1   :  { %v4986_v23 = vpop.f32.mrf.mxu0 }
 0x801   :  { %v4988_v0 = vpop.f32.mrf.mxu0 }
 0x802   :  { %5629 = vst [vmem:[#allocation5_spill] sm:$0xff] %v4988_v0 }
 0x809   :  { %v4990_v22 = vpop.f32.mrf.mxu0 }
 0x80a   :  { %5630 = vst [vmem:[#allocation6_spill] sm:$0xff] %v4990_v22 }
 0x811   :  { %v2258_v41 = vpop.f32.mrf.mxu0 }
 0x812   :  { %v2259_v51 = vadd.f32 %v2258_v41, %v4995_v47 }
 0x814   :  { %2306 = vrot.lane.b32.xlu2 %v2259_v51, %s3939_s13 }
 0x819   :  { %v2261_v14 = vpop.f32.mrf.mxu0 }
 0x81a   :  { %v2262_v10 = vadd.f32 %v2261_v14, %v4995_v47 }
 0x81c   :  { %2308 = vrot.lane.b32.xlu2 %v2262_v10, %s3939_s13 }
 0x85e   :  { %v2214_v4 = vpop.f32.mrf.mxu3 }
 0x85f   :  { %v2215_v2 = vadd.f32 %v2214_v4, %v5016_v24 }
 0x861   :  { %v2264_v63 = vadd.f32 %v2259_v51, %v2215_v2 }
 0x863   :  { %v3428_v15 = vmul.f32 -1.442695, %v2264_v63 }
 0x865   :  { %3791 = vpow2.f32 %v3428_v15 }
 0x866   :  { %v2217_v12 = vpop.f32.mrf.mxu3 }
 0x867   :  { %v2218_v27 = vadd.f32 %v2217_v12, %v5016_v24 }
 0x869   :  { %v2265_v50 = vadd.f32 %v2262_v10, %v2218_v27 }
 0x86b   :  { %v3792_v58 = vpop.eup %3791  ;;  %v3429_v37 = vmul.f32 -1.442695, %v2265_v50 }
 0x86c   :  { %v2272_v34 = vadd.f32 1.0, %v3792_v58 }
 0x86d   :  { %3793 = vpow2.f32 %v3429_v37 }
 0x86e   :  { %3795 = vrcp.f32 %v2272_v34  ;;  %v2285_v31 = vand.u32 2147483648, %v2272_v34  ;;  %v2283_v61 = vand.u32 2147483647, %v2272_v34  ;;  %v2307_v42 = vpop.permute.xlu2 %2306  ;;  %vm2279_vm6 = vweird.f32 %v2272_v34 }
 0x870   :  { %v2286_v8 = vor.u32 1.1754944e-38, %v2285_v31  ;;  %vm2284_vm8 = vcmp.eq.f32.partialorder %v2283_v61, 8.507059e+37  ;;  %v1772_v61 = vsel %vm62_vm3, %v4900_v52, 0.0 }
 0x873   :  { %v3794_v57 = vpop.eup %3793 }
 0x874   :  { %v3796_v60 = vpop.eup %3795  ;;  %v2273_v28 = vadd.f32 1.0, %v3794_v57  ;;  %v1914_v57 = vsel %vm62_vm3, %v4827_v59, 0.0  ;;  %v1769_v59 = vsel %vm62_vm3, %v4896_v54, 0.0 }
 0x875   :  { %v2275_v35 = vmul.f32 %v3796_v60, %v2272_v34  ;;  %vm2280_vm5 = vweird.f32 %v3796_v60 }
 0x876   :  { %3797 = vrcp.f32 %v2273_v28  ;;  %vm2281_vm7 = vmor %vm2279_vm6, %vm2280_vm5  ;;  %v2300_v10 = vand.u32 2147483648, %v2273_v28  ;;  %v2298_v63 = vand.u32 2147483647, %v2273_v28  ;;  %vm2294_vm10 = vweird.f32 %v2273_v28  ;;  %v2309_v50 = vpop.permute.xlu2 %2308 }
 0x877   :  { %v2276_v11 = vsub.f32 1.0, %v2275_v35 }
 0x878   :  { %v2301_v12 = vor.u32 1.1754944e-38, %v2300_v10  ;;  %vm2299_vm12 = vcmp.eq.f32.partialorder %v2298_v63, 8.507059e+37 }
 0x879   :  { %v2277_v3 = vmul.f32 %v3796_v60, %v2276_v11 }
 0x87b   :  { %v2278_v40 = vadd.f32 %v3796_v60, %v2277_v3 }
 0x87c   :  { %v3798_v43 = vpop.eup %3797 }
 0x87d   :  { %v2282_v26 = vsel %vm2281_vm7, %v3796_v60, %v2278_v40  ;;  %v2290_v5 = vmul.f32 %v3798_v43, %v2273_v28  ;;  %vm2295_vm9 = vweird.f32 %v3798_v43 }
 0x87e   :  { %v2287_v41 = vsel %vm2284_vm8, %v2286_v8, %v2282_v26  ;;  %vm2296_vm11 = vmor %vm2294_vm10, %vm2295_vm9 }
 0x87f   :  { %v2312_v51 = vmul.f32 %v2307_v42, %v2287_v41  ;;  %v2291_v14 = vsub.f32 1.0, %v2290_v5  ;;  %v2078_v42 = vsel %vm62_vm3, %v4968_v39, 0.0  ;;  %v2326_v54 = vsub.f32 1.0, %v2287_v41  ;;  %v1602_v39 = vpop.xlane.xlu1 %1601 }
 0x880   :  { %v2338_v52 = vmul.f32 0.0, %v2287_v41  ;;  %v1620_v10 = vmax.f32 %v1602_v39, 1e-30  ;;  %v5049_v41 = vld [vmem:[%s5614_s2 + $0x270] sm:$0xff] }
 0x881   :  { %2316 = vrot.lane.b32.xlu0 %v2312_v51, %s3939_s13  ;;  %v2292_v4 = vmul.f32 %v3798_v43, %v2291_v14  ;;  %2371 = vmatpush.msrb.mxu0 %v5049_v41 }
 0x882   :  { %2616 = vmatpush.msrb.mxu2 %v5049_v41 }
 0x883   :  { %v2293_v15 = vadd.f32 %v3798_v43, %v2292_v4 }
 0x885   :  { %v2297_v58 = vsel %vm2296_vm11, %v3798_v43, %v2293_v15 }
 0x886   :  { %v2302_v37 = vsel %vm2299_vm12, %v2301_v12, %v2297_v58 }
 0x887   :  { %v2313_v34 = vmul.f32 %v2309_v50, %v2302_v37  ;;  %v2327_v40 = vsub.f32 1.0, %v2302_v37  ;;  %v2339_v8 = vmul.f32 0.0, %v2302_v37  ;;  %v2077_v4 = vpop.xlane.xlu1 %2076  ;;  %v5054_v37 = vld [vmem:[%s5614_s2 + $0x260] sm:$0xff] }
 0x888   :  { %v2095_v50 = vmax.f32 %v2077_v4, 1e-30  ;;  %2372 = vmatpush.msrb.mxu0 %v5054_v37  ;;  %2617 = vmatpush.msrb.mxu2 %v5054_v37 }
 0x889   :  { %2318 = vrot.lane.b32.xlu2 %v2313_v34, %s3939_s13 }
 0x8b2   :  { %1915 = vadd.xlane.f32.xlu2 %v1914_v57 }
 0x8e3   :  { %v2319_v60 = vpop.permute.xlu2 %2318 }
 0x8e4   :  { %v2323_v35 = vadd.f32 %v2319_v60, %v2218_v27  ;;  %v1603_v27 = vsel %vm62_vm3, %v4821_v1, 0.0  ;;  %v5061_v60 = vld [vmem:[%s5614_s2 + $0x250] sm:$0xff] }
 0x8e5   :  { %2373 = vmatpush.msrb.mxu0 %v5061_v60  ;;  %2618 = vmatpush.msrb.mxu2 %v5061_v60 }
 0x8e6   :  { %3799 = vtanh.f32 %v2323_v35 }
 0x8ec   :  { %v3800_v11 = vpop.eup %3799 }
 0x8ed   :  { %2332 = vrot.lane.b32.xlu2 %v3800_v11, %s3940_s28  ;;  %v1919_v11 = vpop.xlane.xlu1 %1918 }
 0x8f3   :  { %v2317_v28 = vpop.permute.xlu0 %2316 }
 0x8f4   :  { %v2322_v31 = vadd.f32 %v2317_v28, %v2215_v2 }
 0x8f6   :  { %3801 = vtanh.f32 %v2322_v31 }
 0x8f7   :  { %3803 = vrcp.f32 %v1620_v10  ;;  %v5091_v10 = vld [vmem:[%s5614_s2 + $0x210] sm:$0xff] }
 0x8fc   :  { %v3802_v3 = vpop.eup %3801 }
 0x8fd   :  { %2330 = vrot.lane.b32.xlu0 %v3802_v3, %s3940_s28  ;;  %v3804_v57 = vpop.eup %3803 }
 0x916   :  { %1773 = vadd.xlane.f32.xlu2 %v1772_v61  ;;  %v1636_v61 = vmul.f32 %v3804_v57, %v5001_v16  ;;  %v5077_v16 = vld [vmem:[%s5614_s2 + $0x230] sm:$0xff]  ;;  %v5103_v57 = vld [vmem:[%s5614_s2 + $0x200] sm:$0xff] }
 0x925   :  { %v1916_v2 = vpop.xlane.xlu2 %1915 }
 0x926   :  { %v1934_v63 = vmax.f32 %v1916_v2, 1e-30  ;;  %v2043_v2 = vpop.f32.mrf.mxu2 }
 0x927   :  { %1770 = vadd.xlane.f32.xlu0 %v1769_v59 }
 0x928   :  { %3805 = vrcp.f32 %v1934_v63 }
 0x92e   :  { %v3806_v35 = vpop.eup %3805 }
 0x92f   :  { %1604 = vadd.xlane.f32.xlu0 %v1603_v27  ;;  %v1890_v27 = vpop.f32.mrf.mxu1 }
 0x937   :  { %2079 = vadd.xlane.f32.xlu0 %v2078_v42  ;;  %v1935_v42 = vmax.f32 %v1919_v11, 1e-30  ;;  %v1893_v11 = vpop.f32.mrf.mxu1 }
 0x947   :  { %v2333_v43 = vpop.permute.xlu2 %2332 }
 0x948   :  { %v2337_v26 = vmul.f32 %v2333_v43, %v2327_v40  ;;  %v1950_v40 = vmul.f32 %v3806_v35, %v1890_v27 }
 0x94a   :  { %v5034_v5 = vadd.f32 %v2339_v8, %v2337_v26  ;;  %v5072_v8 = vld [vmem:[%s5614_s2 + $0x240] sm:$0xff] }
 0x94b   :  { %2374 = vmatpush.msrb.mxu0 %v5072_v8  ;;  %2619 = vmatpush.msrb.mxu2 %v5072_v8 }
 0x94c   :  { %2346 = vrot.lane.b32.xlu1 %v5034_v5, %s3940_s28 }
 0x94d   :  { %2375 = vmatpush.msrb.mxu0 %v5077_v16  ;;  %2620 = vmatpush.msrb.mxu2 %v5077_v16 }
 0x954   :  { %1974 = vrot.lane.b32.xlu1 %v4860_v19, %s3939_s13 }
 0x96f   :  { %v2331_v1 = vpop.permute.xlu0 %2330 }
 0x970   :  { %v2336_v51 = vmul.f32 %v2331_v1, %v2326_v54  ;;  %v5084_v1 = vld [vmem:[%s5614_s2 + $0x220] sm:$0xff] }
 0x971   :  { %2376 = vmatpush.msrb.mxu0 %v5084_v1  ;;  %2621 = vmatpush.msrb.mxu2 %v5084_v1 }
 0x972   :  { %v5040_v14 = vadd.f32 %v2338_v52, %v2336_v51 }
 0x973   :  { %2377 = vmatpush.msrb.mxu0 %v5091_v10  ;;  %2622 = vmatpush.msrb.mxu2 %v5091_v10 }
 0x974   :  { %2344 = vrot.lane.b32.xlu2 %v5040_v14, %s3940_s28 }
 0x975   :  { %2378 = vmatpush.msrb.mxu0 %v5103_v57  ;;  %2623 = vmatpush.msrb.mxu2 %v5103_v57 }
 0x977   :  { %2861 = vmatpush.msra.mxu2 %v5049_v41 }
 0x979   :  { %2862 = vmatpush.msra.mxu2 %v5054_v37 }
 0x97b   :  { %2863 = vmatpush.msra.mxu2 %v5061_v60 }
 0x97c   :  { %1972 = vrot.lane.b32.xlu2 %v4854_v17, %s3939_s13 }
 0x97d   :  { %2864 = vmatpush.msra.mxu2 %v5072_v8 }
 0x97f   :  { %2865 = vmatpush.msra.mxu2 %v5077_v16 }
 0x981   :  { %2866 = vmatpush.msra.mxu2 %v5084_v1 }
 0x983   :  { %2867 = vmatpush.msra.mxu2 %v5091_v10 }
 0x985   :  { %2868 = vmatpush.msra.mxu2 %v5103_v57 }
 0x989   :  { %v1774_v58 = vpop.xlane.xlu2 %1773 }
 0x98a   :  { %v1790_v34 = vmax.f32 %v1774_v58, 1e-30 }
 0x99a   :  { %v1771_v15 = vpop.xlane.xlu0 %1770 }
 0x99b   :  { %v1789_v12 = vmax.f32 %v1771_v15, 1e-30 }
 0x99d   :  { %3807 = vrcp.f32 %v1789_v12 }
 0x99e   :  { %3809 = vrcp.f32 %v2095_v50 }
 0x99f   :  { %3811 = vrcp.f32 %v1790_v34 }
 0x9a2   :  { %v1605_v28 = vpop.xlane.xlu0 %1604 }
 0x9a3   :  { %v3808_v31 = vpop.eup %3807  ;;  %v1621_v3 = vmax.f32 %v1605_v28, 1e-30 }
 0x9a4   :  { %v1805_v59 = vmul.f32 %v3808_v31, %v4977_v53  ;;  %v3810_v53 = vpop.eup %3809  ;;  %v5122_v31 = vld [vmem:[%s5614_s2 + $0x258] sm:$0xff] }
 0x9a5   :  { %3813 = vrcp.f32 %v1621_v3  ;;  %v2111_v26 = vmul.f32 %v3810_v53, %v2043_v2  ;;  %v3812_v52 = vpop.eup %3811  ;;  %v5137_v2 = vld [vmem:[%s5614_s2 + $0x248] sm:$0xff] }
 0x9a6   :  { %v1813_v43 = vadd.f32 %v1805_v59, %v1636_v61  ;;  %3815 = vrcp.f32 %v1935_v42  ;;  %v1806_v50 = vmul.f32 %v3812_v52, %v4982_v20  ;;  %v5115_v20 = vld [vmem:[%s5614_s2 + $0x268] sm:$0xff]  ;;  %v2046_v61 = vpop.f32.mrf.mxu2 }
 0x9a7   :  { %v5149_v53 = vld [vmem:[%s5614_s2 + $0x228] sm:$0xff] }
 0x9a8   :  { %v1958_v54 = vadd.f32 %v1950_v40, %v1813_v43  ;;  %v5143_v43 = vld [vmem:[%s5614_s2 + $0x238] sm:$0xff]  ;;  %v5172_v52 = vld [vmem:[%s5614_s2 + $0x208] sm:$0xff] }
 0x9aa   :  { %v2080_v51 = vpop.xlane.xlu0 %2079  ;;  %v2119_v39 = vadd.f32 %v2111_v26, %v1958_v54  ;;  %v5159_v54 = vld [vmem:[%s5614_s2 + $0x218] sm:$0xff] }
 0x9ab   :  { %v3814_v4 = vpop.eup %3813  ;;  %v2096_v63 = vmax.f32 %v2080_v51, 1e-30 }
 0x9ac   :  { %v1637_v15 = vmul.f32 %v3814_v4, %v5003_v30  ;;  %v2127_v12 = vmul.f32 0.25, %v2119_v39  ;;  %v3816_v34 = vpop.eup %3815  ;;  %v5110_v30 = vld [vmem:[%s5614_s2 + $0x278] sm:$0xff] }
 0x9ad   :  { %3817 = vrcp.f32 %v2096_v63  ;;  %2394 = vmatpush.msra.mxu0 %v5110_v30  ;;  %3470 = vmatpush.msra.mxu1 %v5110_v30  ;;  %v1951_v28 = vmul.f32 %v3816_v34, %v1893_v11 }
 0x9ae   :  { %v2139_v58 = vadd.f32 %v4974_v56, %v2127_v12  ;;  %v1814_v35 = vadd.f32 %v1806_v50, %v1637_v15  ;;  %2884 = vmatpush.msrb.mxu3 %v5110_v30  ;;  %v5214_v50 = vpop.f32.mrf.mxu1 }
 0x9af   :  { %2395 = vmatpush.msra.mxu0 %v5115_v20  ;;  %3471 = vmatpush.msra.mxu1 %v5115_v20 }
 0x9b0   :  { %3422 = vmatmul.msk.f32.gmra.mxu3 %vm1094_vm4, %v2139_v58  ;;  %v1959_v27 = vadd.f32 %v1951_v28, %v1814_v35 }
 0x9b1   :  { %2885 = vmatpush.msrb.mxu3 %v5115_v20  ;;  %2396 = vmatpush.msra.mxu0 %v5122_v31 }
 0x9b2   :  { %3472 = vmatpush.msra.mxu1 %v5122_v31 }
 0x9b3   :  { %v3818_v3 = vpop.eup %3817  ;;  %2886 = vmatpush.msrb.mxu3 %v5122_v31  ;;  %2397 = vmatpush.msra.mxu0 %v5137_v2 }
 0x9b4   :  { %v2112_v59 = vmul.f32 %v3818_v3, %v2046_v61  ;;  %3473 = vmatpush.msra.mxu1 %v5137_v2  ;;  %v3419_v61 = vld [vmem:[%s5614_s2 + $0x303] ss:$8 sm:$0x3] }
 0x9b5   :  { %2887 = vmatpush.msrb.mxu3 %v5137_v2  ;;  %2398 = vmatpush.msra.mxu0 %v5143_v43 }
 0x9b6   :  { %v2120_v42 = vadd.f32 %v2112_v59, %v1959_v27  ;;  %3474 = vmatpush.msra.mxu1 %v5143_v43  ;;  %v5216_v58 = vpop.f32.mrf.mxu1  ;;  %v5231_v59 = vperm.slane %v3419_v61, 1 }
 0x9b7   :  { %2888 = vmatpush.msrb.mxu3 %v5143_v43  ;;  %2399 = vmatpush.msra.mxu0 %v5149_v53 }
 0x9b8   :  { %v2128_v40 = vmul.f32 0.25, %v2120_v42  ;;  %3475 = vmatpush.msra.mxu1 %v5149_v53  ;;  %5635 = vst [vmem:[#allocation11_spill] sm:$0xff] %v5231_v59 }
 0x9b9   :  { %2400 = vmatpush.msra.mxu0 %v5159_v54  ;;  %2889 = vmatpush.msrb.mxu3 %v5149_v53 }
 0x9ba   :  { %v2140_v26 = vadd.f32 %v4974_v56, %v2128_v40  ;;  %3476 = vmatpush.msra.mxu1 %v5159_v54 }
 0x9bb   :  { %2401 = vmatpush.msra.mxu0 %v5172_v52  ;;  %2890 = vmatpush.msrb.mxu3 %v5159_v54 }
 0x9bc   :  { %3423 = vmatmul.msk.f32.gmra.mxu3 %vm1094_vm4, %v2140_v26  ;;  %3477 = vmatpush.msra.mxu1 %v5172_v52 }
 0x9bd   :  { %2891 = vmatpush.msrb.mxu3 %v5172_v52 }
 0x9be   :  { %v2347_v4 = vpop.permute.xlu1 %2346  ;;  %v5218_v34 = vpop.f32.mrf.mxu1 }
 0x9bf   :  { %v2351_v15 = vsel %vm1094_vm4, %v2347_v4, 0.0  ;;  %5633 = vst [vmem:[#allocation9_spill] sm:$0xff] %v5218_v34 }
 0x9c6   :  { %v5202_v12 = vpop.permute.xlu1 %1974  ;;  %v5220_v35 = vpop.f32.mrf.mxu1 }
 0x9c7   :  { %5634 = vst [vmem:[#allocation10_spill] sm:$0xff] %v5220_v35 }
 0x9ce   :  { %v2345_v51 = vpop.permute.xlu2 %2344 }
 0x9cf   :  { %v2350_v39 = vsel %vm1094_vm4, %v2345_v51, 0.0  ;;  %3436 = vmatmul.msk.f32.vlgmr.msrb.gmra.mxu1 %vm1094_vm4, %v2345_v51  ;;  %v5242_v51 = vperm.slane %v3419_v61, 0 }
 0x9d0   :  { %3430 = vmatmul.msk.f32.vlgmr.msrb.gmra.mxu0 %vm62_vm3, %v2350_v39  ;;  %2748 = vmatpush.msrb.mxu1 %v4907_v33 }
 0x9d1   :  { %2639 = vmatpush.msrb.mxu0 %v5110_v30 }
 0x9d2   :  { %2749 = vmatpush.msrb.mxu1 %v4928_v45 }
 0x9d3   :  { %2640 = vmatpush.msrb.mxu0 %v5115_v20 }
 0x9d4   :  { %2750 = vmatpush.msrb.mxu1 %v4939_v46 }
 0x9d5   :  { %2641 = vmatpush.msrb.mxu0 %v5122_v31 }
 0x9d6   :  { %v5191_v63 = vpop.permute.xlu2 %1972  ;;  %2751 = vmatpush.msrb.mxu1 %v4948_v55 }
 0x9d7   :  { %3415 = vmatmul.msk.f32.gmra.mxu2 %vm62_vm3, %v5191_v63  ;;  %3437 = vmatmul.msk.f32.gmra.mxu1 %vm1094_vm4, %v2347_v4 }
 0x9d8   :  { %3431 = vmatmul.msk.f32.gmra.mxu0 %vm62_vm3, %v2351_v15 }
 0x9d9   :  { %2642 = vmatpush.msrb.mxu0 %v5137_v2 }
 0x9db   :  { %2643 = vmatpush.msrb.mxu0 %v5143_v43 }
 0x9dd   :  { %2644 = vmatpush.msrb.mxu0 %v5149_v53 }
 0x9df   :  { %3416 = vmatmul.msk.f32.gmra.mxu2 %vm62_vm3, %v5202_v12  ;;  %2645 = vmatpush.msrb.mxu0 %v5159_v54 }
 0x9e0   :  { %3432 = vmatmul.msk.f32.vlgmr.msra.gmra.mxu0 %vm62_vm3, %v2350_v39 }
 0x9e1   :  { %2646 = vmatpush.msrb.mxu0 %v5172_v52 }
 0x9e3   :  { %2993 = vmatpush.msra.mxu0 %v4907_v33 }
 0x9e5   :  { %2994 = vmatpush.msra.mxu0 %v4928_v45 }
 0x9e7   :  { %2995 = vmatpush.msra.mxu0 %v4939_v46 }
 0x9e8   :  { %3433 = vmatmul.msk.f32.gmra.mxu0 %vm62_vm3, %v2351_v15 }
 0x9e9   :  { %2996 = vmatpush.msra.mxu0 %v4948_v55 }
 0xa33   :  { %v2220_v26 = vpop.f32.mrf.mxu3 }
 0xa34   :  { %v5245_v39 = vadd.f32 %v2220_v26, %v5016_v24 }
 0xa4c   :  { %v2508_v11 = vpop.f32.mrf.mxu1 }
 0xa4d   :  { %v2509_v28 = vadd.f32 %v2508_v11, %v4995_v47  ;;  %v5223_v33 = vpop.f32.mrf.mxu0 }
 0xa4f   :  { %2556 = vrot.lane.b32.xlu0 %v2509_v28, %s3939_s13  ;;  %v2514_v15 = vadd.f32 %v2509_v28, %v5245_v39 }
 0xa54   :  { %v2511_v45 = vpop.f32.mrf.mxu1 }
 0xa55   :  { %v2512_v46 = vadd.f32 %v2511_v45, %v4995_v47  ;;  %v2383_v3 = vpop.f32.mrf.mxu0  ;;  %v1606_v47 = vsel %vm62_vm3, %v4795_v32, 0.0  ;;  %v2223_v45 = vpop.f32.mrf.mxu3 }
 0xa56   :  { %v5248_v4 = vadd.f32 %v2383_v3, %v5242_v51  ;;  %v5253_v35 = vadd.f32 %v2223_v45, %v5016_v24 }
 0xa57   :  { %2558 = vrot.lane.b32.xlu0 %v2512_v46, %s3939_s13 }
 0xa58   :  { %v2515_v32 = vadd.f32 %v2512_v46, %v5253_v35 }
 0xa5a   :  { %v3439_v61 = vmul.f32 -1.442695, %v2515_v32 }
 0xa5d   :  { %v2403_v55 = vpop.f32.mrf.mxu0 }
 0xa5e   :  { %v5236_v40 = vadd.f32 %v2403_v55, %v5231_v59  ;;  %v3438_v55 = vmul.f32 -1.442695, %v2514_v15 }
 0xa60   :  { %3819 = vpow2.f32 %v3438_v55 }
 0xa65   :  { %v2406_v27 = vpop.f32.mrf.mxu0 }
 0xa66   :  { %v2407_v42 = vadd.f32 %v2406_v27, %v5231_v59 }
 0xa68   :  { %2453 = vrot.lane.b32.xlu2 %v2407_v42, %s3939_s13  ;;  %v2410_v11 = vadd.f32 %v2407_v42, %v5248_v4 }
 0xa6a   :  { %v3435_v27 = vmul.f32 -1.442695, %v2410_v11 }
 0xa6c   :  { %3821 = vpow2.f32 %v3435_v27 }
 0xa6d   :  { %3823 = vpow2.f32 %v3439_v61 }
 0xa70   :  { %2451 = vrot.lane.b32.xlu2 %v5236_v40, %s3939_s13 }
 0xa81   :  { %1607 = vadd.xlane.f32.xlu0 %v1606_v47  ;;  %v3820_v47 = vpop.eup %3819 }
 0xa82   :  { %v3822_v26 = vpop.eup %3821  ;;  %v2522_v3 = vadd.f32 1.0, %v3820_v47 }
 0xa83   :  { %v2418_v22 = vadd.f32 1.0, %v3822_v26  ;;  %v3824_v28 = vpop.eup %3823 }
 0xa84   :  { %3825 = vrcp.f32 %v2522_v3  ;;  %v2523_v42 = vadd.f32 1.0, %v3824_v28  ;;  %v2535_v47 = vand.u32 2147483648, %v2522_v3  ;;  %vm2529_vm15 = vweird.f32 %v2522_v3 }
 0xa85   :  { %3827 = vrcp.f32 %v2418_v22  ;;  %v2533_v0 = vand.u32 2147483647, %v2522_v3  ;;  %v2445_v28 = vand.u32 2147483648, %v2418_v22  ;;  %vm2439_vm1 = vweird.f32 %v2418_v22 }
 0xa86   :  { %3829 = vrcp.f32 %v2523_v42  ;;  %v2443_v44 = vand.u32 2147483647, %v2418_v22  ;;  %v2536_v29 = vor.u32 1.1754944e-38, %v2535_v47  ;;  %vm2544_vm8 = vweird.f32 %v2523_v42 }
 0xa87   :  { %vm2534_vm5 = vcmp.eq.f32.partialorder %v2533_v0, 8.507059e+37  ;;  %v1920_v47 = vsel %vm62_vm3, %v4854_v17, 0.0  ;;  %v2084_v17 = vsel %vm62_vm3, %v5202_v12, 0.0 }
 0xa88   :  { %vm2444_vm6 = vcmp.eq.f32.partialorder %v2443_v44, 8.507059e+37 }
 0xa8a   :  { %v3826_v9 = vpop.eup %3825 }
 0xa8b   :  { %v3828_v15 = vpop.eup %3827  ;;  %v2525_v11 = vmul.f32 %v3826_v9, %v2522_v3  ;;  %vm2530_vm13 = vweird.f32 %v3826_v9 }
 0xa8c   :  { %v2435_v24 = vmul.f32 %v3828_v15, %v2418_v22  ;;  %v3830_v55 = vpop.eup %3829  ;;  %vm2440_vm14 = vweird.f32 %v3828_v15  ;;  %vm2531_vm0 = vmor %vm2529_vm15, %vm2530_vm13 }
 0xa8d   :  { %v2526_v45 = vsub.f32 1.0, %v2525_v11  ;;  %v2540_v27 = vmul.f32 %v3830_v55, %v2523_v42  ;;  %vm2441_vm2 = vmor %vm2439_vm1, %vm2440_vm14  ;;  %vm2545_vm7 = vweird.f32 %v3830_v55 }
 0xa8e   :  { %v2436_v34 = vsub.f32 1.0, %v2435_v24  ;;  %vm2546_vm9 = vmor %vm2544_vm8, %vm2545_vm7 }
 0xa8f   :  { %v2527_v46 = vmul.f32 %v3826_v9, %v2526_v45  ;;  %v2541_v61 = vsub.f32 1.0, %v2540_v27  ;;  %v2446_v45 = vor.u32 1.1754944e-38, %v2445_v28 }
 0xa90   :  { %v2437_v32 = vmul.f32 %v3828_v15, %v2436_v34 }
 0xa91   :  { %v2528_v6 = vadd.f32 %v3826_v9, %v2527_v46  ;;  %v2542_v11 = vmul.f32 %v3830_v55, %v2541_v61  ;;  %v5270_v61 = vadd.f32 %v5223_v33, %v5242_v51 }
 0xa92   :  { %v2438_v26 = vadd.f32 %v3828_v15, %v2437_v32 }
 0xa93   :  { %v2532_v38 = vsel %vm2531_vm0, %v3826_v9, %v2528_v6  ;;  %v2543_v59 = vadd.f32 %v3830_v55, %v2542_v11  ;;  %v2550_v6 = vand.u32 2147483648, %v2523_v42  ;;  %v2548_v9 = vand.u32 2147483647, %v2523_v42 }
 0xa94   :  { %v2442_v24 = vsel %vm2441_vm2, %v3828_v15, %v2438_v26  ;;  %v5256_v34 = vsel %vm2534_vm5, %v2536_v29, %v2532_v38  ;;  %v2409_v42 = vadd.f32 %v5236_v40, %v5270_v61  ;;  %v2081_v26 = vsel %vm62_vm3, %v5191_v63, 0.0 }
 0xa95   :  { %v5259_v32 = vsel %vm2444_vm6, %v2446_v45, %v2442_v24  ;;  %v2547_v38 = vsel %vm2546_vm9, %v3830_v55, %v2543_v59  ;;  %v2551_v29 = vor.u32 1.1754944e-38, %v2550_v6  ;;  %vm2549_vm10 = vcmp.eq.f32.partialorder %v2548_v9, 8.507059e+37 }
 0xa96   :  { %v3434_v59 = vmul.f32 -1.442695, %v2409_v42  ;;  %v1609_v55 = vsel %vm62_vm3, %v4841_v18, 0.0  ;;  %v1923_v11 = vsel %vm62_vm3, %v4860_v19, 0.0 }
 0xa97   :  { %v5264_v44 = vsel %vm2549_vm10, %v2551_v29, %v2547_v38 }
 0xa98   :  { %3831 = vpow2.f32 %v3434_v59 }
 0xa9e   :  { %v3832_v28 = vpop.eup %3831 }
 0xa9f   :  { %v2417_v33 = vadd.f32 1.0, %v3832_v28 }
 0xaa1   :  { %3833 = vrcp.f32 %v2417_v33  ;;  %v2430_v63 = vand.u32 2147483648, %v2417_v33  ;;  %vm2424_vm12 = vweird.f32 %v2417_v33 }
 0xaa7   :  { %v3834_v40 = vpop.eup %3833 }
 0xaa8   :  { %v2420_v24 = vmul.f32 %v3834_v40, %v2417_v33  ;;  %vm2425_vm11 = vweird.f32 %v3834_v40 }
 0xaa9   :  { %vm2426_vm13 = vmor %vm2424_vm12, %vm2425_vm11 }
 0xaaa   :  { %v2421_v45 = vsub.f32 1.0, %v2420_v24 }
 0xaac   :  { %v2422_v18 = vmul.f32 %v3834_v40, %v2421_v45  ;;  %v2588_v45 = vmul.f32 %v5256_v34, %v5040_v14 }
 0xac1   :  { %v2557_v46 = vpop.permute.xlu0 %2556 }
 0xac2   :  { %v2562_v27 = vmul.f32 %v2557_v46, %v5256_v34  ;;  %v2454_v3 = vpop.permute.xlu2 %2453  ;;  %v2423_v46 = vadd.f32 %v3834_v40, %v2422_v18 }
 0xac3   :  { %v2458_v22 = vmul.f32 %v2454_v3, %v5259_v32 }
 0xac4   :  { %2566 = vrot.lane.b32.xlu1 %v2562_v27, %s3939_s13  ;;  %v2428_v27 = vand.u32 2147483647, %v2417_v33  ;;  %v2427_v3 = vsel %vm2426_vm13, %v3834_v40, %v2423_v46  ;;  %v2577_v46 = vsub.f32 1.0, %v5264_v44 }
 0xac5   :  { %2463 = vrot.lane.b32.xlu2 %v2458_v22, %s3939_s13  ;;  %v2431_v22 = vor.u32 1.1754944e-38, %v2430_v63 }
 0xac6   :  { %vm2429_vm14 = vcmp.eq.f32.partialorder %v2428_v27, 8.507059e+37  ;;  %v2589_v27 = vmul.f32 %v5264_v44, %v5034_v5 }
 0xac7   :  { %v5284_v19 = vsel %vm2429_vm14, %v2431_v22, %v2427_v3 }
 0xac9   :  { %v2559_v0 = vpop.permute.xlu0 %2558 }
 0xaca   :  { %v2563_v15 = vmul.f32 %v2559_v0, %v5264_v44  ;;  %v2452_v6 = vpop.permute.xlu2 %2451 }
 0xacb   :  { %v2457_v9 = vmul.f32 %v2452_v6, %v5284_v19 }
 0xacc   :  { %2568 = vrot.lane.b32.xlu0 %v2563_v15, %s3939_s13 }
 0xaee   :  { %1921 = vadd.xlane.f32.xlu2 %v1920_v47  ;;  %v1612_v47 = vsel %vm62_vm3, %v4873_v62, 0.0 }
 0xaf4   :  { %v1608_v12 = vpop.xlane.xlu0 %1607 }
 0xaf6   :  { %1610 = vadd.xlane.f32.xlu2 %v1609_v55  ;;  %2082 = vadd.xlane.f32.xlu0 %v2081_v26  ;;  %v1775_v55 = vsel %vm62_vm3, %v4911_v13, 0.0 }
 0xafe   :  { %1924 = vadd.xlane.f32.xlu2 %v1923_v11 }
 0xb06   :  { %2085 = vadd.xlane.f32.xlu2 %v2084_v17  ;;  %v2576_v17 = vsub.f32 1.0, %v5256_v34  ;;  %v1622_v34 = vmax.f32 %v1608_v12, 1e-30 }
 0xb1e   :  { %2461 = vrot.lane.b32.xlu2 %v2457_v9, %s3939_s13 }
 0xb1f   :  { %v2464_v26 = vpop.permute.xlu2 %2463 }
 0xb36   :  { %v2567_v38 = vpop.permute.xlu1 %2566 }
 0xb37   :  { %v2572_v29 = vadd.f32 %v2567_v38, %v5245_v39  ;;  %v1778_v39 = vsel %vm62_vm3, %v4919_v36, 0.0 }
 0xb39   :  { %3835 = vtanh.f32 %v2572_v29 }
 0xb3e   :  { %v2569_v0 = vpop.permute.xlu0 %2568 }
 0xb3f   :  { %v3836_v15 = vpop.eup %3835  ;;  %v2573_v42 = vadd.f32 %v2569_v0, %v5253_v35  ;;  %v2468_v35 = vadd.f32 %v2464_v26, %v5248_v4 }
 0xb40   :  { %2580 = vrot.lane.b32.xlu1 %v3836_v15, %s3940_s28 }
 0xb41   :  { %3837 = vtanh.f32 %v2573_v42 }
 0xb42   :  { %3839 = vtanh.f32 %v2468_v35  ;;  %v2049_v35 = vpop.f32.mrf.mxu2 }
 0xb47   :  { %v3838_v59 = vpop.eup %3837  ;;  %1613 = vadd.xlane.f32.xlu2 %v1612_v47 }
 0xb48   :  { %2582 = vrot.lane.b32.xlu0 %v3838_v59, %s3940_s28  ;;  %v3840_v28 = vpop.eup %3839 }
 0xb61   :  { %v1922_v62 = vpop.xlane.xlu2 %1921 }
 0xb62   :  { %v1936_v5 = vmax.f32 %v1922_v62, 1e-30 }
 0xb69   :  { %v1611_v33 = vpop.xlane.xlu2 %1610  ;;  %v2083_v24 = vpop.xlane.xlu0 %2082 }
 0xb6a   :  { %1776 = vadd.xlane.f32.xlu1 %v1775_v55  ;;  %v1623_v38 = vmax.f32 %v1611_v33, 1e-30 }
 0xb71   :  { %v1925_v11 = vpop.xlane.xlu2 %1924 }
 0xb72   :  { %1779 = vadd.xlane.f32.xlu0 %v1778_v39  ;;  %v1937_v29 = vmax.f32 %v1925_v11, 1e-30 }
 0xb79   :  { %v2086_v40 = vpop.xlane.xlu2 %2085 }
 0xb7a   :  { %v2098_v59 = vmax.f32 %v2086_v40, 1e-30 }
 0xb81   :  { %v2462_v4 = vpop.permute.xlu2 %2461 }
 0xb82   :  { %v2467_v22 = vadd.f32 %v2462_v4, %v5270_v61  ;;  %v2097_v61 = vmax.f32 %v2083_v24, 1e-30 }
 0xb83   :  { %2477 = vrot.lane.b32.xlu1 %v3840_v28, %s3940_s28 }
 0xb84   :  { %3841 = vtanh.f32 %v2467_v22 }
 0xb85   :  { %3843 = vrcp.f32 %v1622_v34 }
 0xb86   :  { %3845 = vrcp.f32 %v1936_v5  ;;  %v2472_v5 = vsub.f32 1.0, %v5259_v32 }
 0xb8a   :  { %v3842_v14 = vpop.eup %3841 }
 0xb8b   :  { %v3844_v0 = vpop.eup %3843 }
 0xb8c   :  { %v3846_v15 = vpop.eup %3845  ;;  %v1638_v39 = vmul.f32 %v3844_v0, %v5005_v48  ;;  %v2471_v0 = vsub.f32 1.0, %v5284_v19 }
 0xb8d   :  { %v1952_v28 = vmul.f32 %v3846_v15, %v5214_v50  ;;  %v2052_v50 = vpop.f32.mrf.mxu2 }
 0xbb2   :  { %v2581_v13 = vpop.permute.xlu1 %2580 }
 0xbb3   :  { %v2586_v36 = vmul.f32 %v2581_v13, %v2576_v17 }
 0xbb5   :  { %v5303_v18 = vadd.f32 %v2588_v45, %v2586_v36 }
 0xbb7   :  { %2594 = vrot.lane.b32.xlu1 %v5303_v18, %s3940_s28 }
 0xbba   :  { %v2583_v63 = vpop.permute.xlu0 %2582 }
 0xbbb   :  { %v2587_v3 = vmul.f32 %v2583_v63, %v2577_v46 }
 0xbbd   :  { %v5311_v6 = vadd.f32 %v2589_v27, %v2587_v3 }
 0xbbf   :  { %1976 = vrot.lane.b32.xlu1 %v4875_v49, %s3939_s13  ;;  %2596 = vrot.lane.b32.xlu0 %v5311_v6, %s3940_s28 }
 0xbc7   :  { %2475 = vrot.lane.b32.xlu1 %v3842_v14, %s3940_s28  ;;  %1978 = vrot.lane.b32.xlu0 %v4885_v7, %s3939_s13 }
 0xbdd   :  { %v1777_v44 = vpop.xlane.xlu1 %1776 }
 0xbde   :  { %v1791_v9 = vmax.f32 %v1777_v44, 1e-30 }
 0xbe0   :  { %3847 = vrcp.f32 %v1791_v9 }
 0xbe1   :  { %3849 = vrcp.f32 %v2097_v61 }
 0xbe2   :  { %3851 = vrcp.f32 %v1623_v38 }
 0xbe3   :  { %3853 = vrcp.f32 %v1937_v29 }
 0xbe5   :  { %v1780_v42 = vpop.xlane.xlu0 %1779 }
 0xbe6   :  { %v3848_v47 = vpop.eup %3847  ;;  %v1792_v55 = vmax.f32 %v1780_v42, 1e-30  ;;  %v2483_v42 = vmul.f32 0.0, %v5284_v19 }
 0xbe7   :  { %v1807_v12 = vmul.f32 %v3848_v47, %v4984_v21  ;;  %v3850_v26 = vpop.eup %3849 }
 0xbe8   :  { %3855 = vrcp.f32 %v1792_v55  ;;  %v2113_v33 = vmul.f32 %v3850_v26, %v2049_v35  ;;  %v3852_v17 = vpop.eup %3851 }
 0xbe9   :  { %v1815_v62 = vadd.f32 %v1807_v12, %v1638_v39  ;;  %3857 = vrcp.f32 %v2098_v59  ;;  %v3854_v24 = vpop.eup %3853  ;;  %v1639_v40 = vmul.f32 %v3852_v17, %v5007_v25 }
 0xbea   :  { %v1953_v21 = vmul.f32 %v3854_v24, %v5216_v58  ;;  %v2484_v58 = vmul.f32 0.0, %v5259_v32 }
 0xbeb   :  { %v1960_v11 = vadd.f32 %v1952_v28, %v1815_v62 }
 0xbed   :  { %v2121_v13 = vadd.f32 %v2113_v33, %v1960_v11 }
 0xbee   :  { %v3856_v45 = vpop.eup %3855 }
 0xbef   :  { %v1808_v48 = vmul.f32 %v3856_v45, %v4986_v23  ;;  %v2129_v36 = vmul.f32 0.25, %v2121_v13  ;;  %v3858_v4 = vpop.eup %3857 }
 0xbf0   :  { %v2114_v27 = vmul.f32 %v3858_v4, %v2052_v50 }
 0xbf1   :  { %v1816_v46 = vadd.f32 %v1808_v48, %v1639_v40  ;;  %v2141_v63 = vadd.f32 %v4974_v56, %v2129_v36 }
 0xbf3   :  { %3424 = vmatmul.msk.f32.gmra.mxu3 %vm1094_vm4, %v2141_v63  ;;  %v1961_v3 = vadd.f32 %v1953_v21, %v1816_v46 }
 0xbf5   :  { %v2122_v22 = vadd.f32 %v2114_v27, %v1961_v3  ;;  %v2478_v25 = vpop.permute.xlu1 %2477 }
 0xbf6   :  { %v2482_v44 = vmul.f32 %v2478_v25, %v2472_v5 }
 0xbf7   :  { %v2130_v14 = vmul.f32 0.25, %v2122_v22 }
 0xbf8   :  { %v5332_v61 = vadd.f32 %v2484_v58, %v2482_v44 }
 0xbf9   :  { %v2142_v34 = vadd.f32 %v4974_v56, %v2130_v14 }
 0xbfb   :  { %3425 = vmatmul.msk.f32.gmra.mxu3 %vm1094_vm4, %v2142_v34 }
 0xc29   :  { %v2595_v23 = vpop.permute.xlu1 %2594 }
 0xc31   :  { %v5334_v9 = vpop.permute.xlu1 %1976  ;;  %v2597_v38 = vpop.permute.xlu0 %2596 }
 0xc32   :  { %v2601_v29 = vsel %vm1094_vm4, %v2597_v38, %v5332_v61  ;;  %3417 = vmatmul.msk.f32.gmra.mxu2 %vm62_vm3, %v5334_v9 }
 0xc33   :  { %3443 = vmatmul.msk.f32.vlgmr.msra.gmra.mxu1 %vm62_vm3, %v2601_v29 }
 0xc34   :  { %3106 = vmatpush.msra.mxu1 %v5049_v41 }
 0xc36   :  { %3107 = vmatpush.msra.mxu1 %v5054_v37 }
 0xc38   :  { %3108 = vmatpush.msra.mxu1 %v5061_v60 }
 0xc39   :  { %v2476_v32 = vpop.permute.xlu1 %2475  ;;  %v5345_v15 = vpop.permute.xlu0 %1978 }
 0xc3a   :  { %v2481_v47 = vmul.f32 %v2476_v32, %v2471_v0  ;;  %3418 = vmatmul.msk.f32.gmra.mxu2 %vm62_vm3, %v5345_v15  ;;  %3109 = vmatpush.msra.mxu1 %v5072_v8 }
 0xc3b   :  { %3446 = vmatmul.msk.f32.vlgmr.msrb.gmra.mxu1 %vm1094_vm4, %v2595_v23 }
 0xc3c   :  { %v5352_v41 = vadd.f32 %v2483_v42, %v2481_v47  ;;  %3110 = vmatpush.msra.mxu1 %v5077_v16  ;;  %v5377_v16 = vld [vmem:[%s5614_s2 + $0x302] ss:$0 sm:$0xff] }
 0xc3e   :  { %v2600_v37 = vsel %vm1094_vm4, %v2595_v23, %v5352_v41  ;;  %3111 = vmatpush.msra.mxu1 %v5084_v1 }
 0xc3f   :  { %3442 = vmatmul.msk.f32.vlgmr.msrb.gmra.mxu0 %vm62_vm3, %v2600_v37 }
 0xc40   :  { %3112 = vmatpush.msra.mxu1 %v5091_v10 }
 0xc42   :  { %3440 = vmatmul.msk.f32.vlgmr.msrb.gmra.mxu2 %vm62_vm3, %v2600_v37  ;;  %3113 = vmatpush.msra.mxu1 %v5103_v57 }
 0xc43   :  { %3447 = vmatmul.msk.f32.gmra.mxu1 %vm1094_vm4, %v2597_v38  ;;  %3129 = vmatpush.msrb.mxu2 %v5110_v30 }
 0xc45   :  { %3130 = vmatpush.msrb.mxu2 %v5115_v20  ;;  %v5636_v20 = vld [vmem:[#allocation11_spill] sm:$0xff] }
 0xc47   :  { %3131 = vmatpush.msrb.mxu2 %v5122_v31 }
 0xc49   :  { %3132 = vmatpush.msrb.mxu2 %v5137_v2 }
 0xc4a   :  { %3441 = vmatmul.msk.f32.gmra.mxu2 %vm62_vm3, %v2601_v29 }
 0xc4b   :  { %3133 = vmatpush.msrb.mxu2 %v5143_v43 }
 0xc4d   :  { %3134 = vmatpush.msrb.mxu2 %v5149_v53  ;;  %v5390_v53 = vld [vmem:[%s5614_s2 + $0x301] ss:$0 sm:$0xff] }
 0xc4f   :  { %3135 = vmatpush.msrb.mxu2 %v5159_v54 }
 0xc51   :  { %3136 = vmatpush.msrb.mxu2 %v5172_v52 }
 0xc76   :  { %v2226_v43 = vpop.f32.mrf.mxu3 }
 0xc77   :  { %v5393_v54 = vadd.f32 %v5390_v53, %v2226_v43 }
 0xc7e   :  { %v2229_v59 = vpop.f32.mrf.mxu3 }
 0xc7f   :  { %v5399_v39 = vadd.f32 %v5390_v53, %v2229_v59 }
 0xcb0   :  { %v5372_v60 = vpop.f32.mrf.mxu1 }
 0xcb5   :  { %v5385_v2 = vpop.f32.mrf.mxu2 }
 0xcb8   :  { %v2753_v8 = vpop.f32.mrf.mxu1 }
 0xcb9   :  { %v2754_v1 = vadd.f32 %v5377_v16, %v2753_v8 }
 0xcbb   :  { %2801 = vrot.lane.b32.xlu0 %v2754_v1, %s3939_s13  ;;  %v2759_v19 = vadd.f32 %v2754_v1, %v5393_v54 }
 0xcbc   :  { %v2648_v30 = vpop.f32.mrf.mxu0 }
 0xcbd   :  { %v2649_v31 = vadd.f32 %v2648_v30, %v5636_v20  ;;  %v5395_v52 = vpop.f32.mrf.mxu2  ;;  %v3448_v55 = vmul.f32 -1.442695, %v2759_v19 }
 0xcbf   :  { %3859 = vpow2.f32 %v3448_v55 }
 0xcc0   :  { %v2756_v10 = vpop.f32.mrf.mxu1 }
 0xcc1   :  { %v2757_v57 = vadd.f32 %v5377_v16, %v2756_v10 }
 0xcc3   :  { %2803 = vrot.lane.b32.xlu1 %v2757_v57, %s3939_s13  ;;  %v2760_v12 = vadd.f32 %v2757_v57, %v5399_v39  ;;  %v2652_v57 = vadd.f32 %v5372_v60, %v5636_v20 }
 0xcc5   :  { %v2625_v26 = vpop.f32.mrf.mxu2  ;;  %v3449_v35 = vmul.f32 -1.442695, %v2760_v12  ;;  %v3860_v62 = vpop.eup %3859 }
 0xcc6   :  { %v5403_v28 = vadd.f32 %v2625_v26, %v5242_v51  ;;  %v2767_v11 = vadd.f32 1.0, %v3860_v62  ;;  %v5637_v62 = vld [vmem:[#allocation4_spill] sm:$0xff] }
 0xcc7   :  { %3861 = vpow2.f32 %v3449_v35  ;;  %v1926_v35 = vsel %vm62_vm3, %v4875_v49, 0.0 }
 0xcc8   :  { %v2654_v33 = vadd.f32 %v2649_v31, %v5403_v28  ;;  %3863 = vrcp.f32 %v2767_v11  ;;  %v2780_v22 = vand.u32 2147483648, %v2767_v11  ;;  %vm2774_vm0 = vweird.f32 %v2767_v11 }
 0xcc9   :  { %v2778_v14 = vand.u32 2147483647, %v2767_v11 }
 0xcca   :  { %v3444_v17 = vmul.f32 -1.442695, %v2654_v33  ;;  %v2781_v5 = vor.u32 1.1754944e-38, %v2780_v22  ;;  %v1784_v33 = vsel %vm62_vm3, %v5637_v62, 0.0 }
 0xccb   :  { %2696 = vrot.lane.b32.xlu1 %v2649_v31, %s3939_s13  ;;  %vm2779_vm2 = vcmp.eq.f32.partialorder %v2778_v14, 8.507059e+37 }
 0xccc   :  { %3865 = vpow2.f32 %v3444_v17  ;;  %v5427_v17 = vpop.xlane.xlu2 %1613 }
 0xccd   :  { %v3862_v24 = vpop.eup %3861 }
 0xcce   :  { %v2768_v13 = vadd.f32 1.0, %v3862_v24  ;;  %v3864_v45 = vpop.eup %3863 }
 0xccf   :  { %v2770_v48 = vmul.f32 %v3864_v45, %v2767_v11  ;;  %vm2775_vm15 = vweird.f32 %v3864_v45  ;;  %v2090_v11 = vsel %vm62_vm3, %v5345_v15, 0.0 }
 0xcd0   :  { %3867 = vrcp.f32 %v2768_v13  ;;  %vm2776_vm1 = vmor %vm2774_vm0, %vm2775_vm15  ;;  %v2795_v32 = vand.u32 2147483648, %v2768_v13  ;;  %vm2789_vm6 = vweird.f32 %v2768_v13  ;;  %v2793_v42 = vand.u32 2147483647, %v2768_v13 }
 0xcd1   :  { %v2771_v4 = vsub.f32 1.0, %v2770_v48  ;;  %v2628_v48 = vpop.f32.mrf.mxu2 }
 0xcd2   :  { %v3866_v40 = vpop.eup %3865  ;;  %v2796_v8 = vor.u32 1.1754944e-38, %v2795_v32  ;;  %vm2794_vm8 = vcmp.eq.f32.partialorder %v2793_v42, 8.507059e+37  ;;  %v5639_v42 = vld [vmem:[#allocation2_spill] sm:$0xff] }
 0xcd3   :  { %v2662_v36 = vadd.f32 1.0, %v3866_v40  ;;  %v2772_v46 = vmul.f32 %v3864_v45, %v2771_v4 }
 0xcd5   :  { %3869 = vrcp.f32 %v2662_v36  ;;  %v2773_v50 = vadd.f32 %v3864_v45, %v2772_v46  ;;  %v2675_v43 = vand.u32 2147483648, %v2662_v36  ;;  %vm2669_vm10 = vweird.f32 %v2662_v36 }
 0xcd6   :  { %v3868_v21 = vpop.eup %3867  ;;  %v2673_v19 = vand.u32 2147483647, %v2662_v36 }
 0xcd7   :  { %v2785_v63 = vmul.f32 %v3868_v21, %v2768_v13  ;;  %v2777_v34 = vsel %vm2776_vm1, %v3864_v45, %v2773_v50  ;;  %vm2790_vm5 = vweird.f32 %v3868_v21  ;;  %v2676_v55 = vor.u32 1.1754944e-38, %v2675_v43 }
 0xcd8   :  { %v5406_v44 = vsel %vm2779_vm2, %v2781_v5, %v2777_v34  ;;  %vm2791_vm7 = vmor %vm2789_vm6, %vm2790_vm5  ;;  %vm2674_vm12 = vcmp.eq.f32.partialorder %v2673_v19, 8.507059e+37  ;;  %v2087_v34 = vsel %vm62_vm3, %v5334_v9, 0.0 }
 0xcd9   :  { %v2786_v27 = vsub.f32 1.0, %v2785_v63  ;;  %v5638_v63 = vld [vmem:[#allocation3_spill] sm:$0xff] }
 0xcda   :  { %v1781_v50 = vsel %vm62_vm3, %v5638_v63, 0.0 }
 0xcdb   :  { %v3870_v3 = vpop.eup %3869  ;;  %v2787_v25 = vmul.f32 %v3868_v21, %v2786_v27 }
 0xcdc   :  { %v2665_v23 = vmul.f32 %v3870_v3, %v2662_v36  ;;  %vm2670_vm9 = vweird.f32 %v3870_v3  ;;  %v5433_v36 = vadd.f32 %v2628_v48, %v5242_v51 }
 0xcdd   :  { %v2788_v29 = vadd.f32 %v3868_v21, %v2787_v25  ;;  %vm2671_vm11 = vmor %vm2669_vm10, %vm2670_vm9 }
 0xcde   :  { %v2666_v0 = vsub.f32 1.0, %v2665_v23  ;;  %v2655_v15 = vadd.f32 %v2652_v57, %v5433_v36 }
 0xcdf   :  { %v2792_v47 = vsel %vm2791_vm7, %v3868_v21, %v2788_v29 }
 0xce0   :  { %v2667_v37 = vmul.f32 %v3870_v3, %v2666_v0  ;;  %v5410_v10 = vsel %vm2794_vm8, %v2796_v8, %v2792_v47  ;;  %v3445_v21 = vmul.f32 -1.442695, %v2655_v15  ;;  %v1615_v47 = vsel %vm62_vm3, %v5639_v42, 0.0 }
 0xce1   :  { %v2822_v43 = vsub.f32 1.0, %v5410_v10 }
 0xce2   :  { %v2668_v31 = vadd.f32 %v3870_v3, %v2667_v37  ;;  %v1929_v37 = vsel %vm62_vm3, %v4885_v7, 0.0  ;;  %v2834_v7 = vmul.f32 %v5410_v10, %v5311_v6 }
 0xce4   :  { %v2672_v59 = vsel %vm2671_vm11, %v3870_v3, %v2668_v31 }
 0xce5   :  { %v5417_v26 = vsel %vm2674_vm12, %v2676_v55, %v2672_v59 }
 0xce6   :  { %v2716_v42 = vsub.f32 1.0, %v5417_v26 }
 0xd2d   :  { %v2802_v58 = vpop.permute.xlu0 %2801 }
 0xd2e   :  { %v2807_v38 = vmul.f32 %v2802_v58, %v5406_v44 }
 0xd30   :  { %2811 = vrot.lane.b32.xlu0 %v2807_v38, %s3939_s13 }
 0xd35   :  { %v2804_v1 = vpop.permute.xlu1 %2803 }
 0xd36   :  { %v2808_v30 = vmul.f32 %v2804_v1, %v5410_v10  ;;  %v2821_v1 = vsub.f32 1.0, %v5406_v44  ;;  %v5640_v10 = vld [vmem:[#allocation5_spill] sm:$0xff] }
 0xd38   :  { %2813 = vrot.lane.b32.xlu2 %v2808_v30, %s3939_s13  ;;  %2698 = vrot.lane.b32.xlu0 %v2652_v57, %s3939_s13 }
 0xd3d   :  { %v2697_v12 = vpop.permute.xlu1 %2696 }
 0xd3e   :  { %v2702_v60 = vmul.f32 %v2697_v12, %v5417_v26 }
 0xd40   :  { %2706 = vrot.lane.b32.xlu0 %v2702_v60, %s3939_s13 }
 0xd6a   :  { %1927 = vadd.xlane.f32.xlu0 %v1926_v35 }
 0xd72   :  { %1785 = vadd.xlane.f32.xlu0 %v1784_v33 }
 0xd7a   :  { %2091 = vadd.xlane.f32.xlu0 %v2090_v11 }
 0xd92   :  { %v2814_v24 = vpop.permute.xlu2 %2813 }
 0xd93   :  { %v2818_v13 = vadd.f32 %v2814_v24, %v5399_v39 }
 0xd95   :  { %3871 = vtanh.f32 %v2818_v13 }
 0xd9b   :  { %v3872_v45 = vpop.eup %3871 }
 0xd9c   :  { %2827 = vrot.lane.b32.xlu1 %v3872_v45, %s3940_s28  ;;  %v5641_v45 = vld [vmem:[#allocation7_spill] sm:$0xff] }
 0xda2   :  { %v2812_v40 = vpop.permute.xlu0 %2811 }
 0xda3   :  { %v2817_v49 = vadd.f32 %v2812_v40, %v5393_v54 }
 0xda5   :  { %3873 = vtanh.f32 %v2817_v49 }
 0xda6   :  { %3875 = vpow2.f32 %v3445_v21 }
 0xdaa   :  { %v2699_v22 = vpop.permute.xlu0 %2698 }
 0xdab   :  { %v3874_v4 = vpop.eup %3873 }
 0xdac   :  { %2825 = vrot.lane.b32.xlu2 %v3874_v4, %s3940_s28  ;;  %v3876_v39 = vpop.eup %3875  ;;  %v5642_v4 = vld [vmem:[#allocation9_spill] sm:$0xff] }
 0xdad   :  { %v2663_v46 = vadd.f32 1.0, %v3876_v39 }
 0xdaf   :  { %3877 = vrcp.f32 %v2663_v46  ;;  %v2690_v23 = vand.u32 2147483648, %v2663_v46  ;;  %vm2684_vm14 = vweird.f32 %v2663_v46  ;;  %v2688_v5 = vand.u32 2147483647, %v2663_v46 }
 0xdb1   :  { %v2691_v29 = vor.u32 1.1754944e-38, %v2690_v23  ;;  %vm2689_vm0 = vcmp.eq.f32.partialorder %v2688_v5, 8.507059e+37 }
 0xdb2   :  { %v2707_v38 = vpop.permute.xlu0 %2706 }
 0xdb3   :  { %v2712_v32 = vadd.f32 %v2707_v38, %v5403_v28  ;;  %v2833_v28 = vmul.f32 %v5406_v44, %v5303_v18  ;;  %v1624_v44 = vmax.f32 %v5427_v17, 1e-30 }
 0xdb5   :  { %v3878_v27 = vpop.eup %3877  ;;  %3879 = vtanh.f32 %v2712_v32 }
 0xdb6   :  { %v2680_v54 = vmul.f32 %v3878_v27, %v2663_v46  ;;  %vm2685_vm13 = vweird.f32 %v3878_v27 }
 0xdb7   :  { %vm2686_vm15 = vmor %vm2684_vm14, %vm2685_vm13 }
 0xdb8   :  { %v2681_v3 = vsub.f32 1.0, %v2680_v54 }
 0xdba   :  { %v2682_v14 = vmul.f32 %v3878_v27, %v2681_v3 }
 0xdbb   :  { %v3880_v8 = vpop.eup %3879 }
 0xdbc   :  { %v2683_v25 = vadd.f32 %v3878_v27, %v2682_v14 }
 0xdbe   :  { %v2687_v58 = vsel %vm2686_vm15, %v3878_v27, %v2683_v25 }
 0xdbf   :  { %v5441_v0 = vsel %vm2689_vm0, %v2691_v29, %v2687_v58  ;;  %v5643_v29 = vld [vmem:[#allocation8_spill] sm:$0xff] }
 0xdc0   :  { %v2703_v9 = vmul.f32 %v2699_v22, %v5441_v0 }
 0xdc6   :  { %1782 = vadd.xlane.f32.xlu1 %v1781_v50 }
 0xdd5   :  { %2088 = vadd.xlane.f32.xlu2 %v2087_v34 }
 0xddd   :  { %1616 = vadd.xlane.f32.xlu2 %v1615_v47  ;;  %v1928_v60 = vpop.xlane.xlu0 %1927 }
 0xdde   :  { %v1938_v35 = vmax.f32 %v1928_v60, 1e-30 }
 0xddf   :  { %2708 = vrot.lane.b32.xlu1 %v2703_v9, %s3939_s13  ;;  %v5644_v9 = vld [vmem:[#allocation6_spill] sm:$0xff] }
 0xde5   :  { %1930 = vadd.xlane.f32.xlu2 %v1929_v37  ;;  %v1786_v24 = vpop.xlane.xlu0 %1785 }
 0xde6   :  { %v1794_v54 = vmax.f32 %v1786_v24, 1e-30 }
 0xde7   :  { %2720 = vrot.lane.b32.xlu1 %v3880_v8, %s3940_s28 }
 0xded   :  { %v2092_v3 = vpop.xlane.xlu0 %2091 }
 0xdee   :  { %v2100_v14 = vmax.f32 %v2092_v3, 1e-30 }
 0xe06   :  { %v2826_v57 = vpop.permute.xlu2 %2825 }
 0xe07   :  { %v2831_v30 = vmul.f32 %v2826_v57, %v2821_v1 }
 0xe09   :  { %v5454_v31 = vadd.f32 %v2833_v28, %v2831_v30  ;;  %v5645_v28 = vld [vmem:[#allocation10_spill] sm:$0xff] }
 0xe0b   :  { %2839 = vrot.lane.b32.xlu2 %v5454_v31, %s3940_s28 }
 0xe0e   :  { %v2828_v19 = vpop.permute.xlu1 %2827 }
 0xe0f   :  { %v2832_v59 = vmul.f32 %v2828_v19, %v2822_v43  ;;  %v2728_v43 = vmul.f32 %v5417_v26, %v5352_v41 }
 0xe11   :  { %v5461_v55 = vadd.f32 %v2834_v7, %v2832_v59 }
 0xe13   :  { %2841 = vrot.lane.b32.xlu0 %v5461_v55, %s3940_s28 }
 0xe39   :  { %v1783_v12 = vpop.xlane.xlu1 %1782 }
 0xe3a   :  { %v1793_v18 = vmax.f32 %v1783_v12, 1e-30 }
 0xe3c   :  { %3881 = vrcp.f32 %v1793_v18 }
 0xe3d   :  { %3883 = vrcp.f32 %v1624_v44 }
 0xe3e   :  { %3885 = vrcp.f32 %v1938_v35 }
 0xe42   :  { %v3882_v62 = vpop.eup %3881 }
 0xe43   :  { %v3884_v11 = vpop.eup %3883  ;;  %v1809_v13 = vmul.f32 %v3882_v62, %v5640_v10  ;;  %v2729_v62 = vmul.f32 %v5441_v0, %v5332_v61 }
 0xe44   :  { %v1640_v40 = vmul.f32 %v3884_v11, %v5641_v45  ;;  %v3886_v49 = vpop.eup %3885 }
 0xe45   :  { %v1954_v15 = vmul.f32 %v3886_v49, %v5642_v4 }
 0xe46   :  { %v1817_v48 = vadd.f32 %v1809_v13, %v1640_v40 }
 0xe48   :  { %v2089_v33 = vpop.xlane.xlu2 %2088  ;;  %v1962_v27 = vadd.f32 %v1954_v15, %v1817_v48 }
 0xe49   :  { %v2099_v6 = vmax.f32 %v2089_v33, 1e-30 }
 0xe4b   :  { %3887 = vrcp.f32 %v2099_v6 }
 0xe50   :  { %v1617_v17 = vpop.xlane.xlu2 %1616 }
 0xe51   :  { %v3888_v21 = vpop.eup %3887  ;;  %v1625_v39 = vmax.f32 %v1617_v17, 1e-30  ;;  %v2709_v46 = vpop.permute.xlu1 %2708 }
 0xe52   :  { %v2115_v63 = vmul.f32 %v3888_v21, %v5385_v2  ;;  %v2713_v50 = vadd.f32 %v2709_v46, %v5433_v36 }
 0xe54   :  { %3889 = vtanh.f32 %v2713_v50  ;;  %v2123_v22 = vadd.f32 %v2115_v63, %v1962_v27 }
 0xe55   :  { %3891 = vrcp.f32 %v1625_v39 }
 0xe56   :  { %v2131_v34 = vmul.f32 0.25, %v2123_v22  ;;  %3893 = vrcp.f32 %v1794_v54 }
 0xe57   :  { %3895 = vrcp.f32 %v2100_v14 }
 0xe58   :  { %v1931_v25 = vpop.xlane.xlu2 %1930  ;;  %v2143_v23 = vadd.f32 %v4974_v56, %v2131_v34 }
 0xe59   :  { %v1939_v5 = vmax.f32 %v1931_v25, 1e-30  ;;  %v2721_v38 = vpop.permute.xlu1 %2720 }
 0xe5a   :  { %v3890_v58 = vpop.eup %3889  ;;  %3426 = vmatmul.msk.f32.gmra.mxu3 %vm1094_vm4, %v2143_v23  ;;  %v2726_v8 = vmul.f32 %v2721_v38, %v2716_v42 }
 0xe5b   :  { %v3892_v2 = vpop.eup %3891  ;;  %3897 = vrcp.f32 %v1939_v5  ;;  %2722 = vrot.lane.b32.xlu1 %v3890_v58, %s3940_s28 }
 0xe5c   :  { %v3894_v36 = vpop.eup %3893  ;;  %v1641_v32 = vmul.f32 %v3892_v2, %v5643_v29  ;;  %v5481_v59 = vadd.f32 %v2728_v43, %v2726_v8 }
 0xe5d   :  { %v3896_v47 = vpop.eup %3895  ;;  %v1810_v37 = vmul.f32 %v3894_v36, %v5644_v9 }
 0xe5e   :  { %v2116_v19 = vmul.f32 %v3896_v47, %v5395_v52  ;;  %v2717_v52 = vsub.f32 1.0, %v5441_v0 }
 0xe5f   :  { %v1818_v57 = vadd.f32 %v1810_v37, %v1641_v32 }
 0xe61   :  { %v3898_v1 = vpop.eup %3897 }
 0xe62   :  { %v1955_v30 = vmul.f32 %v3898_v1, %v5645_v28 }
 0xe64   :  { %v1963_v7 = vadd.f32 %v1955_v30, %v1818_v57 }
 0xe65   :  { %v2840_v12 = vpop.permute.xlu2 %2839 }
 0xe66   :  { %v2845_v18 = vsel %vm1094_vm4, %v2840_v12, %v5481_v59  ;;  %3456 = vmatmul.msk.f32.vlgmr.msra.gmra.mxu0 %vm1094_vm4, %v2840_v12  ;;  %v2124_v44 = vadd.f32 %v2116_v19, %v1963_v7 }
 0xe67   :  { %3450 = vmatmul.msk.f32.vlgmr.msra.gmra.mxu2 %vm62_vm3, %v2845_v18 }
 0xe68   :  { %v2132_v60 = vmul.f32 0.25, %v2124_v44 }
 0xe6a   :  { %v2144_v35 = vadd.f32 %v4974_v56, %v2132_v60 }
 0xe6c   :  { %3427 = vmatmul.msk.f32.gmra.mxu3 %vm1094_vm4, %v2144_v35 }
 0xe74   :  { %3452 = vmatmul.msk.f32.vlgmr.msrb.gmra.mxu3 %vm62_vm3, %v2845_v18 }
 0xe85   :  { %v2842_v41 = vpop.permute.xlu0 %2841 }
 0xe86   :  { %3457 = vmatmul.msk.f32.gmra.mxu0 %vm1094_vm4, %v2842_v41 }
 0xecd   :  { %v2723_v26 = vpop.permute.xlu1 %2722 }
 0xece   :  { %v2727_v33 = vmul.f32 %v2723_v26, %v2717_v52 }
 0xed0   :  { %v5494_v11 = vadd.f32 %v2729_v62, %v2727_v33 }
 0xed2   :  { %v2846_v24 = vsel %vm1094_vm4, %v2842_v41, %v5494_v11 }
 0xed3   :  { %3451 = vmatmul.msk.f32.gmra.mxu2 %vm62_vm3, %v2846_v24  ;;  %3453 = vmatmul.msk.f32.gmra.mxu3 %vm62_vm3, %v2846_v24 }
 0xedd   :  { %v2232_v10 = vpop.f32.mrf.mxu3 }
 0xede   :  { %v5507_v49 = vadd.f32 %v5390_v53, %v2232_v10 }
 0xee3   :  { %v2998_v56 = vpop.f32.mrf.mxu0 }
 0xee4   :  { %v2999_v6 = vadd.f32 %v5377_v16, %v2998_v56 }
 0xee6   :  { %3046 = vrot.lane.b32.xlu0 %v2999_v6, %s3939_s13  ;;  %v3004_v48 = vadd.f32 %v2999_v6, %v5507_v49 }
 0xee8   :  { %v3458_v15 = vmul.f32 -1.442695, %v3004_v48 }
 0xeea   :  { %v2870_v4 = vpop.f32.mrf.mxu2  ;;  %3899 = vpow2.f32 %v3458_v15 }
 0xeeb   :  { %v5511_v17 = vadd.f32 %v2870_v4, %v5242_v51 }
 0xeef   :  { %v2235_v13 = vpop.f32.mrf.mxu3 }
 0xef0   :  { %v3900_v46 = vpop.eup %3899  ;;  %v5515_v54 = vadd.f32 %v5390_v53, %v2235_v13 }
 0xef1   :  { %v3012_v63 = vadd.f32 1.0, %v3900_v46 }
 0xef3   :  { %v3025_v36 = vand.u32 2147483648, %v3012_v63  ;;  %vm3019_vm2 = vweird.f32 %v3012_v63  ;;  %v3023_v38 = vand.u32 2147483647, %v3012_v63 }
 0xef5   :  { %v3026_v47 = vor.u32 1.1754944e-38, %v3025_v36  ;;  %vm3024_vm6 = vcmp.eq.f32.partialorder %v3023_v38, 8.507059e+37 }
 0xef7   :  { %v2893_v45 = vpop.f32.mrf.mxu3 }
 0xef8   :  { %v2894_v61 = vadd.f32 %v2893_v45, %v5636_v20 }
 0xefa   :  { %2941 = vrot.lane.b32.xlu2 %v2894_v61, %s3939_s13  ;;  %v2899_v21 = vadd.f32 %v2894_v61, %v5511_v17 }
 0xefc   :  { %v3454_v39 = vmul.f32 -1.442695, %v2899_v21 }
 0xefe   :  { %3901 = vpow2.f32 %v3454_v39 }
 0xeff   :  { %3903 = vrcp.f32 %v3012_v63 }
 0xf03   :  { %v3001_v0 = vpop.f32.mrf.mxu0 }
 0xf04   :  { %v3002_v40 = vadd.f32 %v5377_v16, %v3001_v0  ;;  %v3902_v16 = vpop.eup %3901 }
 0xf05   :  { %v2907_v50 = vadd.f32 1.0, %v3902_v16  ;;  %v3904_v27 = vpop.eup %3903 }
 0xf06   :  { %3048 = vrot.lane.b32.xlu1 %v3002_v40, %s3939_s13  ;;  %v3015_v3 = vmul.f32 %v3904_v27, %v3012_v63  ;;  %v3005_v22 = vadd.f32 %v3002_v40, %v5515_v54  ;;  %vm3020_vm1 = vweird.f32 %v3904_v27 }
 0xf07   :  { %3905 = vrcp.f32 %v2907_v50  ;;  %vm3021_vm5 = vmor %vm3019_vm2, %vm3020_vm1  ;;  %v2920_v30 = vand.u32 2147483648, %v2907_v50  ;;  %vm2914_vm8 = vweird.f32 %v2907_v50  ;;  %v2918_v43 = vand.u32 2147483647, %v2907_v50 }
 0xf08   :  { %v3016_v14 = vsub.f32 1.0, %v3015_v3  ;;  %v3459_v25 = vmul.f32 -1.442695, %v3005_v22 }
 0xf09   :  { %v2921_v12 = vor.u32 1.1754944e-38, %v2920_v30  ;;  %vm2919_vm10 = vcmp.eq.f32.partialorder %v2918_v43, 8.507059e+37 }
 0xf0a   :  { %v3017_v5 = vmul.f32 %v3904_v27, %v3016_v14  ;;  %3907 = vpow2.f32 %v3459_v25 }
 0xf0c   :  { %v3018_v2 = vadd.f32 %v3904_v27, %v3017_v5 }
 0xf0d   :  { %v3906_v34 = vpop.eup %3905 }
 0xf0e   :  { %v2910_v23 = vmul.f32 %v3906_v34, %v2907_v50  ;;  %v3022_v53 = vsel %vm3021_vm5, %v3904_v27, %v3018_v2  ;;  %vm2915_vm7 = vweird.f32 %v3906_v34 }
 0xf0f   :  { %v5519_v8 = vsel %vm3024_vm6, %v3026_v47, %v3022_v53  ;;  %vm2916_vm9 = vmor %vm2914_vm8, %vm2915_vm7 }
 0xf10   :  { %v2911_v58 = vsub.f32 1.0, %v2910_v23  ;;  %v3908_v29 = vpop.eup %3907 }
 0xf11   :  { %v3013_v37 = vadd.f32 1.0, %v3908_v29 }
 0xf12   :  { %v2912_v32 = vmul.f32 %v3906_v34, %v2911_v58 }
 0xf13   :  { %3909 = vrcp.f32 %v3013_v37  ;;  %v3040_v62 = vand.u32 2147483648, %v3013_v37  ;;  %vm3034_vm12 = vweird.f32 %v3013_v37  ;;  %v3038_v33 = vand.u32 2147483647, %v3013_v37 }
 0xf14   :  { %v2913_v57 = vadd.f32 %v3906_v34, %v2912_v32 }
 0xf15   :  { %v3041_v56 = vor.u32 1.1754944e-38, %v3040_v62  ;;  %vm3039_vm14 = vcmp.eq.f32.partialorder %v3038_v33, 8.507059e+37 }
 0xf16   :  { %v2917_v19 = vsel %vm2916_vm9, %v3906_v34, %v2913_v57 }
 0xf17   :  { %v5524_v18 = vsel %vm2919_vm10, %v2921_v12, %v2917_v19 }
 0xf19   :  { %v3910_v60 = vpop.eup %3909 }
 0xf1a   :  { %v3030_v35 = vmul.f32 %v3910_v60, %v3013_v37  ;;  %vm3035_vm11 = vweird.f32 %v3910_v60 }
 0xf1b   :  { %vm3036_vm13 = vmor %vm3034_vm12, %vm3035_vm11  ;;  %vm3296_vm12 = vcmask 80896  }
 0xf1c   :  { %v3031_v41 = vsub.f32 1.0, %v3030_v35 }
 0xf1e   :  { %v3032_v52 = vmul.f32 %v3910_v60, %v3031_v41 }
 0xf20   :  { %v3033_v26 = vadd.f32 %v3910_v60, %v3032_v52 }
 0xf22   :  { %v3037_v24 = vsel %vm3036_vm13, %v3910_v60, %v3033_v26 }
 0xf23   :  { %v3042_v10 = vsel %vm3039_vm14, %v3041_v56, %v3037_v24 }
 0xf54   :  { %v2942_v7 = vpop.permute.xlu2 %2941 }
 0xf55   :  { %v2947_v44 = vmul.f32 %v2942_v7, %v5524_v18  ;;  %v2973_v7 = vmul.f32 %v5524_v18, %v5481_v59 }
 0xf56   :  { %v2896_v42 = vpop.f32.mrf.mxu3  ;;  %v2873_v45 = vpop.f32.mrf.mxu2 }
 0xf57   :  { %v2897_v9 = vadd.f32 %v2896_v42, %v5636_v20  ;;  %v2874_v61 = vadd.f32 %v2873_v45, %v5242_v51  ;;  %v3078_v42 = vmul.f32 %v5519_v8, %v5454_v31  ;;  %v2961_v31 = vsub.f32 1.0, %v5524_v18 }
 0xf58   :  { %v3047_v1 = vpop.permute.xlu0 %3046 }
 0xf59   :  { %v3052_v28 = vmul.f32 %v3047_v1, %v5519_v8  ;;  %2943 = vrot.lane.b32.xlu1 %v2897_v9, %s3939_s13  ;;  %v2900_v0 = vadd.f32 %v2897_v9, %v2874_v61  ;;  %v3067_v1 = vsub.f32 1.0, %v3042_v10 }
 0xf5b   :  { %3056 = vrot.lane.b32.xlu0 %v3052_v28, %s3939_s13  ;;  %v3455_v40 = vmul.f32 -1.442695, %v2900_v0  ;;  %v3079_v28 = vmul.f32 %v3042_v10, %v5461_v55 }
 0xf5d   :  { %3911 = vpow2.f32 %v3455_v40 }
 0xf63   :  { %2951 = vrot.lane.b32.xlu0 %v2947_v44, %s3939_s13  ;;  %v3912_v48 = vpop.eup %3911 }
 0xf64   :  { %v2908_v4 = vadd.f32 1.0, %v3912_v48 }
 0xf66   :  { %3913 = vrcp.f32 %v2908_v4  ;;  %v2935_v16 = vand.u32 2147483648, %v2908_v4  ;;  %vm2929_vm0 = vweird.f32 %v2908_v4  ;;  %v2933_v50 = vand.u32 2147483647, %v2908_v4 }
 0xf68   :  { %v2936_v3 = vor.u32 1.1754944e-38, %v2935_v16  ;;  %vm2934_vm2 = vcmp.eq.f32.partialorder %v2933_v50, 8.507059e+37 }
 0xf6c   :  { %v3914_v15 = vpop.eup %3913 }
 0xf6d   :  { %v2925_v21 = vmul.f32 %v3914_v15, %v2908_v4  ;;  %vm2930_vm15 = vweird.f32 %v3914_v15 }
 0xf6e   :  { %vm2931_vm1 = vmor %vm2929_vm0, %vm2930_vm15 }
 0xf6f   :  { %v2926_v39 = vsub.f32 1.0, %v2925_v21 }
 0xf71   :  { %v2927_v46 = vmul.f32 %v3914_v15, %v2926_v39 }
 0xf73   :  { %v2928_v63 = vadd.f32 %v3914_v15, %v2927_v46 }
 0xf75   :  { %v2932_v27 = vsel %vm2931_vm1, %v3914_v15, %v2928_v63 }
 0xf76   :  { %v2937_v14 = vsel %vm2934_vm2, %v2936_v3, %v2932_v27 }
 0xf77   :  { %v2962_v35 = vsub.f32 1.0, %v2937_v14  ;;  %v2974_v52 = vmul.f32 %v2937_v14, %v5494_v11 }
 0xf78   :  { %v3049_v6 = vpop.permute.xlu1 %3048 }
 0xf79   :  { %v3053_v13 = vmul.f32 %v3049_v6, %v3042_v10 }
 0xf7b   :  { %3058 = vrot.lane.b32.xlu2 %v3053_v13, %s3939_s13 }
 0xfcb   :  { %v2944_v22 = vpop.permute.xlu1 %2943 }
 0xfcc   :  { %v2948_v34 = vmul.f32 %v2944_v22, %v2937_v14 }
 0xfcd   :  { %v3057_v25 = vpop.permute.xlu0 %3056 }
 0xfce   :  { %v3062_v23 = vadd.f32 %v3057_v25, %v5507_v49  ;;  %2953 = vrot.lane.b32.xlu1 %v2948_v34, %s3939_s13  ;;  %v3066_v49 = vsub.f32 1.0, %v5519_v8 }
 0xfd0   :  { %3915 = vtanh.f32 %v3062_v23 }
 0xfd5   :  { %v3059_v5 = vpop.permute.xlu2 %3058  ;;  %v2952_v58 = vpop.permute.xlu0 %2951 }
 0xfd6   :  { %v3916_v2 = vpop.eup %3915  ;;  %v3063_v36 = vadd.f32 %v3059_v5, %v5515_v54  ;;  %v2957_v38 = vadd.f32 %v2952_v58, %v5511_v17 }
 0xfd7   :  { %3070 = vrot.lane.b32.xlu2 %v3916_v2, %s3940_s28 }
 0xfd8   :  { %3917 = vtanh.f32 %v3063_v36 }
 0xfd9   :  { %3919 = vtanh.f32 %v2957_v38 }
 0xfde   :  { %v3918_v29 = vpop.eup %3917 }
 0xfdf   :  { %v3920_v32 = vpop.eup %3919  ;;  %3072 = vrot.lane.b32.xlu0 %v3918_v29, %s3940_s28 }
 0xfe0   :  { %2965 = vrot.lane.b32.xlu1 %v3920_v32, %s3940_s28 }
0x1031   :  { %v3071_v53 = vpop.permute.xlu2 %3070 }
0x1032   :  { %v3076_v47 = vmul.f32 %v3071_v53, %v3066_v49 }
0x1034   :  { %v3080_v54 = vadd.f32 %v3078_v42, %v3076_v47 }
0x1036   :  { %3084 = vrot.lane.b32.xlu2 %v3080_v54, %s3940_s28 }
0x1040   :  { %v2954_v17 = vpop.permute.xlu1 %2953 }
0x1041   :  { %v2958_v9 = vadd.f32 %v2954_v17, %v2874_v61 }
0x1043   :  { %3921 = vtanh.f32 %v2958_v9 }
0x1049   :  { %v3922_v37 = vpop.eup %3921 }
0x104a   :  { %2967 = vrot.lane.b32.xlu0 %v3922_v37, %s3940_s28 }
0x1051   :  { %v3073_v57 = vpop.permute.xlu0 %3072 }
0x1052   :  { %v3077_v30 = vmul.f32 %v3073_v57, %v3067_v1  ;;  %v2966_v19 = vpop.permute.xlu1 %2965 }
0x1053   :  { %v2971_v8 = vmul.f32 %v2966_v19, %v2961_v31  ;;  %v3225_v31 = vld [vmem:[%s5614_s2 + $0x2b0] sm:$0xff] }
0x1054   :  { %v3081_v43 = vadd.f32 %v3079_v28, %v3077_v30  ;;  %3249 = vmatpush.msra.mxu2 %v3225_v31  ;;  %3478 = vmatpush.msra.mxu3 %v3225_v31 }
0x1055   :  { %v5547_v12 = vadd.f32 %v2973_v7, %v2971_v8  ;;  %v3224_v8 = vld [vmem:[%s5614_s2 + $0x2a0] sm:$0xff]  ;;  %v3223_v7 = vld [vmem:[%s5614_s2 + $0x290] sm:$0xff] }
0x1056   :  { %3086 = vrot.lane.b32.xlu1 %v3081_v43, %s3940_s28  ;;  %3250 = vmatpush.msra.mxu2 %v3224_v8 }
0x1057   :  { %3479 = vmatpush.msra.mxu3 %v3224_v8 }
0x1058   :  { %3251 = vmatpush.msra.mxu2 %v3223_v7 }
0x1059   :  { %3480 = vmatpush.msra.mxu3 %v3223_v7 }
0x1090   :  { %v3085_v44 = vpop.permute.xlu2 %3084 }
0x1091   :  { %v3090_v60 = vsel %vm1094_vm4, %v3085_v44, %v5547_v12 }
0x1092   :  { %3460 = vmatmul.msk.f32.vlgmr.msra.gmra.mxu1 %vm62_vm3, %v3090_v60  ;;  %3462 = vmatmul.msk.f32.vlgmr.msrb.gmra.mxu2 %vm62_vm3, %v3090_v60 }
0x10bc   :  { %v2968_v55 = vpop.permute.xlu0 %2967 }
0x10bd   :  { %v2972_v41 = vmul.f32 %v2968_v55, %v2962_v35 }
0x10bf   :  { %v5554_v26 = vadd.f32 %v2974_v52, %v2972_v41 }
0x10c8   :  { %v3087_v62 = vpop.permute.xlu1 %3086 }
0x10c9   :  { %v3091_v59 = vsel %vm1094_vm4, %v3087_v62, %v5554_v26  ;;  %v3265_v62 = vld [vmem:[%s5614_s2 + $0x2f0] sm:$0xff] }
0x10ca   :  { %3461 = vmatmul.msk.f32.gmra.mxu1 %vm62_vm3, %v3091_v59  ;;  %3463 = vmatmul.msk.f32.gmra.mxu2 %vm62_vm3, %v3091_v59 }
0x10cb   :  { %3285 = vmatpush.msrb.mxu0 %v3265_v62 }
0x110f   :  { %v3115_v24 = vpop.f32.mrf.mxu1 }
0x1110   :  { %v3116_v56 = vadd.f32 %v3115_v24, %v5242_v51  ;;  %v3226_v24 = vld [vmem:[%s5614_s2 + $0x304] ss:$0 sm:$0xff] }
0x1115   :  { %v3138_v18 = vpop.f32.mrf.mxu2 }
0x1116   :  { %v3139_v33 = vadd.f32 %v3138_v18, %v5636_v20  ;;  %v3264_v18 = vld [vmem:[%s5614_s2 + $0x2e0] sm:$0xff] }
0x1117   :  { %3286 = vmatpush.msrb.mxu0 %v3264_v18 }
0x1118   :  { %3186 = vrot.lane.b32.xlu2 %v3139_v33, %s3939_s13  ;;  %v3144_v6 = vadd.f32 %v3139_v33, %v3116_v56  ;;  %v3262_v33 = vld [vmem:[%s5614_s2 + $0x2c0] sm:$0xff] }
0x111a   :  { %v3464_v11 = vmul.f32 -1.442695, %v3144_v6 }
0x111c   :  { %3923 = vpow2.f32 %v3464_v11 }
0x1122   :  { %v3924_v45 = vpop.eup %3923 }
0x1123   :  { %v3152_v61 = vadd.f32 1.0, %v3924_v45 }
0x1125   :  { %3925 = vrcp.f32 %v3152_v61  ;;  %v3165_v21 = vand.u32 2147483648, %v3152_v61  ;;  %vm3159_vm5 = vweird.f32 %v3152_v61  ;;  %v3163_v39 = vand.u32 2147483647, %v3152_v61 }
0x1127   :  { %v3166_v63 = vor.u32 1.1754944e-38, %v3165_v21  ;;  %vm3164_vm7 = vcmp.eq.f32.partialorder %v3163_v39, 8.507059e+37 }
0x112b   :  { %v3926_v0 = vpop.eup %3925 }
0x112c   :  { %v3155_v40 = vmul.f32 %v3926_v0, %v3152_v61  ;;  %vm3160_vm3 = vweird.f32 %v3926_v0  ;;  %v3266_v61 = vld [vmem:[%s5614_s2 + $0x305] ss:$0 sm:$0xff] }
0x112d   :  { %vm3161_vm6 = vmor %vm3159_vm5, %vm3160_vm3 }
0x112e   :  { %v3156_v48 = vsub.f32 1.0, %v3155_v40 }
0x1130   :  { %v3157_v4 = vmul.f32 %v3926_v0, %v3156_v48 }
0x1132   :  { %v3158_v15 = vadd.f32 %v3926_v0, %v3157_v4 }
0x1134   :  { %v3162_v46 = vsel %vm3161_vm6, %v3926_v0, %v3158_v15 }
0x1147   :  { %v3118_v27 = vpop.f32.mrf.mxu1 }
0x1148   :  { %v3119_v3 = vadd.f32 %v3118_v27, %v5242_v51 }
0x114d   :  { %v3141_v10 = vpop.f32.mrf.mxu2 }
0x114e   :  { %v3142_v13 = vadd.f32 %v3141_v10, %v5636_v20  ;;  %v3167_v20 = vsel %vm3164_vm7, %v3166_v63, %v3162_v46 }
0x114f   :  { %v3206_v57 = vsub.f32 1.0, %v3167_v20  ;;  %v3218_v30 = vmul.f32 %v3167_v20, %v5547_v12  ;;  %v3222_v12 = vld [vmem:[%s5614_s2 + $0x280] sm:$0xff] }
0x1150   :  { %3188 = vrot.lane.b32.xlu0 %v3142_v13, %s3939_s13  ;;  %v3145_v22 = vadd.f32 %v3142_v13, %v3119_v3  ;;  %3252 = vmatpush.msra.mxu2 %v3222_v12 }
0x1151   :  { %3481 = vmatpush.msra.mxu3 %v3222_v12 }
0x1152   :  { %v3465_v14 = vmul.f32 -1.442695, %v3145_v22 }
0x1154   :  { %3927 = vpow2.f32 %v3465_v14 }
0x115a   :  { %v3928_v34 = vpop.eup %3927 }
0x115b   :  { %v3153_v25 = vadd.f32 1.0, %v3928_v34 }
0x115d   :  { %3929 = vrcp.f32 %v3153_v25  ;;  %v3180_v38 = vand.u32 2147483648, %v3153_v25  ;;  %vm3174_vm9 = vweird.f32 %v3153_v25  ;;  %v3178_v29 = vand.u32 2147483647, %v3153_v25 }
0x115f   :  { %v3181_v49 = vor.u32 1.1754944e-38, %v3180_v38  ;;  %vm3179_vm11 = vcmp.eq.f32.partialorder %v3178_v29, 8.507059e+37 }
0x1163   :  { %v3930_v23 = vpop.eup %3929 }
0x1164   :  { %v3170_v5 = vmul.f32 %v3930_v23, %v3153_v25  ;;  %vm3175_vm8 = vweird.f32 %v3930_v23 }
0x1165   :  { %vm3176_vm10 = vmor %vm3174_vm9, %vm3175_vm8 }
0x1166   :  { %v3171_v58 = vsub.f32 1.0, %v3170_v5 }
0x1168   :  { %v3172_v2 = vmul.f32 %v3930_v23, %v3171_v58 }
0x116a   :  { %v3173_v36 = vadd.f32 %v3930_v23, %v3172_v2 }
0x116c   :  { %v3177_v32 = vsel %vm3176_vm10, %v3930_v23, %v3173_v36 }
0x116d   :  { %v3182_v53 = vsel %vm3179_vm11, %v3181_v49, %v3177_v32 }
0x116e   :  { %v3207_v44 = vsub.f32 1.0, %v3182_v53  ;;  %v3219_v55 = vmul.f32 %v3182_v53, %v5554_v26  ;;  %v3263_v26 = vld [vmem:[%s5614_s2 + $0x2d0] sm:$0xff] }
0x116f   :  { %3287 = vmatpush.msrb.mxu0 %v3263_v26 }
0x1171   :  { %3288 = vmatpush.msrb.mxu0 %v3262_v33 }
0x1172   :  { %v3187_v16 = vpop.permute.xlu2 %3186 }
0x1173   :  { %v3192_v50 = vmul.f32 %v3187_v16, %v3167_v20 }
0x1175   :  { %3196 = vrot.lane.b32.xlu1 %v3192_v50, %s3939_s13 }
0x11c2   :  { %v3189_v51 = vpop.permute.xlu0 %3188 }
0x11c3   :  { %v3193_v42 = vmul.f32 %v3189_v51, %v3182_v53 }
0x11c5   :  { %3198 = vrot.lane.b32.xlu2 %v3193_v42, %s3939_s13 }
0x11e7   :  { %v3197_v47 = vpop.permute.xlu1 %3196 }
0x11e8   :  { %v3202_v54 = vadd.f32 %v3197_v47, %v3116_v56 }
0x11ea   :  { %3931 = vtanh.f32 %v3202_v54 }
0x11f0   :  { %v3932_v17 = vpop.eup %3931 }
0x11f1   :  { %3210 = vrot.lane.b32.xlu0 %v3932_v17, %s3940_s28 }
0x121f   :  { %v3199_v9 = vpop.permute.xlu2 %3198 }
0x1220   :  { %v3203_v37 = vadd.f32 %v3199_v9, %v3119_v3 }
0x1222   :  { %3933 = vtanh.f32 %v3203_v37 }
0x1228   :  { %v3934_v1 = vpop.eup %3933 }
0x1229   :  { %3212 = vrot.lane.b32.xlu1 %v3934_v1, %s3940_s28 }
0x1263   :  { %v3211_v28 = vpop.permute.xlu0 %3210 }
0x1264   :  { %v3216_v43 = vmul.f32 %v3211_v28, %v3206_v57 }
0x1266   :  { %v3220_v19 = vadd.f32 %v3218_v30, %v3216_v43 }
0x1268   :  { %3229 = vrot.lane.b32.xlu2 %v3220_v19, %s3940_s28 }
0x129b   :  { %v3213_v60 = vpop.permute.xlu1 %3212 }
0x129c   :  { %v3217_v35 = vmul.f32 %v3213_v60, %v3207_v44 }
0x129e   :  { %v3221_v41 = vadd.f32 %v3219_v55, %v3217_v35 }
0x12a0   :  { %3231 = vrot.lane.b32.xlu0 %v3221_v41, %s3940_s28 }
0x12c2   :  { %v3230_v52 = vpop.permute.xlu2 %3229 }
0x12c3   :  { %3466 = vmatmul.msk.f32.vlgmr.msra.gmra.mxu2 %vm1094_vm4, %v3230_v52 }
0x1312   :  { %v3232_v59 = vpop.permute.xlu0 %3231 }
0x1313   :  { %3467 = vmatmul.msk.f32.vlgmr.msra.gmra.mxu3 %vm1094_vm4, %v3232_v59 }
0x1346   :  { %v3254_v56 = vpop.f32.mrf.mxu2 }
0x1347   :  { %v3255_v6 = vadd.f32 %v3254_v56, %v3226_v24 }
0x1349   :  { %v3260_v11 = vmax.f32 %v3255_v6, 0.0 }
0x134b   :  { %3468 = vmatmul.msk.f32.vlgmr.msrb.gmra.mxu0 %vm1094_vm4, %v3260_v11 }
0x1396   :  { %v3257_v10 = vpop.f32.mrf.mxu3 }
0x1397   :  { %v3258_v13 = vadd.f32 %v3257_v10, %v3226_v24 }
0x1399   :  { %v3261_v45 = vmax.f32 %v3258_v13, 0.0 }
0x139b   :  { %3469 = vmatmul.msk.f32.gmra.mxu0 %vm1094_vm4, %v3261_v45 }
0x13c8   :  { %v3290_v0 = vpop.f32.mrf.mxu0 }
0x13c9   :  { %v3291_v40 = vadd.f32 %v3290_v0, %v3266_v61 }
0x13cb   :  { %3297 = vst.msk [vmem:[%s5617_s3] sm:$0xff] %vm3296_vm12, %v3291_v40 }
0x1418   :  { %v3293_v48 = vpop.f32.mrf.mxu0 }
0x1419   :  { %v3294_v4 = vadd.f32 %v3293_v48, %v3266_v61 }
0x141b   :  { %3298 = vst.msk [vmem:[%s5617_s3 + $0x8] sm:$0xff] %vm3296_vm12, %v3294_v4 }

</bundles_post_ra>
